<compile_context>
chip_gen: v7x
topology: tpu7x:2x2x1
jax: 0.10.0
libtpu: 0.0.40
codegen_flags: <defaults>
</compile_context>

<pallas_src>
import jax
import jax.numpy as jnp
from jax.experimental import pallas as pl
from jax.experimental.pallas import tpu as pltpu

H, W = 60, 5                 # spatial size implied by fc1: in_features = 64 * 60 * 5
HW = H * W                   # 300
C1, C2 = 32, 64              # conv channel counts
KTAPS = 9                    # 3x3
HID = 128                    # fc1 hidden size
NUM_ACTIONS = 4
PAD = 8                      # lane padding so every tap offset (-6..6) is an in-bounds slice
TK = 3200                    # fc1 K-tile (multiple of 128; 19200 / 3200 = 6 steps)


# ----------------------------- Pallas kernels ------------------------------

def fused_conv_kernel(x9_ref, wmask_ref, w1_ref, b1_ref, w2_ref, b2_ref, o_ref):
    # x9_ref:    (1, 9, HW)   im2col of the 1-channel input (tap, flattened position)
    # wmask_ref: (2, HW)      f32 column-validity masks (row0: w>=1, row1: w<=W-2)
    # w1_ref:    (C1, 9)      b1_ref: (C1, 1)
    # w2_ref:    (C2, 9*C1)   b2_ref: (C2, 1)
    # o_ref:     (1, C2, HW)
    x9 = x9_ref[0]                                                   # (9, HW)
    y1 = jnp.dot(w1_ref[...], x9, preferred_element_type=jnp.float32)
    y1 = jnp.maximum(y1 + b1_ref[...], 0.0)                          # (C1, HW), stays in VMEM

    # In-VMEM im2col of y1 for conv2: zero-pad the flattened spatial axis so every
    # 3x3 tap offset is a static, in-bounds lane slice; mask W-boundary wraps.
    zpad = jnp.zeros((C1, PAD), jnp.float32)
    ypad = jnp.concatenate([zpad, y1, zpad], axis=1)                 # (C1, HW + 2*PAD)
    wm = wmask_ref[...]
    mask_l = wm[0:1, :]                                              # valid if w >= 1
    mask_r = wm[1:2, :]                                              # valid if w <= W-2

    pieces = []
    for kh in range(3):
        for kw in range(3):
            off = (kh - 1) * W + (kw - 1)
            piece = ypad[:, PAD + off: PAD + off + HW]               # (C1, HW)
            if kw == 0:
                piece = piece * mask_l
            elif kw == 2:
                piece = piece * mask_r
            pieces.append(piece)
    cols2 = jnp.concatenate(pieces, axis=0)                          # (9*C1, HW), K=288

    y2 = jnp.dot(w2_ref[...], cols2, preferred_element_type=jnp.float32)
    o_ref[0] = jnp.maximum(y2 + b2_ref[...], 0.0)                    # (C2, HW)


def fused_conv(x_cols, wmask, w1p, b1c, w2p, b2c):
    B = x_cols.shape[0]
    return pl.pallas_call(
        fused_conv_kernel,
        out_shape=jax.ShapeDtypeStruct((B, C2, HW), jnp.float32),
        grid_spec=pltpu.PrefetchScalarGridSpec(
            num_scalar_prefetch=0,
            grid=(B,),
            in_specs=[
                pl.BlockSpec((1, KTAPS, HW), lambda b: (b, 0, 0)),
                pl.BlockSpec((2, HW), lambda b: (0, 0)),
                pl.BlockSpec((C1, KTAPS), lambda b: (0, 0)),
                pl.BlockSpec((C1, 1), lambda b: (0, 0)),
                pl.BlockSpec((C2, KTAPS * C1), lambda b: (0, 0)),
                pl.BlockSpec((C2, 1), lambda b: (0, 0)),
            ],
            out_specs=pl.BlockSpec((1, C2, HW), lambda b: (b, 0, 0)),
        ),
        compiler_params=pltpu.CompilerParams(
            dimension_semantics=("parallel",)),
    )(x_cols, wmask, w1p, b1c, w2p, b2c)


def mlp_softmax_kernel(x_ref, w1_ref, b1_ref, w2_ref, b2_ref, o_ref, acc_ref):
    # K-tiled fc1 (bf16 weights, f32 accumulation) + fused fc2 + softmax on last step.
    # x_ref: (B, TK) f32   w1_ref: (TK, HID) bf16   b1_ref: (1, HID) f32
    # w2_ref: (HID, A) f32 b2_ref: (1, A) f32       o_ref: (B, A)   acc_ref: (B, HID) f32
    k = pl.program_id(0)

    @pl.when(k == 0)
    def _init():
        acc_ref[...] = jnp.zeros_like(acc_ref)

    acc_ref[...] += jnp.dot(x_ref[...].astype(jnp.bfloat16), w1_ref[...],
                            preferred_element_type=jnp.float32)

    @pl.when(k == pl.num_programs(0) - 1)
    def _finish():
        h = jnp.maximum(acc_ref[...] + b1_ref[...], 0.0)             # f32 relu
        logits = jnp.dot(h, w2_ref[...],
                         preferred_element_type=jnp.float32) + b2_ref[...]
        m = jnp.max(logits, axis=-1, keepdims=True)
        e = jnp.exp(logits - m)
        o_ref[...] = e / jnp.sum(e, axis=-1, keepdims=True)


def mlp_softmax(flat, w1_bf16, b1, w2, b2):
    B, F = flat.shape
    Hd = w1_bf16.shape[1]
    A = w2.shape[1]
    assert F % TK == 0
    nk = F // TK
    return pl.pallas_call(
        mlp_softmax_kernel,
        out_shape=jax.ShapeDtypeStruct((B, A), jnp.float32),
        grid_spec=pltpu.PrefetchScalarGridSpec(
            num_scalar_prefetch=0,
            grid=(nk,),
            in_specs=[
                pl.BlockSpec((B, TK), lambda k: (0, k)),
                pl.BlockSpec((TK, Hd), lambda k: (k, 0)),
                pl.BlockSpec((1, Hd), lambda k: (0, 0)),
                pl.BlockSpec((Hd, A), lambda k: (0, 0)),
                pl.BlockSpec((1, A), lambda k: (0, 0)),
            ],
            out_specs=pl.BlockSpec((B, A), lambda k: (0, 0)),
            scratch_shapes=[pltpu.VMEM((B, Hd), jnp.float32)],
        ),
        compiler_params=pltpu.CompilerParams(
            dimension_semantics=("arbitrary",)),
    )(flat, w1_bf16, b1, w2, b2)


# ------------------------------- JAX glue -----------------------------------

def im2col_input(x_nchw):
    """(B, 1, H, W) -> (B, 9, H*W) for conv1 (3x3, stride 1, padding 1). ~10 KB/img."""
    B = x_nchw.shape[0]
    xp = jnp.pad(x_nchw[:, 0], ((0, 0), (1, 1), (1, 1)))              # (B, H+2, W+2)
    taps = [xp[:, kh:kh + H, kw:kw + W].reshape(B, HW)
            for kh in range(3) for kw in range(3)]
    return jnp.stack(taps, axis=1)                                    # (B, 9, HW)


def init_params(key):
    """Deterministic params with PyTorch-native shapes (Conv2d: (Cout,Cin,3,3), Linear: (out,in))."""
    ks = jax.random.split(key, 8)

    def u(k, shape, fan_in):
        bound = 1.0 / jnp.sqrt(jnp.float32(fan_in))
        return jax.random.uniform(k, shape, jnp.float32, -bound, bound)

    return {
        "conv1_w": u(ks[0], (C1, 1, 3, 3), 1 * 9),
        "conv1_b": u(ks[1], (C1,), 1 * 9),
        "conv2_w": u(ks[2], (C2, C1, 3, 3), C1 * 9),
        "conv2_b": u(ks[3], (C2,), C1 * 9),
        "fc1_w": u(ks[4], (HID, C2 * HW), C2 * HW),
        "fc1_b": u(ks[5], (HID,), C2 * HW),
        "fc2_w": u(ks[6], (NUM_ACTIONS, HID), HID),
        "fc2_b": u(ks[7], (NUM_ACTIONS,), HID),
    }


def pack_params(p):
    """One-time weight packing OUTSIDE the jitted forward (transposes, tap packing, bf16)."""
    A = p["fc2_w"].shape[0]
    w_idx = jnp.arange(HW, dtype=jnp.int32) % W
    wmask = jnp.stack([(w_idx >= 1), (w_idx <= W - 2)]).astype(jnp.float32)   # (2, HW)
    return {
        "wmask":  wmask,
        # conv1: (C1,1,3,3) -> (C1, 9), column = kh*3+kw
        "w1p":    p["conv1_w"].reshape(C1, KTAPS),
        "b1c":    p["conv1_b"].reshape(C1, 1),
        # conv2: (C2,C1,3,3) -> (C2, 9*C1), column = (kh*3+kw)*C1 + cin
        "w2p":    jnp.transpose(p["conv2_w"], (0, 2, 3, 1)).reshape(C2, KTAPS * C1),
        "b2c":    p["conv2_b"].reshape(C2, 1),
        # fc1: flatten order is already PyTorch's (C,H,W) -> plain transpose, bf16 stream
        "fc1_wt": jnp.transpose(p["fc1_w"]).astype(jnp.bfloat16),     # (19200, 128)
        "fc1_b":  p["fc1_b"].reshape(1, HID),
        "fc2_wt": jnp.transpose(p["fc2_w"]).astype(jnp.float32),      # (128, A)
        "fc2_b":  p["fc2_b"].reshape(1, A),
    }


@jax.jit
def behavioral_model_forward(x_nchw, packed):
    B = x_nchw.shape[0]
    x_cols = im2col_input(x_nchw)                                     # (B, 9, HW)
    y2 = fused_conv(x_cols, packed["wmask"], packed["w1p"], packed["b1c"],
                    packed["w2p"], packed["b2c"])                     # (B, C2, HW)
    # Row-major reshape == PyTorch's x.view(B, -1) over (C, H, W); no transpose needed.
    flat = y2.reshape(B, C2 * HW)                                     # (B, 19200)
    return mlp_softmax(flat, packed["fc1_wt"], packed["fc1_b"],
                       packed["fc2_wt"], packed["fc2_b"])             # (B, A)


def reference_forward(x, p):
    """Pure-JAX f32 reference of the PyTorch module (padding=1)."""
    dn = ("NCHW", "OIHW", "NCHW")
    y = jax.lax.conv_general_dilated(x, p["conv1_w"], (1, 1), ((1, 1), (1, 1)),
                                     dimension_numbers=dn)
    y = jnp.maximum(y + p["conv1_b"][None, :, None, None], 0.0)
    y = jax.lax.conv_general_dilated(y, p["conv2_w"], (1, 1), ((1, 1), (1, 1)),
                                     dimension_numbers=dn)
    y = jnp.maximum(y + p["conv2_b"][None, :, None, None], 0.0)
    flat = y.reshape(y.shape[0], -1)
    h = jnp.maximum(flat @ p["fc1_w"].T + p["fc1_b"], 0.0)
    logits = h @ p["fc2_w"].T + p["fc2_b"]
    return jax.nn.softmax(logits, axis=1)


if __name__ == "__main__":
    key = jax.random.PRNGKey(0)
    k_params, k_x = jax.random.split(key)
    params = init_params(k_params)
    packed = pack_params(params)                       # one-time packing, outside jit

    x = jax.random.normal(k_x, (2, 1, H, W), jnp.float32)   # NCHW, batch=2, 1 channel, 60x5

    out = behavioral_model_forward(x, packed)
    out = jax.block_until_ready(out)

    assert out.shape == (2, NUM_ACTIONS)
    # probabilities sum to 1 per row
    assert bool(jnp.all(jnp.abs(jnp.sum(out, axis=1) - 1.0) < 1e-5))
    # cross-check against the pure-JAX f32 reference (loose tol: fc1 weights are bf16)
    ref = jax.block_until_ready(reference_forward(x, params))
    assert bool(jnp.max(jnp.abs(out - ref)) < 2e-2)
    print("KERNEL_OK")
</pallas_src>

<mosaic_0001>
module attributes {stable_mosaic.version = 11 : i64} {
  func.func @fused_conv_kernel(%arg0: i32, %arg1: memref<1x9x300xf32, #tpu.memory_space<vmem>>, %arg2: memref<2x300xf32, #tpu.memory_space<vmem>>, %arg3: memref<32x9xf32, #tpu.memory_space<vmem>>, %arg4: memref<32x1xf32, #tpu.memory_space<vmem>>, %arg5: memref<64x288xf32, #tpu.memory_space<vmem>>, %arg6: memref<64x1xf32, #tpu.memory_space<vmem>>, %arg7: memref<1x64x300xf32, #tpu.memory_space<vmem>>) attributes {dimension_semantics = [#tpu.dimension_semantics<parallel>], iteration_bounds = array<i64: 2>, scalar_prefetch = 0 : i64, scratch_operands = 0 : i64, tpu.core_type = #tpu.core_type<tc>, window_params = [{transform_indices = @transform_0, window_bounds = array<i64: 1, 9, 300>}, {pipeline_mode = #tpu.pipeline_mode<synchronous>, transform_indices = @transform_1, window_bounds = array<i64: 2, 300>}, {pipeline_mode = #tpu.pipeline_mode<synchronous>, transform_indices = @transform_2, window_bounds = array<i64: 32, 9>}, {pipeline_mode = #tpu.pipeline_mode<synchronous>, transform_indices = @transform_3, window_bounds = array<i64: 32, 1>}, {pipeline_mode = #tpu.pipeline_mode<synchronous>, transform_indices = @transform_4, window_bounds = array<i64: 64, 288>}, {pipeline_mode = #tpu.pipeline_mode<synchronous>, transform_indices = @transform_5, window_bounds = array<i64: 64, 1>}, {transform_indices = @transform_6, window_bounds = array<i64: 1, 64, 300>}]} {
    %c0 = arith.constant 0 : index
    %c0_0 = arith.constant 0 : index
    %c0_1 = arith.constant 0 : index
    %0 = vector.load %arg1[%c0, %c0_0, %c0_1] : memref<1x9x300xf32, #tpu.memory_space<vmem>>, vector<1x9x300xf32>
    %1 = vector.shape_cast %0 : vector<1x9x300xf32> to vector<9x300xf32>
    %c0_2 = arith.constant 0 : index
    %c0_3 = arith.constant 0 : index
    %2 = vector.load %arg3[%c0_2, %c0_3] : memref<32x9xf32, #tpu.memory_space<vmem>>, vector<32x9xf32>
    %cst = arith.constant dense<0.000000e+00> : vector<32x300xf32>
    %3 = tpu.matmul %2, %1, %cst {dimension_numbers = #tpu.dot_dimension_numbers<[1], [0], [0], [1], [0, 0, 1, 1], [], []>} : vector<32x9xf32>, vector<9x300xf32>, vector<32x300xf32> -> vector<32x300xf32>
    %c0_4 = arith.constant 0 : index
    %c0_5 = arith.constant 0 : index
    %4 = vector.load %arg4[%c0_4, %c0_5] : memref<32x1xf32, #tpu.memory_space<vmem>>, vector<32x1xf32>
    %5 = vector.broadcast %4 : vector<32x1xf32> to vector<32x300xf32>
    %6 = arith.addf %3, %5 : vector<32x300xf32>
    %cst_6 = arith.constant 0.000000e+00 : f32
    %7 = vector.broadcast %cst_6 : f32 to vector<32x300xf32>
    %8 = arith.maximumf %6, %7 : vector<32x300xf32>
    %cst_7 = arith.constant 0.000000e+00 : f32
    %9 = vector.broadcast %cst_7 : f32 to vector<32x8xf32>
    %10 = tpu.concatenate %9, %8, %9 in 1 : vector<32x8xf32>, vector<32x300xf32>, vector<32x8xf32> -> vector<32x316xf32>
    %c0_8 = arith.constant 0 : index
    %c0_9 = arith.constant 0 : index
    %11 = vector.load %arg2[%c0_8, %c0_9] : memref<2x300xf32, #tpu.memory_space<vmem>>, vector<2x300xf32>
    %12 = vector.extract_strided_slice %11 {offsets = [0, 0], sizes = [1, 300], strides = [1, 1]} : vector<2x300xf32> to vector<1x300xf32>
    %13 = vector.extract_strided_slice %11 {offsets = [1, 0], sizes = [1, 300], strides = [1, 1]} : vector<2x300xf32> to vector<1x300xf32>
    %14 = vector.extract_strided_slice %10 {offsets = [0, 2], sizes = [32, 300], strides = [1, 1]} : vector<32x316xf32> to vector<32x300xf32>
    %15 = vector.broadcast %12 : vector<1x300xf32> to vector<32x300xf32>
    %16 = arith.mulf %14, %15 : vector<32x300xf32>
    %17 = vector.extract_strided_slice %10 {offsets = [0, 3], sizes = [32, 300], strides = [1, 1]} : vector<32x316xf32> to vector<32x300xf32>
    %18 = vector.extract_strided_slice %10 {offsets = [0, 4], sizes = [32, 300], strides = [1, 1]} : vector<32x316xf32> to vector<32x300xf32>
    %19 = vector.broadcast %13 : vector<1x300xf32> to vector<32x300xf32>
    %20 = arith.mulf %18, %19 : vector<32x300xf32>
    %21 = vector.extract_strided_slice %10 {offsets = [0, 7], sizes = [32, 300], strides = [1, 1]} : vector<32x316xf32> to vector<32x300xf32>
    %22 = vector.broadcast %12 : vector<1x300xf32> to vector<32x300xf32>
    %23 = arith.mulf %21, %22 : vector<32x300xf32>
    %24 = vector.extract_strided_slice %10 {offsets = [0, 8], sizes = [32, 300], strides = [1, 1]} : vector<32x316xf32> to vector<32x300xf32>
    %25 = vector.extract_strided_slice %10 {offsets = [0, 9], sizes = [32, 300], strides = [1, 1]} : vector<32x316xf32> to vector<32x300xf32>
    %26 = vector.broadcast %13 : vector<1x300xf32> to vector<32x300xf32>
    %27 = arith.mulf %25, %26 : vector<32x300xf32>
    %28 = vector.extract_strided_slice %10 {offsets = [0, 12], sizes = [32, 300], strides = [1, 1]} : vector<32x316xf32> to vector<32x300xf32>
    %29 = vector.broadcast %12 : vector<1x300xf32> to vector<32x300xf32>
    %30 = arith.mulf %28, %29 : vector<32x300xf32>
    %31 = vector.extract_strided_slice %10 {offsets = [0, 13], sizes = [32, 300], strides = [1, 1]} : vector<32x316xf32> to vector<32x300xf32>
    %32 = vector.extract_strided_slice %10 {offsets = [0, 14], sizes = [32, 300], strides = [1, 1]} : vector<32x316xf32> to vector<32x300xf32>
    %33 = vector.broadcast %13 : vector<1x300xf32> to vector<32x300xf32>
    %34 = arith.mulf %32, %33 : vector<32x300xf32>
    %35 = tpu.concatenate %16, %17, %20, %23, %24, %27, %30, %31, %34 in 0 : vector<32x300xf32>, vector<32x300xf32>, vector<32x300xf32>, vector<32x300xf32>, vector<32x300xf32>, vector<32x300xf32>, vector<32x300xf32>, vector<32x300xf32>, vector<32x300xf32> -> vector<288x300xf32>
    %c0_10 = arith.constant 0 : index
    %c0_11 = arith.constant 0 : index
    %36 = vector.load %arg5[%c0_10, %c0_11] : memref<64x288xf32, #tpu.memory_space<vmem>>, vector<64x288xf32>
    %cst_12 = arith.constant dense<0.000000e+00> : vector<64x300xf32>
    %37 = tpu.matmul %36, %35, %cst_12 {dimension_numbers = #tpu.dot_dimension_numbers<[1], [0], [0], [1], [0, 0, 1, 1], [], []>} : vector<64x288xf32>, vector<288x300xf32>, vector<64x300xf32> -> vector<64x300xf32>
    %c0_13 = arith.constant 0 : index
    %c0_14 = arith.constant 0 : index
    %38 = vector.load %arg6[%c0_13, %c0_14] : memref<64x1xf32, #tpu.memory_space<vmem>>, vector<64x1xf32>
    %39 = vector.broadcast %38 : vector<64x1xf32> to vector<64x300xf32>
    %40 = arith.addf %37, %39 : vector<64x300xf32>
    %cst_15 = arith.constant 0.000000e+00 : f32
    %41 = vector.broadcast %cst_15 : f32 to vector<64x300xf32>
    %42 = arith.maximumf %40, %41 : vector<64x300xf32>
    %c0_16 = arith.constant 0 : index
    %c0_17 = arith.constant 0 : index
    %c0_18 = arith.constant 0 : index
    %43 = vector.load %arg7[%c0_16, %c0_17, %c0_18] : memref<1x64x300xf32, #tpu.memory_space<vmem>>, vector<1x64x300xf32>
    %44 = vector.shape_cast %43 : vector<1x64x300xf32> to vector<64x300xf32>
    %45 = vector.shape_cast %42 : vector<64x300xf32> to vector<1x64x300xf32>
    tpu.vector_store %arg7[%c0_16, %c0_17, %c0_18], %45 {strides = array<i32>} : memref<1x64x300xf32, #tpu.memory_space<vmem>>, vector<1x64x300xf32>,
    return
  }
  func.func @transform_0(%arg0: i32) -> (i32, i32, i32) {
    %c0_i32 = arith.constant 0 : i32
    %c0_i32_0 = arith.constant 0 : i32
    %c0_i32_1 = arith.constant 0 : i32
    return %arg0, %c0_i32, %c0_i32_0 : i32, i32, i32
  }
  func.func @transform_1(%arg0: i32) -> (i32, i32) {
    %c0_i32 = arith.constant 0 : i32
    %c0_i32_0 = arith.constant 0 : i32
    %c0_i32_1 = arith.constant 0 : i32
    return %c0_i32, %c0_i32_0 : i32, i32
  }
  func.func @transform_2(%arg0: i32) -> (i32, i32) {
    %c0_i32 = arith.constant 0 : i32
    %c0_i32_0 = arith.constant 0 : i32
    %c0_i32_1 = arith.constant 0 : i32
    return %c0_i32, %c0_i32_0 : i32, i32
  }
  func.func @transform_3(%arg0: i32) -> (i32, i32) {
    %c0_i32 = arith.constant 0 : i32
    %c0_i32_0 = arith.constant 0 : i32
    %c0_i32_1 = arith.constant 0 : i32
    return %c0_i32, %c0_i32_0 : i32, i32
  }
  func.func @transform_4(%arg0: i32) -> (i32, i32) {
    %c0_i32 = arith.constant 0 : i32
    %c0_i32_0 = arith.constant 0 : i32
    %c0_i32_1 = arith.constant 0 : i32
    return %c0_i32, %c0_i32_0 : i32, i32
  }
  func.func @transform_5(%arg0: i32) -> (i32, i32) {
    %c0_i32 = arith.constant 0 : i32
    %c0_i32_0 = arith.constant 0 : i32
    %c0_i32_1 = arith.constant 0 : i32
    return %c0_i32, %c0_i32_0 : i32, i32
  }
  func.func @transform_6(%arg0: i32) -> (i32, i32, i32) {
    %c0_i32 = arith.constant 0 : i32
    %c0_i32_0 = arith.constant 0 : i32
    %c0_i32_1 = arith.constant 0 : i32
    return %arg0, %c0_i32, %c0_i32_0 : i32, i32, i32
  }
}

module attributes {stable_mosaic.version = 11 : i64} {
  func.func @mlp_softmax_kernel(%arg0: i32, %arg1: memref<2x3200xf32, #tpu.memory_space<vmem>>, %arg2: memref<3200x128xbf16, #tpu.memory_space<vmem>>, %arg3: memref<1x128xf32, #tpu.memory_space<vmem>>, %arg4: memref<128x4xf32, #tpu.memory_space<vmem>>, %arg5: memref<1x4xf32, #tpu.memory_space<vmem>>, %arg6: memref<2x4xf32, #tpu.memory_space<vmem>>, %arg7: memref<2x128xf32, #tpu.memory_space<vmem>>) attributes {dimension_semantics = [#tpu.dimension_semantics<arbitrary>], iteration_bounds = array<i64: 6>, scalar_prefetch = 0 : i64, scratch_operands = 1 : i64, tpu.core_type = #tpu.core_type<tc>, window_params = [{transform_indices = @transform_0, window_bounds = array<i64: 2, 3200>}, {transform_indices = @transform_1, window_bounds = array<i64: 3200, 128>}, {pipeline_mode = #tpu.pipeline_mode<synchronous>, transform_indices = @transform_2, window_bounds = array<i64: 1, 128>}, {pipeline_mode = #tpu.pipeline_mode<synchronous>, transform_indices = @transform_3, window_bounds = array<i64: 128, 4>}, {pipeline_mode = #tpu.pipeline_mode<synchronous>, transform_indices = @transform_4, window_bounds = array<i64: 1, 4>}, {pipeline_mode = #tpu.pipeline_mode<synchronous>, transform_indices = @transform_5, window_bounds = array<i64: 2, 4>}]} {
    %c0_i32 = arith.constant 0 : i32
    %0 = arith.cmpi eq, %arg0, %c0_i32 : i32
    %1 = arith.extui %0 : i1 to i32
    %c0_i32_0 = arith.constant 0 : i32
    %2 = arith.cmpi ne, %1, %c0_i32_0 : i32
    scf.if %2 {
      %cst_9 = arith.constant 0.000000e+00 : f32
      %13 = vector.broadcast %cst_9 : f32 to vector<2x128xf32>
      %c0_10 = arith.constant 0 : index
      %c0_11 = arith.constant 0 : index
      %14 = vector.load %arg7[%c0_10, %c0_11] : memref<2x128xf32, #tpu.memory_space<vmem>>, vector<2x128xf32>
      tpu.vector_store %arg7[%c0_10, %c0_11], %13 {strides = array<i32>} : memref<2x128xf32, #tpu.memory_space<vmem>>, vector<2x128xf32>,
    } else {
    }
    %c0 = arith.constant 0 : index
    %c0_1 = arith.constant 0 : index
    %3 = vector.load %arg7[%c0, %c0_1] : memref<2x128xf32, #tpu.memory_space<vmem>>, vector<2x128xf32>
    %c0_2 = arith.constant 0 : index
    %c0_3 = arith.constant 0 : index
    %4 = vector.load %arg1[%c0_2, %c0_3] : memref<2x3200xf32, #tpu.memory_space<vmem>>, vector<2x3200xf32>
    %5 = arith.truncf %4 : vector<2x3200xf32> to vector<2x3200xbf16>
    %c0_4 = arith.constant 0 : index
    %c0_5 = arith.constant 0 : index
    %6 = vector.load %arg2[%c0_4, %c0_5] : memref<3200x128xbf16, #tpu.memory_space<vmem>>, vector<3200x128xbf16>
    %cst = arith.constant dense<0.000000e+00> : vector<2x128xf32>
    %7 = tpu.matmul %5, %6, %cst {dimension_numbers = #tpu.dot_dimension_numbers<[1], [0], [0], [1], [0, 0, 1, 1], [], []>} : vector<2x3200xbf16>, vector<3200x128xbf16>, vector<2x128xf32> -> vector<2x128xf32>
    %8 = arith.addf %3, %7 : vector<2x128xf32>
    %c0_6 = arith.constant 0 : index
    %c0_7 = arith.constant 0 : index
    %9 = vector.load %arg7[%c0_6, %c0_7] : memref<2x128xf32, #tpu.memory_space<vmem>>, vector<2x128xf32>
    tpu.vector_store %arg7[%c0_6, %c0_7], %8 {strides = array<i32>} : memref<2x128xf32, #tpu.memory_space<vmem>>, vector<2x128xf32>,
    %c5_i32 = arith.constant 5 : i32
    %10 = arith.cmpi eq, %arg0, %c5_i32 : i32
    %11 = arith.extui %10 : i1 to i32
    %c0_i32_8 = arith.constant 0 : i32
    %12 = arith.cmpi ne, %11, %c0_i32_8 : i32
    scf.if %12 {
      %c0_9 = arith.constant 0 : index
      %c0_10 = arith.constant 0 : index
      %13 = vector.load %arg7[%c0_9, %c0_10] : memref<2x128xf32, #tpu.memory_space<vmem>>, vector<2x128xf32>
      %c0_11 = arith.constant 0 : index
      %c0_12 = arith.constant 0 : index
      %14 = vector.load %arg3[%c0_11, %c0_12] : memref<1x128xf32, #tpu.memory_space<vmem>>, vector<1x128xf32>
      %15 = vector.broadcast %14 : vector<1x128xf32> to vector<2x128xf32>
      %16 = arith.addf %13, %15 : vector<2x128xf32>
      %cst_13 = arith.constant 0.000000e+00 : f32
      %17 = vector.broadcast %cst_13 : f32 to vector<2x128xf32>
      %18 = arith.maximumf %16, %17 : vector<2x128xf32>
      %c0_14 = arith.constant 0 : index
      %c0_15 = arith.constant 0 : index
      %19 = vector.load %arg4[%c0_14, %c0_15] : memref<128x4xf32, #tpu.memory_space<vmem>>, vector<128x4xf32>
      %cst_16 = arith.constant dense<0.000000e+00> : vector<2x4xf32>
      %20 = tpu.matmul %18, %19, %cst_16 {dimension_numbers = #tpu.dot_dimension_numbers<[1], [0], [0], [1], [0, 0, 1, 1], [], []>} : vector<2x128xf32>, vector<128x4xf32>, vector<2x4xf32> -> vector<2x4xf32>
      %c0_17 = arith.constant 0 : index
      %c0_18 = arith.constant 0 : index
      %21 = vector.load %arg5[%c0_17, %c0_18] : memref<1x4xf32, #tpu.memory_space<vmem>>, vector<1x4xf32>
      %22 = vector.broadcast %21 : vector<1x4xf32> to vector<2x4xf32>
      %23 = arith.addf %20, %22 : vector<2x4xf32>
      %cst_19 = arith.constant dense<0xFF800000> : vector<2xf32>
      %24 = vector.multi_reduction <maximumf>, %23, %cst_19 [1] : vector<2x4xf32> to vector<2xf32>
      %25 = vector.shape_cast %24 : vector<2xf32> to vector<2x1xf32>
      %26 = vector.broadcast %25 : vector<2x1xf32> to vector<2x4xf32>
      %27 = arith.subf %23, %26 : vector<2x4xf32>
      %28 = math.exp %27 : vector<2x4xf32>
      %cst_20 = arith.constant dense<0.000000e+00> : vector<2xf32>
      %29 = vector.multi_reduction <add>, %28, %cst_20 [1] : vector<2x4xf32> to vector<2xf32>
      %30 = vector.shape_cast %29 : vector<2xf32> to vector<2x1xf32>
      %31 = vector.broadcast %30 : vector<2x1xf32> to vector<2x4xf32>
      %32 = arith.divf %28, %31 : vector<2x4xf32>
      %c0_21 = arith.constant 0 : index
      %c0_22 = arith.constant 0 : index
      %33 = vector.load %arg6[%c0_21, %c0_22] : memref<2x4xf32, #tpu.memory_space<vmem>>, vector<2x4xf32>
      tpu.vector_store %arg6[%c0_21, %c0_22], %32 {strides = array<i32>} : memref<2x4xf32, #tpu.memory_space<vmem>>, vector<2x4xf32>,
    } else {
    }
    return
  }
  func.func @transform_0(%arg0: i32) -> (i32, i32) {
    %c0_i32 = arith.constant 0 : i32
    %c0_i32_0 = arith.constant 0 : i32
    return %c0_i32, %arg0 : i32, i32
  }
  func.func @transform_1(%arg0: i32) -> (i32, i32) {
    %c0_i32 = arith.constant 0 : i32
    %c0_i32_0 = arith.constant 0 : i32
    return %arg0, %c0_i32 : i32, i32
  }
  func.func @transform_2(%arg0: i32) -> (i32, i32) {
    %c0_i32 = arith.constant 0 : i32
    %c0_i32_0 = arith.constant 0 : i32
    %c0_i32_1 = arith.constant 0 : i32
    return %c0_i32, %c0_i32_0 : i32, i32
  }
  func.func @transform_3(%arg0: i32) -> (i32, i32) {
    %c0_i32 = arith.constant 0 : i32
    %c0_i32_0 = arith.constant 0 : i32
    %c0_i32_1 = arith.constant 0 : i32
    return %c0_i32, %c0_i32_0 : i32, i32
  }
  func.func @transform_4(%arg0: i32) -> (i32, i32) {
    %c0_i32 = arith.constant 0 : i32
    %c0_i32_0 = arith.constant 0 : i32
    %c0_i32_1 = arith.constant 0 : i32
    return %c0_i32, %c0_i32_0 : i32, i32
  }
  func.func @transform_5(%arg0: i32) -> (i32, i32) {
    %c0_i32 = arith.constant 0 : i32
    %c0_i32_0 = arith.constant 0 : i32
    %c0_i32_1 = arith.constant 0 : i32
    return %c0_i32, %c0_i32_0 : i32, i32
  }
}

</mosaic_0001>

<bundles_post_ra>
// kernel: behavioral_model_forward.2
= control target key start
LH: loop header
LB: loop body
LE: loop exit
PB: predicated region body
PF: predicated region fallthrough
CT: control target
= control target key end

     0   :  { %11 = vsyncpa [#allocation3], 0  ;;  %s4614_s0 = inlined_call_operand.vmem [shape: f32[2,9,300], index: 0, kind: input, shape index: {}]   ;;  %s4615_s1 = inlined_call_operand.hbm [shape: f32[2,300], index: 1, kind: input, shape index: {}]   ;;  %s4616_s2 = inlined_call_operand.vmem [shape: f32[32,9], index: 2, kind: input, shape index: {}]   ;;  %s4617_s3 = inlined_call_operand.vmem [shape: f32[32,1], index: 3, kind: input, shape index: {}]   ;;  %s4618_s4 = inlined_call_operand.hbm [shape: f32[64,288], index: 4, kind: input, shape index: {}]   ;;  %s4619_s5 = inlined_call_operand.vmem [shape: f32[64,1], index: 5, kind: input, shape index: {}]   ;;  %s4620_s6 = inlined_call_operand.vmem [shape: f32[2,64,300], index: 6, kind: output, shape index: {}]  }
   0x1   :  { %12 = vsyncpa [#allocation5], 0  ;;  %s3185_s21 = smov 0  }
   0x2 LB: > { %s3191_s22 = sadd.s32 4294967295, %s3126_s21   ;;  %p2195_p0 = scmp.ge.s32.totalorder %s3126_s21, 1  ;;  %s3126_s21 = sphi %s3185_s21, %s18_s21  }
   0x3   : > { %p180_p1 = scmp.lt.s32.totalorder %s3126_s21, 3  ;;  %p4621_p2 = scmp.eq.s32.totalorder %s3191_s22, 0 }
   0x4   : > { %s3128_s23 = smov [#allocation2]   ;;  %s3129_s26 = smov [#allocation4]  }
   0x5   : > { %s193_s24 = sshll.u32 %s3128_s23, 4  ;;  %p3196_p3 = pnand %p2195_p0, %p180_p1  ;;  %s194_s24 = int_to_ptr.vmem [resolvable:$true] %s193_s24 }
   0x6   : > { %s209_s27 = sshll.u32 %s3129_s26, 4  ;;  %s3056_s7 = scalar_lea.hbm %s4615_s1, 96  ;;  %s3208_s27 = int_to_ptr.vmem [resolvable:$true] %s209_s27 }
   0x7   : > { %s4634_s25 = scalar_select %p3196_p3, 1, 0 }
   0x8   : > { %p2503_p4 = pneg %p3196_p3  ;;  %p3057_p6 = scmp.ne.s32.totalorder %s4615_s1, %s3056_s7 }
   0x9   : > { %p3063_p10 = scmp.lt.u32.totalorder %s3056_s7, %s4615_s1 }
   0xa   : > { %p3204_p5 = pnand %p4621_p2, %p2503_p4 }
   0xc   : > { %p3058_p7 = pneg %p3204_p5 }
   0xe   : > { %p3059_p8 = pnand %p3058_p7, %p3057_p6 }
  0x10   : > { %p3060_p9 = pneg %p3059_p8 }
  0x12   : > { %p3065_p11 = pnand %p3063_p10, %p3060_p9 }
  0x14   : > { %3068 = shalt.err (!%p3065_p11)
}
  0x15   : > { %s3069_s12 = scalar_lea.vmem %s194_s24, 96  ;;  %p3077_p1 = scmp.lt.s32.totalorder %s194_s24, %s194_s24 }
  0x16   : > { %p3070_p12 = scmp.ne.s32.totalorder %s194_s24, %s3069_s12  ;;  %p3078_p4 = scmp.lt.s32.totalorder %s3069_s12, %s3069_s12 }
  0x18   : > { %p3072_p13 = pnand %p3070_p12, %p3058_p7  ;;  %p3079_p2 = por %p3078_p4, %p3077_p1 }
  0x1a   : > { %p3073_p0 = pneg %p3072_p13 }
  0x1c   : > { %p3080_p3 = pnand %p3079_p2, %p3073_p0 }
  0x1e   : > { %3083 = shalt.err (!%p3080_p3)
}
  0x1f   : > { %2506 = dma.hbm_to_vmem [thread:$0]  (!%p3204_p5), %s4615_s1, 96, %s194_s24, [#allocation3]  }
  0x20   : > { %s3084_s17 = scalar_lea.hbm %s4618_s4, 3072 }
  0x21   : > { %p3085_p6 = scmp.ne.s32.totalorder %s4618_s4, %s3084_s17  ;;  %p3091_p3 = scmp.lt.u32.totalorder %s3084_s17, %s4618_s4 }
  0x23   : > { %p3087_p8 = pnand %p3085_p6, %p3058_p7 }
  0x25   : > { %p3088_p2 = pneg %p3087_p8 }
  0x27   : > { %p3093_p9 = pnand %p3091_p3, %p3088_p2 }
  0x29   : > { %3096 = shalt.err (!%p3093_p9)
}
  0x2a   : > { %s3097_s24 = scalar_lea.vmem %s3208_s27, 3072  ;;  %p3105_p13 = scmp.lt.s32.totalorder %s3208_s27, %s3208_s27 }
  0x2b   : > { %p3098_p10 = scmp.ne.s32.totalorder %s3208_s27, %s3097_s24  ;;  %p3106_p0 = scmp.lt.s32.totalorder %s3097_s24, %s3097_s24 }
  0x2d   : > { %p3100_p11 = pnand %p3098_p10, %p3058_p7  ;;  %p3107_p1 = por %p3106_p0, %p3105_p13 }
  0x2f   : > { %p3101_p12 = pneg %p3100_p11 }
  0x31   : > { %p3108_p4 = pnand %p3107_p1, %p3101_p12 }
  0x33   : > { %3111 = shalt.err (!%p3108_p4)
}
  0x34   : > { %s3130_s26 = smov 384   ;;  %s3131_s29 = smov 24  }
  0x35   : > { %2509 = dma.hbm_to_vmem [thread:$0]  (!%p3204_p5), %s4618_s4, 3072, %s3208_s27, [#allocation5], %s3130_s26, %s3130_s26, %s3131_s29  }
  0x36   : > { %p4636_p6 = scmp.ne.s32.totalorder %s4634_s25, 0 }
  0x37   : > { %p4637_p7 = scmp.eq.s32.totalorder (!%p4636_p6), %s3191_s22, 0 }
  0x38   : > { %236 = sbr.rel (%p4636_p6) target bundleno = 1065 (0x429), region = 44 }
  0x3f   : > { %3117 = dma.done.wait (%p4637_p7), [#allocation3], 96   ;;  %p4638_p8 = pmov %p4637_p7 }
  0x40   : > { %p4639_p2 = pmov %p4637_p7 }
  0x41   : > { %3119 = vsyncadd (%p4638_p8), [#allocation3], 4294967200 }
  0x42   : > { %3121 = dma.done.wait (%p4639_p2), [#allocation5], 3072   ;;  %p4640_p3 = pmov %p4639_p2 }
  0x43   : > { %p270_p9 = scmp.lt.s32.totalorder %s3191_s22, 1  ;;  %v4623_v0 = vmov 0.0   ;;  %v591_v1 = vlaneseq  ;;  %v3133_v2 = vmov 0   ;;  %vm327_vm0 = vcmask 1040384   ;;  %v286_v15 = vld [vmem:[%s4616_s2] sm:$0xff]  ;;  %v292_v18 = vld [vmem:[%s4617_s3 + $0x10] sm:$0xff] }
  0x44   : > { %3123 = vsyncadd (%p4640_p3), [#allocation5], 4294964224  ;;  %401 = vmatprep.mubr.f32.mxu0 %v4623_v0  ;;  %2544 = vset.pattern.permute.xlu0 %v3133_v2  ;;  %vm3134_vm1 = vmmov 1   ;;  %vm314_vm3 = vcmask 72704   ;;  %v290_v17 = vld [vmem:[%s4617_s3] sm:$0xff]  ;;  %v287_v20 = vld [vmem:[%s4616_s2 + $0x8] sm:$0xff] }
  0x45   : > { %s4662_s22 = smov (!%p270_p9, %s3191_s22), 1  ;;  %2545 = vset.pattern.permute.xlu1 %v3133_v2  ;;  %v3273_v3 = vshrl.u32 %v591_v1, 7  ;;  %vm3278_vm2 = vmpackc.low %vm327_vm0, %vm3134_vm1  ;;  %2311 = vmatprep.mubr.msk.f32.mxu1 %vm314_vm3, %v286_v15  ;;  %v589_v19 = vld [vmem:[#allocation2] sm:$0x3f]  ;;  %v288_v22 = vld [vmem:[%s4616_s2 + $0x10] sm:$0xff]  ;;  %s3135_s30 = smov 14  }
  0x46   : > { %s2493_s25 = smul.u32 48, %s4662_s22  ;;  %296 = vperm.xlu0 %2544, %v290_v17   ;;  %v291_v23 = vld [vmem:[%s4617_s3 + $0x8] sm:$0xff]  ;;  %306 = vperm.xlu1 %2545, %v292_v18   ;;  %v293_v26 = vld [vmem:[%s4617_s3 + $0x18] sm:$0xff]  ;;  %s3136_s7 = smov 4   ;;  %vm681_vm4 = vcmask 31744   ;;  %vm559_vm5 = vcmask 64512  }
  0x47   : > { %v651_v12 = vsub.s32 3, %v3273_v3  ;;  %v647_v16 = vsub.s32 1, %v3273_v3  ;;  %v655_v25 = vsub.s32 5, %v3273_v3  ;;  %v289_v27 = vld [vmem:[%s4616_s2 + $0x18] sm:$0xff]  ;;  %v593_v29 = vsub.s32 0, %v3273_v3  ;;  %s3138_s27 = smov 9  }
  0x48   : > { %s274_s8 = scalar_lea.vmem %s4614_s0, %s2493_s25  ;;  %v601_v33 = vsub.s32 4, %v3273_v3  ;;  %v597_v37 = vsub.s32 2, %v3273_v3  ;;  %s3137_s25 = smov 7   ;;  %vm584_vm6 = vcmask 424960   ;;  %vm776_vm7 = vcmask 113664  }
  0x49   : > { %v281_v5 = vld [vmem:[%s274_s8 + $0x8] sm:$0xff]  ;;  %v284_v6 = vld [vmem:[%s274_s8 + $0x20] sm:$0x1]  ;;  %v282_v7 = vld [vmem:[%s274_s8 + $0x10] sm:$0xff]  ;;  %v652_v21 = vrot.slane %v589_v19, %v651_v12  ;;  %v648_v24 = vrot.slane %v589_v19, %v647_v16  ;;  %v656_v31 = vrot.slane %v589_v19, %v655_v25  ;;  %v594_v32 = vrot.slane %v589_v19, %v593_v29  ;;  %s3139_s28 = smov 12   ;;  %s3141_s9 = smov 8  }
  0x4a   : > { %v2337_v8 = vpack.c.bf16 %v284_v6, %v281_v5  ;;  %v285_v9 = vld [vmem:[%s274_s8 + $0x28] sm:$0x1]  ;;  %v280_v10 = vld [vmem:[%s274_s8] sm:$0xff]  ;;  %v283_v11 = vld [vmem:[%s274_s8 + $0x18] sm:$0x1]  ;;  %301 = vperm.xlu0 %2544, %v291_v23   ;;  %311 = vperm.xlu1 %2545, %v293_v26   ;;  %v602_v36 = vrot.slane %v589_v19, %v601_v33  ;;  %v598_v39 = vrot.slane %v589_v19, %v597_v37  ;;  %s3140_s8 = smov 2  }
  0x4b   : > { %v2343_v13 = vpack.c.bf16 %v285_v9, %v282_v7  ;;  %v2340_v14 = vpack.c.bf16 %v283_v11, %v280_v10  ;;  %v667_v28 = vrot.slane %v652_v21, %v647_v16  ;;  %v663_v30 = vrot.slane %v648_v24, %v647_v16  ;;  %s3142_s10 = smov 127   ;;  %s3143_s11 = smov 126  }
  0x4c   : > { %2339 = vmatprep.subr.msk.bf16.mxu0 %vm3278_vm2, %v2337_v8  ;;  %v671_v34 = vrot.slane %v656_v31, %v647_v16  ;;  %v609_v35 = vrot.slane %v594_v32, %v593_v29  ;;  %v617_v38 = vrot.slane %v602_v36, %v593_v29  ;;  %v613_v40 = vrot.slane %v598_v39, %v593_v29  ;;  %s3144_s12 = smov 116   ;;  %s3145_s13 = smov 123  }
  0x4d   : > { %2345 = vmatprep.subr.msk.bf16.mxu1 %vm3278_vm2, %v2343_v13  ;;  %2342 = vmatpush1.bf16.msk.msra.mxu0 %vm3278_vm2, %v2340_v14  ;;  %vm627_vm8 = vcmask 15360   ;;  %vm705_vm9 = vcmask 56320   ;;  %s3146_s14 = smov 117   ;;  %s3147_s15 = smov 122   ;;  %vm752_vm10 = vcmask 97280   ;;  %vm826_vm11 = vcmask 1039360  }
  0x4e   : > { %2348 = vmatpush3.bf16.msk.msra.mxu1 %vm3278_vm2, %v2343_v13  ;;  %772 = vrot.lane.b32.xlu0 %v667_v28, %s3135_s30  ;;  %s3148_s16 = smov 121   ;;  %s3149_s17 = smov 118   ;;  %vm871_vm12 = vcmask 1031168   ;;  %vm1117_vm13 = vcmask 949248   ;;  %vm916_vm14 = vcmask 1006592   ;;  %vm949_vm15 = vcmask 998400  }
  0x4f   : > { %770 = vrot.lane.b32.xlu1 %v663_v30, %s3135_s30  ;;  %vm994_vm0 = vcmask 990208   ;;  %vm1072_vm1 = vcmask 957440   ;;  %vm1039_vm2 = vcmask 965632  }
  0x50   : > { %2206 = vmatmul.mubr.msk.f32.vlgmr.msra.gmra.mrb[0].mxu0 %vm314_vm3, %v286_v15 }
  0x51   : > { %2312 = vmatmul.mubr.msk.f32.vlgmr.msra.gmra.mrb[0].mxu1 %vm314_vm3, %v287_v20  ;;  %407 = vmatprep.mubr.f32.mxu0 %v4623_v0 }
  0x52   : > { %2314 = vmatprep.mubr.msk.f32.mxu1 %vm314_vm3, %v288_v22  ;;  %677 = vrot.lane.b32.xlu0 %v667_v28, %s3136_s7 }
  0x53   : > { %774 = vrot.lane.b32.xlu1 %v671_v34, %s3135_s30 }
  0x54   : > { %2207 = vmatmul.mubr.msk.f32.gmra.mrb[2].mxu0 %vm314_vm3, %v287_v20 }
  0x55   : > { %2315 = vmatmul.mubr.msk.f32.gmra.mrb[2].mxu1 %vm314_vm3, %v289_v27  ;;  %413 = vmatprep.mubr.f32.mxu0 %v4623_v0 }
  0x56   : > { %1808 = vmatprep.mubr.f32.mxu1 %v4623_v0  ;;  %699 = vrot.lane.b32.xlu0 %v609_v35, %s3137_s25 }
  0x57   : > { %675 = vrot.lane.b32.xlu1 %v663_v30, %s3136_s7 }
  0x58   : > { %2208 = vmatmul.mubr.msk.f32.gmra.mrb[4].mxu0 %vm314_vm3, %v288_v22 }
  0x59   : > { %419 = vmatprep.mubr.f32.mxu0 %v4623_v0 }
  0x5a   : > { %703 = vrot.lane.b32.xlu0 %v617_v38, %s3137_s25 }
  0x5b   : > { %679 = vrot.lane.b32.xlu1 %v671_v34, %s3136_s7 }
  0x5c   : > { %2209 = vmatmul.mubr.msk.f32.gmra.mrb[6].mxu0 %vm314_vm3, %v289_v27 }
  0x5e   : > { %727 = vrot.lane.b32.xlu0 %v671_v34, %s3138_s27 }
  0x5f   : > { %701 = vrot.lane.b32.xlu1 %v613_v40, %s3137_s25 }
  0x62   : > { %750 = vrot.lane.b32.xlu0 %v617_v38, %s3139_s28 }
  0x63   : > { %725 = vrot.lane.b32.xlu1 %v667_v28, %s3138_s27 }
  0x66   : > { %621 = vrot.lane.b32.xlu0 %v609_v35, %s3140_s8 }
  0x67   : > { %748 = vrot.lane.b32.xlu1 %v613_v40, %s3139_s28 }
  0x6a   : > { %746 = vrot.lane.b32.xlu0 %v609_v35, %s3139_s28 }
  0x6b   : > { %723 = vrot.lane.b32.xlu1 %v663_v30, %s3138_s27 }
  0x6f   : > { %623 = vrot.lane.b32.xlu1 %v613_v40, %s3140_s8 }
  0x73   : > { %625 = vrot.lane.b32.xlu1 %v617_v38, %s3140_s8 }
  0xc5   : > { %v297_v41 = vpop.permute.xlu0 %296  ;;  %v307_v42 = vpop.permute.xlu1 %306 }
  0xc9   : > { %v302_v43 = vpop.permute.xlu0 %301  ;;  %v312_v60 = vpop.permute.xlu1 %311 }
  0xcd   : > { %v3344_v18 = vpop.permute.xlu1 %770  ;;  %v773_v20 = vpop.permute.xlu0 %772 }
  0xd1   : > { %v775_v19 = vpop.permute.xlu1 %774  ;;  %v678_v22 = vpop.permute.xlu0 %677 }
  0xd5   : > { %v3346_v21 = vpop.permute.xlu1 %675  ;;  %v3348_v24 = vpop.permute.xlu0 %699 }
  0xd6   : > { %v3365_v40 = vsel %vm681_vm4, %v3346_v21, %v678_v22 }
  0xd9   : > { %v680_v23 = vpop.permute.xlu1 %679  ;;  %v704_v26 = vpop.permute.xlu0 %703 }
  0xdd   : > { %v702_v25 = vpop.permute.xlu1 %701  ;;  %v3352_v28 = vpop.permute.xlu0 %727 }
  0xe1   : > { %v3350_v27 = vpop.permute.xlu1 %725  ;;  %v3356_v30 = vpop.permute.xlu0 %750 }
  0xe5   : > { %v3354_v29 = vpop.permute.xlu1 %748  ;;  %v3360_v32 = vpop.permute.xlu0 %621 }
  0xe9   : > { %v3358_v31 = vpop.permute.xlu1 %723  ;;  %v3362_v34 = vpop.permute.xlu0 %746 }
  0xed   : > { %v624_v33 = vpop.permute.xlu1 %623 }
  0xf1   : > { %v626_v35 = vpop.permute.xlu1 %625 }
 0x123   : > { %v403_v44 = vpop.f32.mrb[0].mxu0 }
 0x124   : > { %v404_v45 = vadd.f32 %v403_v44, %v297_v41  ;;  %v2313_v46 = vpop.f32.mrb[0].mxu1  ;;  %v405_v47 = vpop.f32.mrb[1].mxu0  ;;  %v3374_v44 = vsel %vm681_vm4, %v678_v22, %v680_v23  ;;  %vm2093_vm4 = vcmask 359424  }
 0x125   : > { %v498_v48 = vadd.f32 %v2313_v46, %v302_v43  ;;  %v492_v49 = vpop.f32.mrb[1].mxu1  ;;  %v406_v53 = vadd.f32 %v405_v47, %v297_v41 }
 0x126   : > { %v511_v50 = vmax.f32 %v404_v45, 0.0  ;;  %v493_v51 = vadd.f32 %v492_v49, %v297_v41 }
 0x127   : > { %v516_v52 = vmax.f32 %v498_v48, 0.0  ;;  %v409_v54 = vpop.f32.mrb[2].mxu0  ;;  %v512_v61 = vmax.f32 %v406_v53, 0.0 }
 0x128   : > { %v411_v55 = vpop.f32.mrb[3].mxu0  ;;  %535 = vrot.lane.b32.xlu0 %v511_v50, %s3141_s9  ;;  %v2316_v56 = vpop.f32.mrb[2].mxu1  ;;  %v513_v58 = vmax.f32 %v493_v51, 0.0  ;;  %v410_v62 = vadd.f32 %v409_v54, %v302_v43  ;;  %v3386_v50 = vsel %vm776_vm7, %v3344_v18, %v773_v20  ;;  %v3388_v51 = vsel %vm776_vm7, %v773_v20, %v775_v19 }
 0x129   : > { %545 = vrot.lane.b32.xlu1 %v516_v52, %s3141_s9  ;;  %v502_v57 = vpop.f32.mrb[3].mxu1  ;;  %v412_v59 = vadd.f32 %v411_v55, %v302_v43  ;;  %v508_v3 = vadd.f32 %v2316_v56, %v312_v60  ;;  %v3392_v52 = vsel %vm627_vm8, %v3360_v32, %v624_v33  ;;  %v3396_v54 = vsel %vm627_vm8, %v624_v33, %v626_v35 }
 0x12a   : > { %v503_v1 = vadd.f32 %v502_v57, %v307_v42  ;;  %v514_v5 = vmax.f32 %v410_v62, 0.0 }
 0x12b   : > { %v415_v63 = vpop.f32.mrb[4].mxu0  ;;  %v515_v4 = vmax.f32 %v412_v59, 0.0  ;;  %v522_v11 = vmax.f32 %v508_v3, 0.0 }
 0x12c   : > { %539 = vrot.lane.b32.xlu0 %v513_v58, %s3141_s9  ;;  %v417_v2 = vpop.f32.mrb[5].mxu0  ;;  %v519_v7 = vmax.f32 %v503_v1, 0.0  ;;  %v416_v8 = vadd.f32 %v415_v63, %v307_v42  ;;  %v3415_v63 = vsel %vm705_vm9, %v3348_v24, %v702_v25  ;;  %v3418_v1 = vsel %vm705_vm9, %v702_v25, %v704_v26 }
 0x12d   : > { %537 = vrot.lane.b32.xlu1 %v512_v61, %s3141_s9  ;;  %v418_v10 = vadd.f32 %v417_v2, %v307_v42 }
 0x12e   : > { %v517_v12 = vmax.f32 %v416_v8, 0.0 }
 0x12f   : > { %v421_v6 = vpop.f32.mrb[6].mxu0  ;;  %v518_v14 = vmax.f32 %v418_v10, 0.0 }
 0x130   : > { %543 = vrot.lane.b32.xlu0 %v515_v4, %s3141_s9  ;;  %v423_v9 = vpop.f32.mrb[7].mxu0  ;;  %v422_v13 = vadd.f32 %v421_v6, %v312_v60 }
 0x131   : > { %541 = vrot.lane.b32.xlu1 %v514_v5, %s3141_s9  ;;  %v424_v16 = vadd.f32 %v423_v9, %v312_v60 }
 0x132   : > { %v520_v15 = vmax.f32 %v422_v13, 0.0 }
 0x133   : > { %v521_v17 = vmax.f32 %v424_v16, 0.0 }
 0x134   : > { %551 = vrot.lane.b32.xlu0 %v519_v7, %s3141_s9 }
 0x135   : > { %557 = vrot.lane.b32.xlu1 %v522_v11, %s3141_s9 }
 0x138   : > { %547 = vrot.lane.b32.xlu0 %v517_v12, %s3141_s9 }
 0x139   : > { %549 = vrot.lane.b32.xlu1 %v518_v14, %s3141_s9 }
 0x13c   : > { %553 = vrot.lane.b32.xlu0 %v520_v15, %s3141_s9 }
 0x140   : > { %555 = vrot.lane.b32.xlu0 %v521_v17, %s3141_s9 }
 0x19a   : > { %v536_v36 = vpop.permute.xlu0 %535 }
 0x19b   : > { %v546_v37 = vpop.permute.xlu1 %545  ;;  %v3368_v41 = vsel %vm559_vm5, 0.0, %v536_v36 }
 0x19c   : > { %v687_v22 = vmul.f32 %v3346_v21, %v3368_v41  ;;  %v711_v23 = vmul.f32 %v3348_v24, %v3368_v41  ;;  %v782_v35 = vmul.f32 %v3344_v18, %v3368_v41 }
 0x19e   : > { %v540_v38 = vpop.permute.xlu0 %539 }
 0x19f   : > { %v538_v39 = vpop.permute.xlu1 %537 }
 0x1a0   : > { %v3371_v42 = vsel %vm559_vm5, %v536_v36, %v538_v39  ;;  %v561_v43 = vsel %vm559_vm5, %v538_v39, %v540_v38 }
 0x1a1   : > { %v3377_v45 = vsel %vm584_vm6, %v561_v43, 0.0  ;;  %v2546_v46 = vpack.i.bf16 %v3371_v42, %v3368_v41  ;;  %v688_v47 = vmul.f32 %v3365_v40, %v3371_v42  ;;  %v783_v57 = vmul.f32 %v3386_v50, %v3371_v42 }
 0x1a2   : > { %v544_v48 = vpop.permute.xlu0 %543  ;;  %v689_v49 = vmul.f32 %v3374_v44, %v3377_v45  ;;  %v784_v59 = vmul.f32 %v3388_v51, %v3377_v45  ;;  %v634_v60 = vmul.f32 %v3392_v52, %v3371_v42  ;;  %v635_v61 = vmul.f32 %v3396_v54, %v3377_v45 }
 0x1a3   : > { %v542_v53 = vpop.permute.xlu1 %541  ;;  %2547 = vrot.lane.b32.xlu0 %v2546_v46, %s3142_s10  ;;  %v712_v5 = vmul.f32 %v3415_v63, %v3371_v42  ;;  %v713_v6 = vmul.f32 %v3418_v1, %v3377_v45  ;;  %v563_v9 = vsel %vm559_vm5, %v544_v48, %v546_v37 }
 0x1a4   : > { %v3399_v55 = vsel %vm559_vm5, 0.0, %v542_v53  ;;  %v2561_v56 = vpack.i.bf16 %v689_v49, %v688_v47  ;;  %v2556_v3 = vpack.i.bf16 %v784_v59, %v783_v57  ;;  %v2581_v4 = vpack.i.bf16 %v635_v61, %v634_v60 }
 0x1a5   : > { %v2551_v58 = vpack.i.bf16 %v3399_v55, %v3377_v45  ;;  %v3425_v7 = vsel %vm559_vm5, %v542_v53, %v544_v48  ;;  %v2566_v10 = vpack.i.bf16 %v713_v6, %v712_v5  ;;  %v3435_v12 = vsel %vm584_vm6, %v563_v9, 0.0 }
 0x1a6   : > { %v552_v62 = vpop.permute.xlu0 %551  ;;  %v2591_v11 = vpack.i.bf16 %v3425_v7, %v3371_v42  ;;  %v2571_v15 = vpack.i.bf16 %v3399_v55, %v3368_v41  ;;  %v2596_v16 = vpack.i.bf16 %v3435_v12, %v3425_v7  ;;  %v690_v17 = vmul.f32 %v3346_v21, %v3399_v55 }
 0x1a7   : > { %2552 = vrot.lane.b32.xlu1 %v2551_v58, %s3142_s10  ;;  %2562 = vrot.lane.b32.xlu0 %v2561_v56, %s3143_s11  ;;  %v558_v2 = vpop.permute.xlu1 %557  ;;  %v714_v33 = vmul.f32 %v3348_v24, %v3399_v55  ;;  %v3466_v38 = vmul.f32 %v3392_v52, %v3425_v7  ;;  %v785_v43 = vmul.f32 %v3344_v18, %v3399_v55 }
 0x1a8   : > { %v2606_v37 = vpack.i.bf16 %v690_v17, %v687_v22  ;;  %v3475_v46 = vmul.f32 %v3396_v54, %v3435_v12  ;;  %v786_v48 = vmul.f32 %v3386_v50, %v3425_v7  ;;  %v787_v49 = vmul.f32 %v3388_v51, %v3435_v12 }
 0x1a9   : > { %v2616_v56 = vpack.i.bf16 %v714_v33, %v711_v23  ;;  %v715_v57 = vmul.f32 %v3415_v63, %v3425_v7  ;;  %v716_v60 = vmul.f32 %v3418_v1, %v3435_v12 }
 0x1aa   : > { %v3427_v8 = vpop.permute.xlu0 %547  ;;  %v2676_v58 = vpack.i.bf16 %v3475_v46, %v3466_v38 }
 0x1ab   : > { %2557 = vrot.lane.b32.xlu1 %v2556_v3, %s3144_s12  ;;  %2582 = vrot.lane.b32.xlu0 %v2581_v4, %s3143_s11  ;;  %v550_v14 = vpop.permute.xlu1 %549  ;;  %v2601_v3 = vpack.i.bf16 %v785_v43, %v782_v35  ;;  %v2661_v35 = vpack.i.bf16 %v716_v60, %v715_v57 }
 0x1ac   : > { %v565_v19 = vsel %vm559_vm5, %v550_v14, %v552_v62  ;;  %v3454_v25 = vsel %vm559_vm5, %v3427_v8, %v550_v14 }
 0x1ad   : > { %v3462_v36 = vsel %vm584_vm6, %v565_v19, 0.0  ;;  %v3488_v53 = vmul.f32 %v3386_v50, %v3454_v25  ;;  %v3502_v61 = vmul.f32 %v3365_v40, %v3454_v25  ;;  %v3520_v6 = vmul.f32 %v3415_v63, %v3454_v25 }
 0x1ae   : > { %v554_v13 = vpop.permute.xlu0 %553  ;;  %v3496_v59 = vmul.f32 %v3388_v51, %v3462_v36  ;;  %v3506_v62 = vmul.f32 %v3374_v44, %v3462_v36  ;;  %v3528_v9 = vmul.f32 %v3418_v1, %v3462_v36 }
 0x1af   : > { %2567 = vrot.lane.b32.xlu1 %v2566_v10, %s3145_s13  ;;  %2592 = vrot.lane.b32.xlu0 %v2591_v11, %s3146_s14  ;;  %v3567_v33 = vsel %vm559_vm5, 0.0, %v554_v13 }
 0x1b0   : > { %v2691_v4 = vpack.i.bf16 %v3496_v59, %v3488_v53  ;;  %v2701_v17 = vpack.i.bf16 %v3528_v9, %v3520_v6 }
 0x1b2   : > { %v556_v20 = vpop.permute.xlu0 %555 }
 0x1b3   : > { %2572 = vrot.lane.b32.xlu1 %v2571_v15, %s3147_s15  ;;  %2597 = vrot.lane.b32.xlu0 %v2596_v16, %s3142_s10  ;;  %v567_v26 = vsel %vm559_vm5, %v556_v20, %v558_v2  ;;  %v3469_v39 = vsel %vm559_vm5, %v554_v13, %v556_v20  ;;  %v2651_v16 = vpack.i.bf16 %v787_v49, %v786_v48 }
 0x1b4   : > { %v3478_v47 = vsel %vm584_vm6, %v567_v26, 0.0  ;;  %v3510_v2 = vmul.f32 %v3386_v50, %v3469_v39  ;;  %v2696_v50 = vpack.i.bf16 %v3506_v62, %v3502_v61  ;;  %v3532_v10 = vmul.f32 %v3365_v40, %v3469_v39 }
 0x1b5   : > { %v3516_v5 = vmul.f32 %v3388_v51, %v3478_v47  ;;  %v3538_v14 = vmul.f32 %v3374_v44, %v3478_v47  ;;  %v3552_v19 = vmul.f32 %v3415_v63, %v3469_v39  ;;  %v3556_v20 = vmul.f32 %v3418_v1, %v3478_v47 }
 0x1b6   : > { %v3564_v26 = vsel %vm559_vm5, 0.0, %v3427_v8  ;;  %v2611_v1 = vpack.i.bf16 %v3435_v12, %v3377_v45  ;;  %v3579_v8 = vmul.f32 %v3392_v52, %v3469_v39  ;;  %v3583_v13 = vmul.f32 %v3396_v54, %v3478_v47 }
 0x1b7   : > { %2577 = vrot.lane.b32.xlu1 %v2571_v15, %s3146_s14  ;;  %2607 = vrot.lane.b32.xlu0 %v2606_v37, %s3143_s11  ;;  %v2786_v51 = vpack.i.bf16 %v3516_v5, %v3510_v2  ;;  %v3546_v15 = vmul.f32 %v3396_v54, %v3462_v36  ;;  %v2791_v22 = vpack.i.bf16 %v3538_v14, %v3532_v10 }
 0x1b8   : > { %v2796_v63 = vpack.i.bf16 %v3556_v20, %v3552_v19  ;;  %v737_v37 = vmul.f32 %v3358_v31, %v3399_v55  ;;  %v3587_v43 = vmul.f32 %v3360_v32, %v3564_v26  ;;  %v3591_v48 = vmul.f32 %v3360_v32, %v3567_v33 }
 0x1b9   : > { %v2686_v49 = vpack.i.bf16 %v3567_v33, %v3462_v36  ;;  %v2811_v54 = vpack.i.bf16 %v3583_v13, %v3579_v8  ;;  %v2706_v60 = vpack.i.bf16 %v3567_v33, %v3564_v26  ;;  %v767_v2 = vmul.f32 %v3362_v34, %v3567_v33 }
 0x1bb   : > { %2617 = vrot.lane.b32.xlu0 %v2616_v56, %s3145_s13  ;;  %2587 = vrot.lane.b32.xlu1 %v2591_v11, %s3147_s15  ;;  %v3542_v11 = vmul.f32 %v3392_v52, %v3454_v25  ;;  %v734_v52 = vmul.f32 %v3358_v31, %v3368_v41  ;;  %v2771_v56 = vpack.i.bf16 %v3591_v48, %v3587_v43 }
 0x1bd   : > { %v2716_v23 = vpack.i.bf16 %v3546_v15, %v3542_v11  ;;  %v2621_v57 = vpack.i.bf16 %v737_v37, %v734_v52  ;;  %v636_v37 = vmul.f32 %v3360_v32, %v3399_v55  ;;  %v633_v52 = vmul.f32 %v3360_v32, %v3368_v41 }
 0x1be   : > { %v753_v32 = vsel %vm752_vm10, %v3362_v34, %v3354_v29 }
 0x1bf   : > { %2602 = vrot.lane.b32.xlu1 %v2601_v3, %s3144_s12  ;;  %2652 = vrot.lane.b32.xlu0 %v2651_v16, %s3144_s12  ;;  %v761_v3 = vmul.f32 %v3362_v34, %v3399_v55  ;;  %v758_v16 = vmul.f32 %v3362_v34, %v3368_v41 }
 0x1c3   : > { %2612 = vrot.lane.b32.xlu1 %v2611_v1, %s3147_s15  ;;  %2662 = vrot.lane.b32.xlu0 %v2661_v35, %s3145_s13  ;;  %v2631_v35 = vpack.i.bf16 %v761_v3, %v758_v16  ;;  %v759_v16 = vmul.f32 %v753_v32, %v3371_v42 }
 0x1c7   : > { %2622 = vrot.lane.b32.xlu1 %v2621_v57, %s3148_s16  ;;  %2687 = vrot.lane.b32.xlu0 %v2686_v49, %s3142_s10  ;;  %v2636_v49 = vpack.i.bf16 %v636_v37, %v633_v52  ;;  %v2721_v57 = vpack.i.bf16 %v3469_v39, %v3454_v25  ;;  %v2731_v52 = vpack.i.bf16 %v3478_v47, %v3469_v39 }
 0x1cb   : > { %2627 = vrot.lane.b32.xlu1 %v2611_v1, %s3146_s14  ;;  %2707 = vrot.lane.b32.xlu0 %v2706_v60, %s3147_s15  ;;  %v729_v1 = vsel %vm314_vm3, %v3358_v31, %v3350_v27 }
 0x1cc   : > { %v738_v3 = vmul.f32 %v729_v1, %v3425_v7  ;;  %v735_v55 = vmul.f32 %v729_v1, %v3371_v42  ;;  %v693_v42 = vmul.f32 %v3346_v21, %v3564_v26 }
 0x1ce   : > { %v2641_v41 = vpack.i.bf16 %v738_v3, %v735_v55  ;;  %v696_v3 = vmul.f32 %v3346_v21, %v3567_v33  ;;  %v717_v21 = vmul.f32 %v3348_v24, %v3564_v26 }
 0x1cf   : > { %2632 = vrot.lane.b32.xlu1 %v2631_v35, %s3149_s17  ;;  %2712 = vrot.lane.b32.xlu0 %v2706_v60, %s3146_s14  ;;  %v762_v60 = vmul.f32 %v753_v32, %v3425_v7  ;;  %v691_v35 = vmul.f32 %v3365_v40, %v3425_v7  ;;  %v730_v40 = vsel %vm314_vm3, %v3350_v27, %v3352_v28  ;;  %vm1606_vm3 = vcmask 261120  }
 0x1d0   : > { %v739_v55 = vmul.f32 %v730_v40, %v3435_v12  ;;  %v754_v27 = vsel %vm752_vm10, %v3354_v29, %v3356_v30  ;;  %v2761_v29 = vpack.i.bf16 %v3478_v47, %v3462_v36  ;;  %v744_v30 = vmul.f32 %v729_v1, %v3469_v39 }
 0x1d1   : > { %v2646_v37 = vpack.i.bf16 %v762_v60, %v759_v16  ;;  %v763_v16 = vmul.f32 %v754_v27, %v3435_v12  ;;  %v745_v38 = vmul.f32 %v730_v40, %v3478_v47  ;;  %v742_v46 = vmul.f32 %v730_v40, %v3462_v36 }
 0x1d2   : > { %v769_v59 = vmul.f32 %v754_v27, %v3478_v47  ;;  %v766_v61 = vmul.f32 %v754_v27, %v3462_v36 }
 0x1d3   : > { %2637 = vrot.lane.b32.xlu1 %v2636_v49, %s3143_s11  ;;  %2722 = vrot.lane.b32.xlu0 %v2721_v57, %s3147_s15  ;;  %v692_v49 = vmul.f32 %v3374_v44, %v3435_v12  ;;  %v720_v44 = vmul.f32 %v3348_v24, %v3567_v33  ;;  %v740_v24 = vmul.f32 %v3358_v31, %v3564_v26 }
 0x1d4   : > { %v2806_v62 = vpack.i.bf16 %v769_v59, %v766_v61 }
 0x1d5   : > { %v2656_v7 = vpack.i.bf16 %v692_v49, %v691_v35  ;;  %v2751_v60 = vpack.i.bf16 %v720_v44, %v717_v21  ;;  %v743_v35 = vmul.f32 %v3358_v31, %v3567_v33  ;;  %v741_v31 = vmul.f32 %v729_v1, %v3454_v25 }
 0x1d7   : > { %2642 = vrot.lane.b32.xlu1 %v2641_v41, %s3148_s16  ;;  %2727 = vrot.lane.b32.xlu0 %v2721_v57, %s3146_s14  ;;  %v2741_v57 = vpack.i.bf16 %v696_v3, %v693_v42  ;;  %v736_v41 = vmul.f32 %v730_v40, %v3377_v45  ;;  %v2756_v49 = vpack.i.bf16 %v743_v35, %v740_v24 }
 0x1d8   : > { %v2776_v12 = vpack.i.bf16 %v744_v30, %v741_v31  ;;  %v768_v3 = vmul.f32 %v753_v32, %v3469_v39  ;;  %v765_v42 = vmul.f32 %v753_v32, %v3454_v25  ;;  %v788_v39 = vmul.f32 %v3344_v18, %v3564_v26 }
 0x1d9   : > { %v2666_v28 = vpack.i.bf16 %v739_v55, %v736_v41 }
 0x1db   : > { %2647 = vrot.lane.b32.xlu1 %v2646_v37, %s3149_s17  ;;  %2732 = vrot.lane.b32.xlu0 %v2731_v52, %s3142_s10  ;;  %v760_v37 = vmul.f32 %v754_v27, %v3377_v45  ;;  %v2681_v45 = vpack.i.bf16 %v3454_v25, %v3564_v26  ;;  %v791_v25 = vmul.f32 %v3344_v18, %v3567_v33 }
 0x1dc   : > { %v764_v18 = vmul.f32 %v3362_v34, %v3564_v26 }
 0x1dd   : > { %v2671_v52 = vpack.i.bf16 %v763_v16, %v760_v37  ;;  %v2736_v53 = vpack.i.bf16 %v791_v25, %v788_v39 }
 0x1df   : > { %2657 = vrot.lane.b32.xlu1 %v2656_v7, %s3143_s11  ;;  %2742 = vrot.lane.b32.xlu0 %v2741_v57, %s3143_s11  ;;  %v2781_v7 = vpack.i.bf16 %v768_v3, %v765_v42 }
 0x1e3   : > { %2667 = vrot.lane.b32.xlu1 %v2666_v28, %s3148_s16  ;;  %2752 = vrot.lane.b32.xlu0 %v2751_v60, %s3145_s13 }
 0x1e7   : > { %2672 = vrot.lane.b32.xlu1 %v2671_v52, %s3149_s17  ;;  %2757 = vrot.lane.b32.xlu0 %v2756_v49, %s3148_s16 }
 0x1eb   : > { %2677 = vrot.lane.b32.xlu1 %v2676_v58, %s3143_s11  ;;  %2762 = vrot.lane.b32.xlu0 %v2761_v29, %s3146_s14  ;;  %v2801_v58 = vpack.i.bf16 %v745_v38, %v742_v46 }
 0x1ef   : > { %2682 = vrot.lane.b32.xlu1 %v2681_v45, %s3142_s10  ;;  %2777 = vrot.lane.b32.xlu0 %v2776_v12, %s3148_s16 }
 0x1f3   : > { %2692 = vrot.lane.b32.xlu1 %v2691_v4, %s3144_s12  ;;  %2782 = vrot.lane.b32.xlu0 %v2781_v7, %s3149_s17  ;;  %v2766_v4 = vpack.i.bf16 %v767_v2, %v764_v18 }
 0x1f7   : > { %2697 = vrot.lane.b32.xlu1 %v2696_v50, %s3143_s11  ;;  %2787 = vrot.lane.b32.xlu0 %v2786_v51, %s3144_s12 }
 0x1fb   : > { %2702 = vrot.lane.b32.xlu1 %v2701_v17, %s3145_s13  ;;  %2792 = vrot.lane.b32.xlu0 %v2791_v22, %s3143_s11 }
 0x1ff   : > { %2717 = vrot.lane.b32.xlu1 %v2716_v23, %s3143_s11  ;;  %2797 = vrot.lane.b32.xlu0 %v2796_v63, %s3145_s13 }
 0x203   : > { %2737 = vrot.lane.b32.xlu1 %v2736_v53, %s3144_s12  ;;  %2802 = vrot.lane.b32.xlu0 %v2801_v58, %s3148_s16 }
 0x207   : > { %2747 = vrot.lane.b32.xlu1 %v2761_v29, %s3147_s15  ;;  %2807 = vrot.lane.b32.xlu0 %v2806_v62, %s3149_s17 }
 0x20b   : > { %2767 = vrot.lane.b32.xlu1 %v2766_v4, %s3149_s17  ;;  %2812 = vrot.lane.b32.xlu0 %v2811_v54, %s3143_s11 }
 0x20f   : > { %2772 = vrot.lane.b32.xlu1 %v2771_v56, %s3143_s11 }
 0x215   : > { %v2548_v36 = vpop.permute.xlu0 %2547 }
 0x216   : > { %v2550_v6 = vunpack.i.h.bf16 %v2548_v36  ;;  %v2549_v13 = vunpack.i.l.bf16 %v2548_v36 }
 0x218   : > { %v827_v40 = vsel %vm826_vm11, %v2549_v13, %v2550_v6 }
 0x219   : > { %v2553_v47 = vpop.permute.xlu1 %2552  ;;  %v3740_v5 = vpop.permute.xlu0 %2562 }
 0x21a   : > { %v2554_v50 = vunpack.i.l.bf16 %v2553_v47  ;;  %v2565_v34 = vunpack.i.h.bf16 %v3740_v5  ;;  %v2564_v9 = vunpack.i.l.bf16 %v3740_v5  ;;  %v2555_v1 = vunpack.i.h.bf16 %v2553_v47 }
 0x21c   : > { %v828_v10 = vsel %vm826_vm11, %v2550_v6, %v2554_v50  ;;  %v873_v19 = vsel %vm871_vm12, %v2564_v9, %v2565_v34 }
 0x21d   : > { %v2558_v51 = vpop.permute.xlu1 %2557  ;;  %v3745_v14 = vpop.permute.xlu0 %2582  ;;  %v2816_v11 = vpack.i.bf16 %v2554_v50, %v828_v10  ;;  %v2826_v33 = vpack.i.bf16 %v2565_v34, %v873_v19 }
 0x21e   : > { %v2560_v15 = vunpack.i.h.bf16 %v2558_v51  ;;  %v2559_v17 = vunpack.i.l.bf16 %v2558_v51 }
 0x21f   : > { %2817 = vrot.lane.b32.xlu0 %v2816_v11, %s3143_s11 }
 0x220   : > { %v1119_v20 = vsel %vm1117_vm13, %v2559_v17, %v2560_v15 }
 0x221   : > { %v3752_v22 = vpop.permute.xlu1 %2567  ;;  %v3754_v23 = vpop.permute.xlu0 %2592  ;;  %v2821_v26 = vpack.i.bf16 %v2560_v15, %v1119_v20 }
 0x222   : > { %v2570_v63 = vunpack.i.h.bf16 %v3752_v22  ;;  %v2569_v8 = vunpack.i.l.bf16 %v3752_v22  ;;  %v2585_v22 = vunpack.i.h.bf16 %v3745_v14 }
 0x223   : > { %2822 = vrot.lane.b32.xlu1 %v2821_v26, %s3143_s11  ;;  %2827 = vrot.lane.b32.xlu0 %v2826_v33, %s3143_s11 }
 0x224   : > { %v918_v43 = vsel %vm916_vm14, %v2569_v8, %v2570_v63 }
 0x225   : > { %v3763_v48 = vpop.permute.xlu1 %2572  ;;  %v2598_v54 = vpop.permute.xlu0 %2597  ;;  %v2831_v56 = vpack.i.bf16 %v2570_v63, %v918_v43 }
 0x226   : > { %v2599_v32 = vunpack.i.l.bf16 %v2598_v54  ;;  %v2600_v16 = vunpack.i.h.bf16 %v2598_v54 }
 0x227   : > { %2832 = vrot.lane.b32.xlu0 %v2831_v56, %s3143_s11 }
 0x228   : > { %v829_v57 = vsel %vm826_vm11, %v2555_v1, %v2599_v32  ;;  %v830_v45 = vsel %vm826_vm11, %v2599_v32, %v2600_v16 }
 0x229   : > { %v3768_v55 = vpop.permute.xlu1 %2577  ;;  %v3770_v44 = vpop.permute.xlu0 %2607  ;;  %v2836_v41 = vpack.i.bf16 %v829_v57, %v827_v40  ;;  %v2846_v39 = vpack.i.bf16 %v2600_v16, %v830_v45 }
 0x22a   : > { %v2609_v45 = vunpack.i.l.bf16 %v3770_v44 }
 0x22b   : > { %2837 = vrot.lane.b32.xlu0 %v2836_v41, %s3143_s11 }
 0x22d   : > { %v3773_v21 = vpop.permute.xlu1 %2587  ;;  %v3775_v27 = vpop.permute.xlu0 %2617 }
 0x22e   : > { %v2590_v24 = vunpack.i.h.bf16 %v3773_v21  ;;  %v2589_v52 = vunpack.i.l.bf16 %v3773_v21 }
 0x231   : > { %v2603_v28 = vpop.permute.xlu1 %2602  ;;  %v3777_v60 = vpop.permute.xlu0 %2652 }
 0x232   : > { %v2605_v12 = vunpack.i.h.bf16 %v2603_v28  ;;  %v2604_v3 = vunpack.i.l.bf16 %v2603_v28  ;;  %v2654_v42 = vunpack.i.l.bf16 %v3777_v60 }
 0x234   : > { %v1118_v58 = vsel %vm1117_vm13, %v2604_v3, %v2559_v17  ;;  %v1120_v59 = vsel %vm1117_vm13, %v2605_v12, %v2654_v42 }
 0x235   : > { %v2613_v35 = vpop.permute.xlu1 %2612  ;;  %v3779_v37 = vpop.permute.xlu0 %2662  ;;  %v2851_v61 = vpack.i.bf16 %v1120_v59, %v1118_v58  ;;  %v2610_v58 = vunpack.i.h.bf16 %v3770_v44  ;;  %v2655_v44 = vunpack.i.h.bf16 %v3777_v60 }
 0x236   : > { %v2615_v49 = vunpack.i.h.bf16 %v2613_v35  ;;  %v2614_v29 = vunpack.i.l.bf16 %v2613_v35  ;;  %2842 = vrot.lane.b32.xlu1 %v2613_v35, %s3143_s11  ;;  %v2664_v59 = vunpack.i.l.bf16 %v3779_v37 }
 0x238   : > { %v3786_v30 = vsel %vm949_vm15, %v2589_v52, %v2614_v29  ;;  %v3791_v31 = vsel %vm949_vm15, %v2590_v24, %v2615_v49 }
 0x239   : > { %v2946_v7 = vpack.i.bf16 %v3791_v31, %v3786_v30  ;;  %v2623_v25 = vpop.permute.xlu1 %2622  ;;  %v3797_v38 = vpop.permute.xlu0 %2687 }
 0x23a   : > { %2847 = vrot.lane.b32.xlu1 %v2846_v39, %s3143_s11  ;;  %v2625_v34 = vunpack.i.h.bf16 %v2623_v25  ;;  %v2624_v11 = vunpack.i.l.bf16 %v2623_v25  ;;  %v2690_v57 = vunpack.i.h.bf16 %v3797_v38 }
 0x23d   : > { %v3800_v46 = vpop.permute.xlu1 %2627  ;;  %v2708_v53 = vpop.permute.xlu0 %2707 }
 0x23e   : > { %2852 = vrot.lane.b32.xlu1 %v2851_v61, %s3143_s11  ;;  %v2710_v36 = vunpack.i.h.bf16 %v2708_v53  ;;  %v2709_v47 = vunpack.i.l.bf16 %v2708_v53 }
 0x241   : > { %v2633_v62 = vpop.permute.xlu1 %2632  ;;  %v2713_v2 = vpop.permute.xlu0 %2712 }
 0x242   : > { %v2715_v15 = vunpack.i.h.bf16 %v2713_v2  ;;  %v2714_v17 = vunpack.i.l.bf16 %v2713_v2  ;;  %v2635_v16 = vunpack.i.h.bf16 %v2633_v62  ;;  %v2634_v35 = vunpack.i.l.bf16 %v2633_v62 }
 0x243   : > { %v2620_v62 = vunpack.i.h.bf16 %v3775_v27  ;;  %v2619_v2 = vunpack.i.l.bf16 %v3775_v27 }
 0x245   : > { %v3808_v18 = vpop.permute.xlu1 %2637  ;;  %v3810_v4 = vpop.permute.xlu0 %2722  ;;  %v917_v5 = vsel %vm916_vm14, %v2619_v2, %v2569_v8  ;;  %v2584_v8 = vunpack.i.l.bf16 %v3745_v14 }
 0x246   : > { %v4627_v6 = vunpack.i.h.bf16 %v3810_v4  ;;  %v4628_v50 = vunpack.i.l.bf16 %v3810_v4 }
 0x248   : > { %v3817_v10 = vsel %vm949_vm15, %v2709_v47, %v4628_v50  ;;  %v3822_v51 = vsel %vm949_vm15, %v2710_v36, %v4627_v6  ;;  %v872_v36 = vsel %vm871_vm12, %v2609_v45, %v2564_v9  ;;  %v2665_v9 = vunpack.i.h.bf16 %v3779_v37 }
 0x249   : > { %v3826_v20 = vpop.permute.xlu1 %2642  ;;  %v3828_v26 = vpop.permute.xlu0 %2727  ;;  %v4646_v21 = vpack.i.bf16 %v3822_v51, %v3817_v10 }
 0x24a   : > { %v4631_v33 = vunpack.i.h.bf16 %v3826_v20  ;;  %v4629_v63 = vunpack.i.l.bf16 %v3826_v20  ;;  %v2730_v13 = vunpack.i.h.bf16 %v3828_v26  ;;  %v2729_v43 = vunpack.i.l.bf16 %v3828_v26 }
 0x24c   : > { %v3837_v54 = vsel %vm994_vm0, %v2625_v34, %v4631_v33  ;;  %v3842_v56 = vsel %vm994_vm0, %v2624_v11, %v4629_v63  ;;  %v3847_v1 = vsel %vm1072_vm1, %v2714_v17, %v2729_v43  ;;  %v3852_v32 = vsel %vm1072_vm1, %v2715_v15, %v2730_v13 }
 0x24d   : > { %v3858_v41 = vpop.permute.xlu1 %2647  ;;  %v3860_v28 = vpop.permute.xlu0 %2732 }
 0x24e   : > { %v4626_v49 = vunpack.i.h.bf16 %v3858_v41  ;;  %v4625_v29 = vunpack.i.l.bf16 %v3858_v41 }
 0x250   : > { %v3868_v12 = vsel %vm1039_vm2, %v2635_v16, %v4626_v49  ;;  %v3873_v3 = vsel %vm1039_vm2, %v2634_v35, %v4625_v29  ;;  %v919_v16 = vsel %vm916_vm14, %v2620_v62, %v2664_v59  ;;  %v1121_v62 = vsel %vm1117_vm13, %v2654_v42, %v2655_v44 }
 0x251   : > { %v2658_v39 = vpop.permute.xlu1 %2657  ;;  %v3877_v53 = vpop.permute.xlu0 %2742  ;;  %v2861_v45 = vpack.i.bf16 %v919_v16, %v917_v5  ;;  %v2871_v2 = vpack.i.bf16 %v2655_v44, %v1121_v62 }
 0x252   : > { %v2659_v61 = vunpack.i.l.bf16 %v2658_v39  ;;  %v2660_v34 = vunpack.i.h.bf16 %v2658_v39 }
 0x254   : > { %v874_v47 = vsel %vm871_vm12, %v2610_v58, %v2659_v61  ;;  %v875_v39 = vsel %vm871_vm12, %v2659_v61, %v2660_v34  ;;  %v920_v61 = vsel %vm916_vm14, %v2664_v59, %v2665_v9 }
 0x255   : > { %v3887_v11 = vpop.permute.xlu1 %2667  ;;  %v3889_v15 = vpop.permute.xlu0 %2752  ;;  %v2856_v17 = vpack.i.bf16 %v874_v47, %v872_v36  ;;  %v2876_v37 = vpack.i.bf16 %v2660_v34, %v875_v39  ;;  %v2640_v47 = vunpack.i.h.bf16 %v3808_v18  ;;  %v2881_v14 = vpack.i.bf16 %v2665_v9, %v920_v61 }
 0x256   : > { %v2670_v35 = vunpack.i.h.bf16 %v3887_v11  ;;  %2867 = vrot.lane.b32.xlu1 %v3887_v11, %s3143_s11  ;;  %v1427_v9 = vsel %vm871_vm12, %v2584_v8, %v2585_v22  ;;  %v2689_v61 = vunpack.i.l.bf16 %v3797_v38  ;;  %v2754_v63 = vunpack.i.l.bf16 %v3889_v15 }
 0x257   : > { %2857 = vrot.lane.b32.xlu0 %v2856_v17, %s3143_s11  ;;  %v2639_v17 = vunpack.i.l.bf16 %v3808_v18 }
 0x259   : > { %v3901_v58 = vpop.permute.xlu1 %2672  ;;  %v3903_v36 = vpop.permute.xlu0 %2757  ;;  %v1426_v44 = vsel %vm871_vm12, %v2639_v17, %v2584_v8 }
 0x25a   : > { %2877 = vrot.lane.b32.xlu1 %v2876_v37, %s3143_s11  ;;  %v2760_v10 = vunpack.i.h.bf16 %v3903_v36  ;;  %v2759_v51 = vunpack.i.l.bf16 %v3903_v36 }
 0x25b   : > { %2862 = vrot.lane.b32.xlu0 %v2861_v45, %s3143_s11 }
 0x25d   : > { %v2678_v60 = vpop.permute.xlu1 %2677  ;;  %v3916_v16 = vpop.permute.xlu0 %2762 }
 0x25e   : > { %v2680_v42 = vunpack.i.h.bf16 %v2678_v60  ;;  %v2679_v5 = vunpack.i.l.bf16 %v2678_v60  ;;  %v2765_v0 = vunpack.i.h.bf16 %v3916_v16  ;;  %v2764_v45 = vunpack.i.l.bf16 %v3916_v16  ;;  %2882 = vrot.lane.b32.xlu1 %v2881_v14, %s3143_s11 }
 0x25f   : > { %2872 = vrot.lane.b32.xlu0 %v2871_v2, %s3143_s11 }
 0x260   : > { %v1428_v59 = vsel %vm871_vm12, %v2640_v47, %v2679_v5  ;;  %v3923_v34 = vpack.c.bf16 %v2680_v42, %v2585_v22  ;;  %v3928_v18 = vsel %vm1072_vm1, %v2729_v43, %v2764_v45  ;;  %v3934_v39 = vsel %vm1072_vm1, %v2730_v13, %v2765_v0 }
 0x261   : > { %v2683_v62 = vpop.permute.xlu1 %2682  ;;  %v3936_v37 = vpop.permute.xlu0 %2777  ;;  %v1429_v2 = vsel %vm871_vm12, %v2679_v5, %v2680_v42  ;;  %v2351_v47 = vpack.c.bf16 %v1428_v59, %v1426_v44 }
 0x262   : > { %v2685_v60 = vunpack.i.h.bf16 %v2683_v62  ;;  %v2349_v26 = vpack.c.bf16 %v1429_v2, %v1427_v9  ;;  %v2684_v44 = vunpack.i.l.bf16 %v2683_v62 }
 0x264   : > { %v832_v0 = vsel %vm826_vm11, %v2685_v60, %v2689_v61  ;;  %2350 = vmatprep.subr.bf16.mxu0 %v2349_v26 }
 0x265   : > { %v2886_v13 = vpack.i.bf16 %v2689_v61, %v832_v0  ;;  %v3945_v17 = vpop.permute.xlu1 %2692  ;;  %v3947_v45 = vpop.permute.xlu0 %2782  ;;  %2352 = vmatpush1.bf16.msra.mxu0 %v2351_v47  ;;  %v2734_v61 = vunpack.i.l.bf16 %v3860_v28 }
 0x266   : > { %v2695_v22 = vunpack.i.h.bf16 %v3945_v17  ;;  %v2694_v8 = vunpack.i.l.bf16 %v3945_v17 }
 0x267   : > { %2887 = vrot.lane.b32.xlu0 %v2886_v13, %s3143_s11  ;;  %v833_v62 = vsel %vm826_vm11, %v2690_v57, %v2734_v61 }
 0x268   : > { %v1123_v42 = vsel %vm1117_vm13, %v2694_v8, %v2695_v22 }
 0x269   : > { %v2891_v5 = vpack.i.bf16 %v2695_v22, %v1123_v42  ;;  %v2698_v14 = vpop.permute.xlu1 %2697  ;;  %v3955_v59 = vpop.permute.xlu0 %2787  ;;  %v831_v22 = vsel %vm826_vm11, %v2684_v44, %v2685_v60 }
 0x26a   : > { %v2700_v9 = vunpack.i.h.bf16 %v2698_v14  ;;  %v2699_v2 = vunpack.i.l.bf16 %v2698_v14  ;;  %v2901_v14 = vpack.i.bf16 %v833_v62, %v831_v22  ;;  %v2789_v38 = vunpack.i.l.bf16 %v3955_v59 }
 0x26b   : > { %2892 = vrot.lane.b32.xlu1 %v2891_v5, %s3143_s11  ;;  %v2745_v5 = vunpack.i.h.bf16 %v3877_v53 }
 0x26c   : > { %v877_v47 = vsel %vm871_vm12, %v2699_v2, %v2700_v9 }
 0x26d   : > { %v2896_v26 = vpack.i.bf16 %v2700_v9, %v877_v47  ;;  %v2703_v0 = vpop.permute.xlu1 %2702  ;;  %v3960_v13 = vpop.permute.xlu0 %2792  ;;  %v2744_v9 = vunpack.i.l.bf16 %v3877_v53  ;;  %v2790_v47 = vunpack.i.h.bf16 %v3955_v59  ;;  %v2735_v59 = vunpack.i.h.bf16 %v3860_v28 }
 0x26e   : > { %v2794_v42 = vunpack.i.l.bf16 %v3960_v13  ;;  %v2705_v40 = vunpack.i.h.bf16 %v2703_v0  ;;  %v2704_v53 = vunpack.i.l.bf16 %v2703_v0  ;;  %v2755_v0 = vunpack.i.h.bf16 %v3889_v15 }
 0x26f   : > { %2897 = vrot.lane.b32.xlu0 %v2896_v26, %s3143_s11  ;;  %v876_v57 = vsel %vm871_vm12, %v2744_v9, %v2699_v2  ;;  %v1125_v62 = vsel %vm1117_vm13, %v2789_v38, %v2790_v47  ;;  %v834_v28 = vsel %vm826_vm11, %v2734_v61, %v2735_v59 }
 0x270   : > { %v878_v60 = vsel %vm871_vm12, %v2745_v5, %v2794_v42  ;;  %v2926_v29 = vpack.i.bf16 %v2790_v47, %v1125_v62 }
 0x271   : > { %v2718_v25 = vpop.permute.xlu1 %2717  ;;  %v3968_v43 = vpop.permute.xlu0 %2797  ;;  %v2921_v44 = vpack.i.bf16 %v878_v60, %v876_v57 }
 0x272   : > { %v4630_v2 = vunpack.i.l.bf16 %v3968_v43  ;;  %v2720_v57 = vunpack.i.h.bf16 %v2718_v25 }
 0x273   : > { %2902 = vrot.lane.b32.xlu0 %v2901_v14, %s3143_s11  ;;  %v922_v14 = vsel %vm916_vm14, %v2704_v53, %v2705_v40 }
 0x274   : > { %v2931_v47 = vpack.i.bf16 %v2705_v40, %v922_v14  ;;  %v923_v9 = vsel %vm916_vm14, %v2755_v0, %v4630_v2  ;;  %v921_v40 = vsel %vm916_vm14, %v2754_v63, %v2704_v53 }
 0x275   : > { %v2738_v26 = vpop.permute.xlu1 %2737  ;;  %v3978_v22 = vpop.permute.xlu0 %2802  ;;  %v2936_v14 = vpack.i.bf16 %v923_v9, %v921_v40 }
 0x276   : > { %v2740_v62 = vunpack.i.h.bf16 %v2738_v26  ;;  %v2739_v6 = vunpack.i.l.bf16 %v2738_v26  ;;  %v2805_v63 = vunpack.i.h.bf16 %v3978_v22  ;;  %v2804_v9 = vunpack.i.l.bf16 %v3978_v22 }
 0x277   : > { %2922 = vrot.lane.b32.xlu0 %v2921_v44, %s3143_s11  ;;  %v2719_v44 = vunpack.i.l.bf16 %v2718_v25  ;;  %v2911_v25 = vpack.i.bf16 %v2735_v59, %v834_v28 }
 0x278   : > { %v1122_v15 = vsel %vm1117_vm13, %v2739_v6, %v2694_v8  ;;  %v1124_v0 = vsel %vm1117_vm13, %v2740_v62, %v2789_v38  ;;  %v2675_v8 = vunpack.i.h.bf16 %v3901_v58  ;;  %v2674_v38 = vunpack.i.l.bf16 %v3901_v58 }
 0x279   : > { %v3983_v49 = vpop.permute.xlu1 %2747  ;;  %v3985_v5 = vpop.permute.xlu0 %2807  ;;  %v1431_v26 = vsel %vm871_vm12, %v2719_v44, %v2720_v57  ;;  %v2916_v53 = vpack.i.bf16 %v1124_v0, %v1122_v15  ;;  %v4651_v15 = vunpack.i.h.bf16 %v3810_v4 }
 0x27a   : > { %2907 = vrot.lane.b32.xlu1 %v3983_v49, %s3143_s11  ;;  %v4648_v40 = vunpack.i.l.bf16 %v3983_v49 }
 0x27b   : > { %2927 = vrot.lane.b32.xlu0 %v2926_v29, %s3143_s11 }
 0x27d   : > { %v3994_v50 = vpop.permute.xlu1 %2767  ;;  %v2813_v19 = vpop.permute.xlu0 %2812 }
 0x27e   : > { %v2815_v60 = vunpack.i.h.bf16 %v2813_v19  ;;  %v2814_v29 = vunpack.i.l.bf16 %v2813_v19  ;;  %2912 = vrot.lane.b32.xlu1 %v2911_v25, %s3143_s11 }
 0x27f   : > { %2932 = vrot.lane.b32.xlu0 %v2931_v47, %s3143_s11  ;;  %v2629_v47 = vunpack.i.l.bf16 %v3800_v46 }
 0x280   : > { %v4004_v61 = vpack.c.bf16 %v2815_v60, %v2720_v57  ;;  %v1433_v27 = vsel %vm871_vm12, %v2814_v29, %v2815_v60  ;;  %v2574_v57 = vunpack.i.l.bf16 %v3763_v48 }
 0x281   : > { %v2773_v2 = vpop.permute.xlu1 %2772  ;;  %v2353_v59 = vpack.c.bf16 %v1433_v27, %v1431_v26  ;;  %v2575_v27 = vunpack.i.h.bf16 %v3763_v48  ;;  %v4649_v26 = vunpack.i.l.bf16 %v3810_v4 }
 0x282   : > { %v2775_v19 = vunpack.i.h.bf16 %v2773_v2  ;;  %v2774_v33 = vunpack.i.l.bf16 %v2773_v2  ;;  %v2795_v2 = vunpack.i.h.bf16 %v3960_v13  ;;  %2917 = vrot.lane.b32.xlu1 %v2916_v53, %s3143_s11  ;;  %v950_v31 = vsel %vm949_vm15, %v2574_v57, %v2589_v52 }
 0x283   : > { %2937 = vrot.lane.b32.xlu0 %v2936_v14, %s3143_s11  ;;  %2354 = vmatprep.subr.bf16.mxu0 %v2353_v59  ;;  %v952_v30 = vsel %vm949_vm15, %v2575_v27, %v2590_v24  ;;  %v4643_v13 = vunpack.i.h.bf16 %v3826_v20  ;;  %v2630_v52 = vunpack.i.h.bf16 %v3800_v46  ;;  %v4650_v14 = vunpack.i.h.bf16 %v3983_v49 }
 0x284   : > { %v1430_v17 = vsel %vm871_vm12, %v2774_v33, %v2719_v44  ;;  %v1432_v6 = vsel %vm871_vm12, %v2775_v19, %v2814_v29  ;;  %v879_v33 = vsel %vm871_vm12, %v2794_v42, %v2795_v2  ;;  %v4644_v42 = vunpack.i.l.bf16 %v3887_v11 }
 0x285   : > { %v2355_v60 = vpack.c.bf16 %v1432_v6, %v1430_v17  ;;  %v2951_v44 = vpack.i.bf16 %v2795_v2, %v879_v33  ;;  %v998_v48 = vsel %vm994_vm0, %v4643_v13, %v2670_v35  ;;  %v2956_v24 = vpack.i.bf16 %v952_v30, %v950_v31 }
 0x286   : > { %2942 = vrot.lane.b32.xlu1 %v3978_v22, %s3143_s11  ;;  %v4647_v35 = vunpack.i.l.bf16 %v3968_v43  ;;  %v2779_v29 = vunpack.i.l.bf16 %v3936_v37  ;;  %v2810_v59 = vunpack.i.h.bf16 %v3985_v5  ;;  %v2809_v53 = vunpack.i.l.bf16 %v3985_v5 }
 0x287   : > { %2356 = vmatpush1.bf16.msra.mxu0 %v2355_v60  ;;  %2947 = vrot.lane.b32.xlu0 %v2946_v7, %s3143_s11  ;;  %v2800_v7 = vunpack.i.h.bf16 %v3968_v43  ;;  %v955_v43 = vsel %vm949_vm15, %v4649_v26, %v4648_v40  ;;  %v4652_v49 = vunpack.i.h.bf16 %v3858_v41  ;;  %v4653_v6 = vunpack.i.l.bf16 %v3858_v41 }
 0x288   : > { %v999_v0 = vsel %vm994_vm0, %v2759_v51, %v2779_v29  ;;  %v2784_v33 = vunpack.i.l.bf16 %v3947_v45  ;;  %v2595_v41 = vunpack.i.h.bf16 %v3754_v23  ;;  %v1000_v30 = vsel %vm994_vm0, %v2779_v29, %v2804_v9 }
 0x289   : > { %v924_v11 = vsel %vm916_vm14, %v4647_v35, %v2800_v7  ;;  %v1043_v4 = vsel %vm1039_vm2, %v4652_v49, %v2675_v8  ;;  %v1041_v2 = vsel %vm1039_vm2, %v4653_v6, %v2674_v38  ;;  %v2594_v8 = vunpack.i.l.bf16 %v3754_v23 }
 0x28a   : > { %2952 = vrot.lane.b32.xlu1 %v2951_v44, %s3143_s11  ;;  %v2966_v25 = vpack.i.bf16 %v2800_v7, %v924_v11  ;;  %v3016_v27 = vpack.i.bf16 %v1043_v4, %v1041_v2  ;;  %v1045_v57 = vsel %vm1039_vm2, %v2784_v33, %v2809_v53  ;;  %v1076_v13 = vsel %vm1072_vm1, %v2595_v41, %v2630_v52  ;;  %v1153_v53 = vld [vmem:[%s4619_s5 + $0x18] sm:$0xff] }
 0x28b   : > { %2962 = vrot.lane.b32.xlu0 %v3901_v58, %s3143_s11  ;;  %v4645_v58 = vunpack.i.l.bf16 %v3826_v20  ;;  %v2780_v20 = vunpack.i.h.bf16 %v3936_v37  ;;  %v957_v37 = vsel %vm949_vm15, %v4651_v15, %v4650_v14  ;;  %v1074_v7 = vsel %vm1072_vm1, %v2594_v8, %v2629_v47 }
 0x28c   : > { %v2971_v36 = vpack.i.bf16 %v957_v37, %v955_v43  ;;  %v2770_v9 = vunpack.i.h.bf16 %v3994_v50 }
 0x28d   : > { %v996_v28 = vsel %vm994_vm0, %v4645_v58, %v4644_v42  ;;  %v1001_v19 = vsel %vm994_vm0, %v2760_v10, %v2780_v20  ;;  %v2769_v58 = vunpack.i.l.bf16 %v3994_v50  ;;  %v2580_v50 = vunpack.i.h.bf16 %v3768_v55 }
 0x28e   : > { %v2986_v62 = vpack.i.bf16 %v998_v48, %v996_v28  ;;  %2957 = vrot.lane.b32.xlu1 %v2956_v24, %s3143_s11  ;;  %v3001_v17 = vpack.i.bf16 %v1001_v19, %v999_v0  ;;  %v3036_v48 = vpack.i.bf16 %v1076_v13, %v1074_v7  ;;  %v1150_v24 = vld [vmem:[%s4619_s5] sm:$0xff]  ;;  %v1156_v19 = vld [vmem:[%s4619_s5 + $0x30] sm:$0xff] }
 0x28f   : > { %2977 = vrot.lane.b32.xlu0 %v4646_v21, %s3143_s11  ;;  %v1044_v52 = vsel %vm1039_vm2, %v2769_v58, %v2784_v33  ;;  %v1075_v29 = vsel %vm1072_vm1, %v2580_v50, %v2595_v41  ;;  %v1154_v0 = vld [vmem:[%s4619_s5 + $0x20] sm:$0xff] }
 0x291   : > { %v2818_v60 = vpop.permute.xlu0 %2817 }
 0x292   : > { %2967 = vrot.lane.b32.xlu1 %v2966_v25, %s3143_s11  ;;  %v2820_v47 = vunpack.i.h.bf16 %v2818_v60 }
 0x293   : > { %2987 = vrot.lane.b32.xlu0 %v2986_v62, %s3143_s11  ;;  %v2819_v62 = vunpack.i.l.bf16 %v2818_v60 }
 0x295   : > { %v4102_v38 = vpop.permute.xlu0 %2827  ;;  %v4119_v22 = vpop.permute.xlu1 %2822 }
 0x296   : > { %2972 = vrot.lane.b32.xlu1 %v2971_v36, %s3143_s11  ;;  %v4657_v36 = vpack.i.bf16 %v3852_v32, %v3847_v1  ;;  %v1157_v1 = vld [vmem:[%s4619_s5 + $0x38] sm:$0xff]  ;;  %v2825_v6 = vunpack.i.h.bf16 %v4119_v22  ;;  %v2824_v2 = vunpack.i.l.bf16 %v4119_v22 }
 0x297   : > { %2997 = vrot.lane.b32.xlu0 %v3800_v46, %s3143_s11  ;;  %v2785_v46 = vunpack.i.h.bf16 %v3947_v45  ;;  %v1002_v45 = vsel %vm994_vm0, %v2780_v20, %v2805_v63  ;;  %v4121_v63 = vld [vmem:[#allocation4 + $0x8] sm:$0xff] }
 0x298   : > { %v3006_v23 = vpack.i.bf16 %v1002_v45, %v1000_v30  ;;  %1695 = vmatprep.mubr.f32.mxu0 %v4121_v63 }
 0x299   : > { %v1047_v44 = vsel %vm1039_vm2, %v2785_v46, %v2810_v59  ;;  %v4115_v42 = vpop.permute.xlu0 %2832  ;;  %v1151_v59 = vld [vmem:[%s4619_s5 + $0x8] sm:$0xff] }
 0x29a   : > { %2982 = vrot.lane.b32.xlu1 %v3985_v5, %s3143_s11  ;;  %v3031_v31 = vpack.i.bf16 %v1047_v44, %v1045_v57  ;;  %v4654_v5 = vpack.i.bf16 %v3837_v54, %v3842_v56  ;;  %v4655_v54 = vpack.i.bf16 %v3934_v39, %v3928_v18  ;;  %v2579_v56 = vunpack.i.l.bf16 %v3768_v55  ;;  %v1152_v55 = vld [vmem:[%s4619_s5 + $0x10] sm:$0xff] }
 0x29b   : > { %3002 = vrot.lane.b32.xlu0 %v3001_v17, %s3143_s11  ;;  %v4656_v18 = vpack.i.bf16 %v3868_v12, %v3873_v3  ;;  %v1435_v12 = vsel %vm871_vm12, %v2819_v62, %v2820_v47  ;;  %v1155_v17 = vld [vmem:[%s4619_s5 + $0x28] sm:$0xff]  ;;  %v1491_v44 = vsel %vm871_vm12, %v2824_v2, %v2825_v6 }
 0x29c   : > { %v1073_v35 = vsel %vm1072_vm1, %v2579_v56, %v2594_v8 }
 0x29d   : > { %v2838_v28 = vpop.permute.xlu0 %2837  ;;  %v3041_v15 = vpack.i.bf16 %v1075_v29, %v1073_v35  ;;  %v2830_v35 = vunpack.i.h.bf16 %v4102_v38 }
 0x29e   : > { %2992 = vrot.lane.b32.xlu1 %v4654_v5, %s3143_s11  ;;  %v2839_v39 = vunpack.i.l.bf16 %v2838_v28  ;;  %v2840_v10 = vunpack.i.h.bf16 %v2838_v28 }
 0x29f   : > { %3017 = vrot.lane.b32.xlu0 %v3016_v27, %s3143_s11 }
 0x2a0   : > { %v1434_v3 = vsel %vm871_vm12, %v2839_v39, %v2819_v62 }
 0x2a2   : > { %3007 = vrot.lane.b32.xlu1 %v3006_v23, %s3143_s11 }
 0x2a3   : > { %3032 = vrot.lane.b32.xlu0 %v3031_v31, %s3143_s11 }
 0x2a6   : > { %3012 = vrot.lane.b32.xlu1 %v3916_v16, %s3143_s11  ;;  %v1046_v16 = vsel %vm1039_vm2, %v2770_v9, %v2785_v46 }
 0x2a7   : > { %3037 = vrot.lane.b32.xlu0 %v3036_v48, %s3143_s11  ;;  %v3026_v11 = vpack.i.bf16 %v1046_v16, %v1044_v52 }
 0x2a8   : > { %v4133_v21 = vpop.permute.xlu1 %2842 }
 0x2aa   : > { %3022 = vrot.lane.b32.xlu1 %v4656_v18, %s3143_s11 }
 0x2ab   : > { %3047 = vrot.lane.b32.xlu0 %v4655_v54, %s3143_s11 }
 0x2ac   : > { %v2848_v20 = vpop.permute.xlu1 %2847 }
 0x2ad   : > { %v2850_v51 = vunpack.i.h.bf16 %v2848_v20  ;;  %v2849_v25 = vunpack.i.l.bf16 %v2848_v20 }
 0x2ae   : > { %3027 = vrot.lane.b32.xlu1 %v3026_v11, %s3143_s11  ;;  %v2829_v11 = vunpack.i.l.bf16 %v4102_v38 }
 0x2af   : > { %1160 = vperm.xlu0 %2544, %v1150_v24   ;;  %v1436_v40 = vsel %vm871_vm12, %v2840_v10, %v2849_v25  ;;  %v4154_v26 = vpack.c.bf16 %v2850_v51, %v2820_v47  ;;  %v1437_v43 = vsel %vm871_vm12, %v2849_v25, %v2850_v51 }
 0x2b0   : > { %v2359_v14 = vpack.c.bf16 %v1436_v40, %v1434_v3  ;;  %v2357_v37 = vpack.c.bf16 %v1437_v43, %v1435_v12  ;;  %v2853_v49 = vpop.permute.xlu1 %2852 }
 0x2b1   : > { %v2854_v60 = vunpack.i.l.bf16 %v2853_v49  ;;  %v2855_v33 = vunpack.i.h.bf16 %v2853_v49 }
 0x2b2   : > { %3042 = vrot.lane.b32.xlu1 %v3041_v15, %s3143_s11  ;;  %2358 = vmatprep.subr.bf16.mxu0 %v2357_v37 }
 0x2b3   : > { %1170 = vperm.xlu0 %2544, %v1152_v55   ;;  %2360 = vmatpush1.bf16.msra.mxu0 %v2359_v14  ;;  %v1490_v41 = vsel %vm871_vm12, %v2854_v60, %v2824_v2  ;;  %v1443_v14 = vsel %vm871_vm12, %v2829_v11, %v2830_v35  ;;  %v2844_v2 = vunpack.i.l.bf16 %v4133_v21 }
 0x2b6   : > { %3052 = vrot.lane.b32.xlu1 %v4657_v36, %s3143_s11  ;;  %s2494_s11 = smul.u32 192, %s4662_s22 }
 0x2b7   : > { %1180 = vperm.xlu0 %2544, %v1154_v0  }
 0x2b8   : > { %s4553_s15 = scalar_lea.vmem %s4620_s6, %s2494_s11 }
 0x2ba   : > { %1165 = vperm.xlu1 %2545, %v1151_v59  }
 0x2bb   : > { %1190 = vperm.xlu0 %2544, %v1156_v19  }
 0x2be   : > { %1175 = vperm.xlu1 %2545, %v1153_v53  }
 0x2c2   : > { %1185 = vperm.xlu1 %2545, %v1155_v17  }
 0x2c6   : > { %1195 = vperm.xlu1 %2545, %v1157_v1  }
 0x2c8   : > { %v4192_v13 = vpop.permute.xlu1 %2867 }
 0x2c9   : > { %v4180_v32 = vpop.permute.xlu0 %2857 }
 0x2ca   : > { %v2860_v59 = vunpack.i.h.bf16 %v4180_v32  ;;  %v2859_v53 = vunpack.i.l.bf16 %v4180_v32 }
 0x2cc   : > { %v4196_v23 = vpop.permute.xlu1 %2877  ;;  %v1442_v32 = vsel %vm871_vm12, %v2859_v53, %v2829_v11 }
 0x2cd   : > { %v4182_v4 = vpop.permute.xlu0 %2862  ;;  %v2880_v20 = vunpack.i.h.bf16 %v4196_v23  ;;  %v2879_v55 = vunpack.i.l.bf16 %v4196_v23 }
 0x2cf   : > { %v1445_v15 = vsel %vm871_vm12, %v2879_v55, %v2880_v20 }
 0x2d0   : > { %v4200_v22 = vpop.permute.xlu1 %2882 }
 0x2d1   : > { %v2873_v46 = vpop.permute.xlu0 %2872  ;;  %v2884_v11 = vunpack.i.l.bf16 %v4200_v22 }
 0x2d2   : > { %v2875_v27 = vunpack.i.h.bf16 %v2873_v46  ;;  %v2874_v57 = vunpack.i.l.bf16 %v2873_v46 }
 0x2d4   : > { %v4188_v8 = vpack.c.bf16 %v2875_v27, %v2825_v6  ;;  %v1492_v30 = vsel %vm871_vm12, %v2855_v33, %v2874_v57  ;;  %v1493_v45 = vsel %vm871_vm12, %v2874_v57, %v2875_v27  ;;  %v2845_v6 = vunpack.i.h.bf16 %v4133_v21 }
 0x2d5   : > { %v2415_v31 = vpack.c.bf16 %v1492_v30, %v1490_v41  ;;  %v2413_v7 = vpack.c.bf16 %v1493_v45, %v1491_v44  ;;  %v1444_v27 = vsel %vm871_vm12, %v2860_v59, %v2879_v55  ;;  %v2365_v57 = vpack.c.bf16 %v1445_v15, %v1443_v14  ;;  %v4272_v55 = vld [vmem:[#allocation4 + $0x10] sm:$0xff] }
 0x2d6   : > { %v2869_v14 = vunpack.i.l.bf16 %v4192_v13  ;;  %v2865_v15 = vunpack.i.h.bf16 %v4182_v4 }
 0x2d7   : > { %2414 = vmatprep.subr.bf16.mxu1 %v2413_v7  ;;  %v2367_v7 = vpack.c.bf16 %v1444_v27, %v1442_v32 }
 0x2d8   : > { %2416 = vmatpush1.bf16.msra.mxu1 %v2415_v31  ;;  %v2421_v31 = vpack.c.bf16 %v2845_v6, %v2844_v2 }
 0x2d9   : > { %v4194_v5 = vpop.permute.xlu0 %2887 }
 0x2da   : > { %v2890_v29 = vunpack.i.h.bf16 %v4194_v5  ;;  %v2889_v10 = vunpack.i.l.bf16 %v4194_v5 }
 0x2dc   : > { %v1439_v19 = vsel %vm871_vm12, %v2889_v10, %v2890_v29 }
 0x2dd   : > { %v4202_v58 = vpop.permute.xlu1 %2892 }
 0x2de   : > { %v4633_v56 = vunpack.i.h.bf16 %v4202_v58  ;;  %v2894_v28 = vunpack.i.l.bf16 %v4202_v58 }
 0x2e0   : > { %v1495_v47 = vsel %vm871_vm12, %v2894_v28, %v4633_v56 }
 0x2e1   : > { %v4198_v48 = vpop.permute.xlu0 %2897 }
 0x2e5   : > { %v2903_v9 = vpop.permute.xlu0 %2902 }
 0x2e6   : > { %v2904_v51 = vunpack.i.l.bf16 %v2903_v9  ;;  %v2905_v12 = vunpack.i.h.bf16 %v2903_v9 }
 0x2e8   : > { %v1438_v37 = vsel %vm871_vm12, %v2904_v51, %v2889_v10  ;;  %v2900_v10 = vunpack.i.h.bf16 %v4198_v48  ;;  %v2899_v51 = vunpack.i.l.bf16 %v4198_v48 }
 0x2e9   : > { %v4204_v54 = vpop.permute.xlu0 %2922 }
 0x2ec   : > { %v4212_v16 = vpop.permute.xlu1 %2907 }
 0x2ed   : > { %v4208_v24 = vpop.permute.xlu0 %2927  ;;  %v2910_v9 = vunpack.i.h.bf16 %v4212_v16 }
 0x2ee   : > { %v4632_v50 = vunpack.i.h.bf16 %v4208_v24  ;;  %v2929_v52 = vunpack.i.l.bf16 %v4208_v24 }
 0x2f0   : > { %v1497_v62 = vsel %vm871_vm12, %v2929_v52, %v4632_v50  ;;  %v4228_v25 = vpop.permute.xlu1 %2912 }
 0x2f1   : > { %v4220_v18 = vpop.permute.xlu0 %2932  ;;  %v2417_v39 = vpack.c.bf16 %v1497_v62, %v1495_v47  ;;  %v2915_v3 = vunpack.i.h.bf16 %v4228_v25  ;;  %v2914_v40 = vunpack.i.l.bf16 %v4228_v25  ;;  %v2834_v62 = vunpack.i.l.bf16 %v4115_v42 }
 0x2f2   : > { %v2439_v25 = vpack.c.bf16 %v2880_v20, %v2830_v35 }
 0x2f3   : > { %2418 = vmatprep.subr.bf16.mxu1 %v2417_v39  ;;  %v1440_v0 = vsel %vm871_vm12, %v2905_v12, %v2914_v40  ;;  %v1441_v36 = vsel %vm871_vm12, %v2914_v40, %v2915_v3  ;;  %v2885_v39 = vunpack.i.h.bf16 %v4200_v22  ;;  %v2924_v12 = vunpack.i.l.bf16 %v4204_v54 }
 0x2f4   : > { %v2363_v17 = vpack.c.bf16 %v1440_v0, %v1438_v37  ;;  %v2918_v1 = vpop.permute.xlu1 %2917  ;;  %v2361_v49 = vpack.c.bf16 %v1441_v36, %v1439_v19  ;;  %v2870_v40 = vunpack.i.h.bf16 %v4192_v13  ;;  %v2864_v37 = vunpack.i.l.bf16 %v4182_v4 }
 0x2f5   : > { %v4232_v43 = vpop.permute.xlu0 %2937  ;;  %v2920_v60 = vunpack.i.h.bf16 %v2918_v1  ;;  %v2919_v46 = vunpack.i.l.bf16 %v2918_v1  ;;  %v2925_v19 = vunpack.i.h.bf16 %v4204_v54  ;;  %v1452_v4 = vsel %vm871_vm12, %v2865_v15, %v2884_v11 }
 0x2f6   : > { %2362 = vmatprep.subr.bf16.mxu0 %v2361_v49  ;;  %v1453_v1 = vsel %vm871_vm12, %v2884_v11, %v2885_v39  ;;  %v4658_v49 = vmov 0.0   ;;  %v1450_v11 = vsel %vm871_vm12, %v2864_v37, %v2834_v62  ;;  %v2935_v15 = vunpack.i.h.bf16 %v4220_v18 }
 0x2f7   : > { %v1494_v44 = vsel %vm871_vm12, %v2919_v46, %v2894_v28  ;;  %v1496_v41 = vsel %vm871_vm12, %v2920_v60, %v2929_v52  ;;  %2364 = vmatpush1.bf16.msra.mxu0 %v2363_v17  ;;  %v2909_v28 = vunpack.i.l.bf16 %v4212_v16  ;;  %v2835_v52 = vunpack.i.h.bf16 %v4115_v42  ;;  %v4303_v60 = vld [vmem:[#allocation4 + $0x28] sm:$0xff] }
 0x2f8   : > { %v2419_v30 = vpack.c.bf16 %v1496_v41, %v1494_v44  ;;  %v4258_v45 = vpop.permute.xlu1 %2942  ;;  %2366 = vmatprep.subr.bf16.mxu0 %v2365_v57  ;;  %v1446_v46 = vsel %vm871_vm12, %v2924_v12, %v2899_v51 }
 0x2f9   : > { %v4252_v33 = vpop.permute.xlu0 %2947  ;;  %v2425_v36 = vpack.c.bf16 %v2910_v9, %v2909_v28  ;;  %v1451_v54 = vsel %vm871_vm12, %v2834_v62, %v2835_v52  ;;  %v2945_v44 = vunpack.i.h.bf16 %v4258_v45  ;;  %v2944_v41 = vunpack.i.l.bf16 %v4258_v45 }
 0x2fa   : > { %2420 = vmatpush1.bf16.msra.mxu1 %v2419_v30  ;;  %v2375_v62 = vpack.c.bf16 %v1452_v4, %v1450_v11  ;;  %v2950_v37 = vunpack.i.h.bf16 %v4252_v33  ;;  %v4357_v11 = vld [vmem:[#allocation4 + $0x58] sm:$0xff] }
 0x2fb   : > { %2368 = vmatpush1.bf16.msra.mxu0 %v2367_v7  ;;  %2422 = vmatprep.subr.bf16.mxu1 %v2421_v31  ;;  %v2429_v7 = vpack.c.bf16 %v2870_v40, %v2869_v14 }
 0x2fc   : > { %v4281_v0 = vpop.permute.xlu1 %2952 }
 0x2fd   : > { %v4266_v47 = vpop.permute.xlu0 %2962  ;;  %v2955_v59 = vunpack.i.h.bf16 %v4281_v0  ;;  %v2954_v53 = vunpack.i.l.bf16 %v4281_v0  ;;  %2215 = vmatmul.mubr.msk.f32.vlgmr.msra.gmra.mrb[4].mxu1 %vm1606_vm3, %v4272_v55 }
 0x2fe   : > { %2424 = vmatpush3.bf16.msra.mxu1 %v3923_v34  ;;  %1814 = vmatprep.mubr.f32.mxu1 %v4658_v49  ;;  %v1447_v34 = vsel %vm871_vm12, %v2899_v51, %v2900_v10  ;;  %v2373_v51 = vpack.c.bf16 %v1453_v1, %v1451_v54  ;;  %v2940_v54 = vunpack.i.h.bf16 %v4232_v43  ;;  %v2433_v1 = vpack.c.bf16 %v2945_v44, %v2944_v41 }
 0x2ff   : > { %v1448_v27 = vsel %vm871_vm12, %v2925_v19, %v2954_v53  ;;  %2426 = vmatprep.subr.bf16.mxu1 %v2425_v36  ;;  %v1449_v57 = vsel %vm871_vm12, %v2954_v53, %v2955_v59  ;;  %v2934_v19 = vunpack.i.l.bf16 %v4220_v18  ;;  %v2939_v36 = vunpack.i.l.bf16 %v4232_v43 }
 0x300   : > { %v2371_v32 = vpack.c.bf16 %v1448_v27, %v1446_v46  ;;  %v2958_v30 = vpop.permute.xlu1 %2957  ;;  %v2369_v31 = vpack.c.bf16 %v1449_v57, %v1447_v34  ;;  %v2949_v53 = vunpack.i.l.bf16 %v4252_v33  ;;  %v4329_v46 = vld [vmem:[#allocation4 + $0x40] sm:$0xff]  ;;  %v2965_v27 = vunpack.i.h.bf16 %v4266_v47 }
 0x301   : > { %v4290_v17 = vpop.permute.xlu0 %2977  ;;  %2216 = vmatmul.mubr.msk.f32.gmra.mrb[6].mxu1 %vm1606_vm3, %v4303_v60  ;;  %v2964_v34 = vunpack.i.l.bf16 %v4266_v47  ;;  %v2959_v33 = vunpack.i.l.bf16 %v2958_v30 }
 0x302   : > { %2370 = vmatprep.subr.bf16.mxu0 %v2369_v31  ;;  %2428 = vmatpush3.bf16.msra.mxu1 %v4004_v61  ;;  %v2960_v61 = vunpack.i.h.bf16 %v2958_v30  ;;  %v1454_v31 = vsel %vm871_vm12, %v2939_v36, %v2934_v19  ;;  %v1459_v30 = vsel %vm871_vm12, %v2949_v53, %v2844_v2  ;;  %v2435_v2 = vpack.c.bf16 %v2915_v3, %v2890_v29  ;;  %v4380_v29 = vld [vmem:[#allocation4 + $0x70] sm:$0xff] }
 0x303   : > { %2372 = vmatpush1.bf16.msra.mxu0 %v2371_v32  ;;  %2430 = vmatprep.subr.bf16.mxu1 %v2429_v7  ;;  %v1455_v7 = vsel %vm871_vm12, %v2934_v19, %v2935_v15  ;;  %v1461_v19 = vsel %vm871_vm12, %v2950_v37, %v2845_v6  ;;  %v2437_v36 = vpack.c.bf16 %v2965_v27, %v2964_v34 }
 0x304   : > { %v4339_v57 = vpop.permute.xlu1 %2967  ;;  %2374 = vmatprep.subr.bf16.mxu0 %v2373_v51  ;;  %1820 = vmatprep.mubr.f32.mxu1 %v4658_v49  ;;  %v1458_v50 = vsel %vm871_vm12, %v2959_v33, %v2949_v53  ;;  %v2381_v5 = vpack.c.bf16 %v1461_v19, %v1459_v30  ;;  %v2979_v33 = vunpack.i.l.bf16 %v4290_v17 }
 0x305   : > { %v4320_v12 = vpop.permute.xlu0 %2987  ;;  %v2970_v4 = vunpack.i.h.bf16 %v4339_v57  ;;  %v2969_v43 = vunpack.i.l.bf16 %v4339_v57  ;;  %2217 = vmatmul.mubr.msk.f32.gmra.mrb[8].mxu1 %vm1606_vm3, %v4329_v46 }
 0x306   : > { %2432 = vmatpush3.bf16.msra.mxu1 %v4154_v26  ;;  %1826 = vmatprep.mubr.f32.mxu1 %v4658_v49  ;;  %v2990_v3 = vunpack.i.h.bf16 %v4320_v12  ;;  %v2989_v53 = vunpack.i.l.bf16 %v4320_v12 }
 0x307   : > { %v1456_v51 = vsel %vm871_vm12, %v2940_v54, %v2969_v43  ;;  %2376 = vmatpush1.bf16.msra.mxu0 %v2375_v62  ;;  %2434 = vmatprep.subr.bf16.mxu1 %v2433_v1  ;;  %v1457_v26 = vsel %vm871_vm12, %v2969_v43, %v2970_v4  ;;  %v1460_v43 = vsel %vm871_vm12, %v2960_v61, %v2950_v37  ;;  %v2980_v61 = vunpack.i.h.bf16 %v4290_v17  ;;  %v4410_v17 = vld [vmem:[#allocation4 + $0x88] sm:$0xff] }
 0x308   : > { %v2379_v62 = vpack.c.bf16 %v1456_v51, %v1454_v31  ;;  %v2973_v54 = vpop.permute.xlu1 %2972  ;;  %v2377_v1 = vpack.c.bf16 %v1457_v26, %v1455_v7  ;;  %v2383_v31 = vpack.c.bf16 %v1460_v43, %v1458_v50  ;;  %v1467_v51 = vsel %vm871_vm12, %v2989_v53, %v2869_v14 }
 0x309   : > { %v4344_v32 = vpop.permute.xlu0 %2997  ;;  %v2975_v21 = vunpack.i.h.bf16 %v2973_v54  ;;  %v2974_v56 = vunpack.i.l.bf16 %v2973_v54  ;;  %2218 = vmatmul.mubr.msk.f32.gmra.mrb[10].mxu1 %vm1606_vm3, %v4357_v11  ;;  %v2443_v26 = vpack.c.bf16 %v2955_v59, %v2900_v10 }
 0x30a   : > { %2378 = vmatprep.subr.bf16.mxu0 %v2377_v1  ;;  %2436 = vmatpush3.bf16.msra.mxu1 %v2435_v2  ;;  %v3000_v23 = vunpack.i.h.bf16 %v4344_v32  ;;  %v2999_v35 = vunpack.i.l.bf16 %v4344_v32  ;;  %v2447_v1 = vpack.c.bf16 %v2885_v39, %v2835_v52  ;;  %v4456_v52 = vld [vmem:[#allocation4 + $0xb8] sm:$0xff] }
 0x30b   : > { %2380 = vmatpush1.bf16.msra.mxu0 %v2379_v62  ;;  %2438 = vmatprep.subr.bf16.mxu1 %v2437_v36  ;;  %v1463_v37 = vsel %vm871_vm12, %v2974_v56, %v2909_v28  ;;  %v1465_v38 = vsel %vm871_vm12, %v2975_v21, %v2910_v9  ;;  %v1462_v50 = vsel %vm871_vm12, %v2979_v33, %v2974_v56 }
 0x30c   : > { %v4393_v7 = vpop.permute.xlu1 %2982  ;;  %2382 = vmatprep.subr.bf16.mxu0 %v2381_v5  ;;  %1832 = vmatprep.mubr.f32.mxu1 %v4658_v49  ;;  %v1464_v16 = vsel %vm871_vm12, %v2980_v61, %v2975_v21  ;;  %v2385_v9 = vpack.c.bf16 %v1465_v38, %v1463_v37  ;;  %v1469_v56 = vsel %vm871_vm12, %v2990_v3, %v2870_v40  ;;  %v4435_v40 = vld [vmem:[#allocation4 + $0xa0] sm:$0xff] }
 0x30d   : > { %v4376_v6 = vpop.permute.xlu0 %3002  ;;  %v2985_v20 = vunpack.i.h.bf16 %v4393_v7  ;;  %v2984_v28 = vunpack.i.l.bf16 %v4393_v7  ;;  %2219 = vmatmul.mubr.msk.f32.gmra.mrb[12].mxu1 %vm1606_vm3, %v4380_v29  ;;  %v2445_v2 = vpack.c.bf16 %v3000_v23, %v2999_v35  ;;  %v2387_v36 = vpack.c.bf16 %v1464_v16, %v1462_v50 }
 0x30e   : > { %2440 = vmatpush3.bf16.msra.mxu1 %v2439_v25  ;;  %1838 = vmatprep.mubr.f32.mxu1 %v4658_v49  ;;  %v2389_v10 = vpack.c.bf16 %v1469_v56, %v1467_v51  ;;  %v3005_v5 = vunpack.i.h.bf16 %v4376_v6  ;;  %v3004_v25 = vunpack.i.l.bf16 %v4376_v6  ;;  %v1126_v56 = vld [vmem:[#allocation4] sm:$0xff] }
 0x30f   : > { %v2441_v30 = vpack.c.bf16 %v2985_v20, %v2984_v28  ;;  %2384 = vmatpush1.bf16.msra.mxu0 %v2383_v31 }
 0x310   : > { %v2993_v19 = vpop.permute.xlu1 %2992  ;;  %2386 = vmatprep.subr.bf16.mxu0 %v2385_v9 }
 0x311   : > { %v4403_v12 = vpop.permute.xlu0 %3017  ;;  %v2995_v62 = vunpack.i.h.bf16 %v2993_v19  ;;  %v2994_v54 = vunpack.i.l.bf16 %v2993_v19  ;;  %2442 = vmatprep.subr.bf16.mxu1 %v2441_v30  ;;  %2220 = vmatmul.mubr.msk.f32.gmra.mrb[14].mxu1 %vm1606_vm3, %v4410_v17 }
 0x312   : > { %v3020_v13 = vunpack.i.h.bf16 %v4403_v12  ;;  %v3019_v48 = vunpack.i.l.bf16 %v4403_v12  ;;  %2444 = vmatpush3.bf16.msra.mxu1 %v2443_v26  ;;  %1844 = vmatprep.mubr.f32.mxu1 %v4658_v49 }
 0x313   : > { %v1466_v14 = vsel %vm871_vm12, %v2994_v54, %v2989_v53  ;;  %v1468_v0 = vsel %vm871_vm12, %v2995_v62, %v2990_v3  ;;  %2388 = vmatpush1.bf16.msra.mxu0 %v2387_v36  ;;  %2446 = vmatprep.subr.bf16.mxu1 %v2445_v2  ;;  %v4659_v2 = vunpack.i.h.bf16 %v4202_v58  ;;  %v4660_v36 = vunpack.i.h.bf16 %v4208_v24 }
 0x314   : > { %v2391_v43 = vpack.c.bf16 %v1468_v0, %v1466_v14  ;;  %v3008_v21 = vpop.permute.xlu1 %3007  ;;  %2390 = vmatprep.subr.bf16.mxu0 %v2389_v10  ;;  %v1475_v42 = vsel %vm871_vm12, %v3019_v48, %v2964_v34  ;;  %v1477_v22 = vsel %vm871_vm12, %v3020_v13, %v2965_v27  ;;  %v1130_v10 = vld [vmem:[#allocation4 + $0x20] sm:$0xff] }
 0x315   : > { %v4439_v59 = vpop.permute.xlu0 %3032  ;;  %v3010_v37 = vunpack.i.h.bf16 %v3008_v21  ;;  %v3009_v53 = vunpack.i.l.bf16 %v3008_v21  ;;  %2221 = vmatmul.mubr.msk.f32.gmra.mrb[16].mxu1 %vm1606_vm3, %v4435_v40  ;;  %v2397_v50 = vpack.c.bf16 %v1477_v22, %v1475_v42  ;;  %v2457_v62 = vpack.c.bf16 %v4660_v36, %v4659_v2 }
 0x316   : > { %2448 = vmatpush3.bf16.msra.mxu1 %v2447_v1  ;;  %1850 = vmatprep.mubr.f32.mxu1 %v4658_v49  ;;  %v3035_v38 = vunpack.i.h.bf16 %v4439_v59  ;;  %v3034_v12 = vunpack.i.l.bf16 %v4439_v59 }
 0x317   : > { %v1470_v39 = vsel %vm871_vm12, %v3004_v25, %v3009_v53  ;;  %v1472_v6 = vsel %vm871_vm12, %v3005_v5, %v3010_v37  ;;  %2392 = vmatpush1.bf16.msra.mxu0 %v2391_v43  ;;  %v1471_v3 = vsel %vm871_vm12, %v3009_v53, %v2944_v41  ;;  %v1473_v34 = vsel %vm871_vm12, %v3010_v37, %v2945_v44  ;;  %v1133_v43 = vld [vmem:[#allocation4 + $0x38] sm:$0xff]  ;;  %v1136_v53 = vld [vmem:[#allocation4 + $0x50] sm:$0xff] }
 0x318   : > { %v2395_v47 = vpack.c.bf16 %v1472_v6, %v1470_v39  ;;  %v3013_v61 = vpop.permute.xlu1 %3012  ;;  %v2393_v27 = vpack.c.bf16 %v1473_v34, %v1471_v3  ;;  %v2451_v44 = vpack.c.bf16 %v2970_v4, %v2935_v15  ;;  %v1481_v18 = vsel %vm871_vm12, %v3035_v38, %v2985_v20  ;;  %v1135_v34 = vld [vmem:[#allocation4 + $0x48] sm:$0xff] }
 0x319   : > { %v3038_v33 = vpop.permute.xlu0 %3037  ;;  %v3015_v49 = vunpack.i.h.bf16 %v3013_v61  ;;  %v3014_v31 = vunpack.i.l.bf16 %v3013_v61  ;;  %2222 = vmatmul.mubr.msk.f32.gmra.mrb[18].mxu1 %vm1606_vm3, %v4456_v52 }
 0x31a   : > { %2394 = vmatprep.subr.bf16.mxu0 %v2393_v27  ;;  %1921 = vmatprep.mubr.f32.mxu1 %v4121_v63  ;;  %v3040_v30 = vunpack.i.h.bf16 %v3038_v33  ;;  %v3039_v51 = vunpack.i.l.bf16 %v3038_v33  ;;  %v1479_v63 = vsel %vm871_vm12, %v3034_v12, %v2984_v28  ;;  %v1139_v27 = vld [vmem:[#allocation4 + $0x68] sm:$0xff] }
 0x31b   : > { %v2449_v45 = vpack.c.bf16 %v3015_v49, %v3014_v31  ;;  %2396 = vmatpush1.bf16.msra.mxu0 %v2395_v47  ;;  %v2401_v7 = vpack.c.bf16 %v1481_v18, %v1479_v63 }
 0x31c   : > { %v3023_v41 = vpop.permute.xlu1 %3022  ;;  %2398 = vmatprep.subr.bf16.mxu0 %v2397_v50  ;;  %v1485_v58 = vsel %vm871_vm12, %v3040_v30, %v3000_v23  ;;  %v1144_v50 = vld [vmem:[#allocation4 + $0x90] sm:$0xff] }
 0x31d   : > { %v3025_v16 = vunpack.i.h.bf16 %v3023_v41  ;;  %v3024_v9 = vunpack.i.l.bf16 %v3023_v41  ;;  %2450 = vmatprep.subr.bf16.mxu1 %v2449_v45  ;;  %v3048_v26 = vpop.permute.xlu0 %3047  ;;  %v1148_v45 = vld [vmem:[#allocation4 + $0xb0] sm:$0xff] }
 0x31e   : > { %2452 = vmatpush3.bf16.msra.mxu1 %v2451_v44  ;;  %v3050_v20 = vunpack.i.h.bf16 %v3048_v26  ;;  %v3049_v14 = vunpack.i.l.bf16 %v3048_v26  ;;  %v1147_v44 = vld [vmem:[#allocation4 + $0xa8] sm:$0xff] }
 0x31f   : > { %v1474_v15 = vsel %vm871_vm12, %v3024_v9, %v3019_v48  ;;  %v1476_v57 = vsel %vm871_vm12, %v3025_v16, %v3020_v13  ;;  %2454 = vmatprep.subr.bf16.mxu1 %v4188_v8  ;;  %v1129_v13 = vld [vmem:[#allocation4 + $0x18] sm:$0xff]  ;;  %v1483_v48 = vsel %vm871_vm12, %v3039_v51, %v2999_v35  ;;  %v1132_v35 = vld [vmem:[#allocation4 + $0x30] sm:$0xff] }
 0x320   : > { %v2399_v4 = vpack.c.bf16 %v1476_v57, %v1474_v15  ;;  %v3028_v19 = vpop.permute.xlu1 %3027  ;;  %v2405_v5 = vpack.c.bf16 %v1485_v58, %v1483_v48  ;;  %v1487_v32 = vsel %vm871_vm12, %v3049_v14, %v3014_v31  ;;  %v1489_v23 = vsel %vm871_vm12, %v3050_v20, %v3015_v49  ;;  %v1138_v49 = vld [vmem:[#allocation4 + $0x60] sm:$0xff] }
 0x321   : > { %v3030_v54 = vunpack.i.h.bf16 %v3028_v19  ;;  %v3029_v28 = vunpack.i.l.bf16 %v3028_v19  ;;  %1922 = vmatmul.mubr.f32.vlgmr.msra.gmra.mrb[20].mxu1 %v1126_v56  ;;  %v2409_v3 = vpack.c.bf16 %v1489_v23, %v1487_v32  ;;  %v1142_v31 = vld [vmem:[#allocation4 + $0x80] sm:$0xff] }
 0x322   : > { %2400 = vmatpush1.bf16.msra.mxu0 %v2399_v4  ;;  %2456 = vmatpush3.bf16.msra.mxu1 %v4188_v8 }
 0x323   : > { %v1478_v24 = vsel %vm871_vm12, %v3029_v28, %v3034_v12  ;;  %v1480_v0 = vsel %vm871_vm12, %v3030_v54, %v3035_v38  ;;  %2402 = vmatprep.subr.bf16.mxu0 %v2401_v7  ;;  %2458 = vmatprep.subr.bf16.mxu1 %v2457_v62  ;;  %v1141_v38 = vld [vmem:[#allocation4 + $0x78] sm:$0xff] }
 0x324   : > { %v2403_v59 = vpack.c.bf16 %v1480_v0, %v1478_v24  ;;  %v3043_v1 = vpop.permute.xlu1 %3042  ;;  %1926 = vmatprep.mubr.f32.mxu1 %v1130_v10  ;;  %v1145_v12 = vld [vmem:[#allocation4 + $0x98] sm:$0xff] }
 0x325   : > { %v3045_v8 = vunpack.i.h.bf16 %v3043_v1  ;;  %v3044_v21 = vunpack.i.l.bf16 %v3043_v1  ;;  %1927 = vmatmul.mubr.f32.gmra.mrb[22].mxu1 %v1129_v13 }
 0x326   : > { %2404 = vmatpush1.bf16.msra.mxu0 %v2403_v59  ;;  %2460 = vmatpush3.bf16.msra.mxu1 %v2457_v62 }
 0x327   : > { %v1482_v25 = vsel %vm871_vm12, %v3044_v21, %v3039_v51  ;;  %v1484_v37 = vsel %vm871_vm12, %v3045_v8, %v3040_v30  ;;  %2406 = vmatprep.subr.bf16.mxu0 %v2405_v5  ;;  %1931 = vmatprep.mubr.f32.mxu1 %v1133_v43 }
 0x328   : > { %v2407_v42 = vpack.c.bf16 %v1484_v37, %v1482_v25  ;;  %v3053_v22 = vpop.permute.xlu1 %3052 }
 0x329   : > { %v3055_v39 = vunpack.i.h.bf16 %v3053_v22  ;;  %v3054_v6 = vunpack.i.l.bf16 %v3053_v22  ;;  %1932 = vmatmul.mubr.f32.gmra.mrb[24].mxu1 %v1132_v35 }
 0x32a   : > { %2408 = vmatpush1.bf16.msra.mxu0 %v2407_v42  ;;  %1936 = vmatprep.mubr.f32.mxu1 %v1136_v53 }
 0x32b   : > { %v1486_v47 = vsel %vm871_vm12, %v3054_v6, %v3049_v14  ;;  %v1488_v61 = vsel %vm871_vm12, %v3055_v39, %v3050_v20  ;;  %2410 = vmatprep.subr.bf16.mxu0 %v2409_v3 }
 0x32c   : > { %v2411_v33 = vpack.c.bf16 %v1488_v61, %v1486_v47 }
 0x32d   : > { %1937 = vmatmul.mubr.f32.gmra.mrb[26].mxu1 %v1135_v34 }
 0x32e   : > { %2412 = vmatpush1.bf16.msra.mxu0 %v2411_v33  ;;  %1941 = vmatprep.mubr.f32.mxu1 %v1139_v27  ;;  %v1161_v20 = vpop.permute.xlu0 %1160 }
 0x331   : > { %1696 = vmatmul.mubr.f32.vlgmr.msra.gmra.mrb[8].mxu0 %v1126_v56  ;;  %1942 = vmatmul.mubr.f32.gmra.mrb[28].mxu1 %v1138_v49 }
 0x332   : > { %1701 = vmatprep.mubr.f32.mxu0 %v1130_v10  ;;  %1946 = vmatprep.mubr.f32.mxu1 %v1142_v31  ;;  %v1171_v22 = vpop.permute.xlu0 %1170 }
 0x335   : > { %1702 = vmatmul.mubr.f32.gmra.mrb[10].mxu0 %v1129_v13  ;;  %1947 = vmatmul.mubr.f32.gmra.mrb[30].mxu1 %v1141_v38 }
 0x336   : > { %1707 = vmatprep.mubr.f32.mxu0 %v1133_v43  ;;  %1951 = vmatprep.mubr.f32.mxu1 %v1145_v12 }
 0x339   : > { %1708 = vmatmul.mubr.f32.gmra.mrb[12].mxu0 %v1132_v35  ;;  %1952 = vmatmul.mubr.f32.gmra.mrb[32].mxu1 %v1144_v50  ;;  %v1166_v1 = vpop.permute.xlu1 %1165 }
 0x33a   : > { %1713 = vmatprep.mubr.f32.mxu0 %v1136_v53  ;;  %1956 = vmatprep.mubr.f32.mxu1 %v1148_v45 }
 0x33d   : > { %1714 = vmatmul.mubr.f32.gmra.mrb[14].mxu0 %v1135_v34  ;;  %1957 = vmatmul.mubr.f32.gmra.mrb[34].mxu1 %v1147_v44 }
 0x33e   : > { %1719 = vmatprep.mubr.f32.mxu0 %v1139_v27  ;;  %2325 = vmatprep.mubr.msk.f32.mxu1 %vm1606_vm3, %v4272_v55 }
 0x341   : > { %1720 = vmatmul.mubr.f32.gmra.mrb[16].mxu0 %v1138_v49  ;;  %2326 = vmatmul.mubr.msk.f32.vlgmr.msra.gmra.mrb[36].mxu1 %vm1606_vm3, %v4303_v60 }
 0x342   : > { %1725 = vmatprep.mubr.f32.mxu0 %v1142_v31  ;;  %2328 = vmatprep.mubr.msk.f32.mxu1 %vm1606_vm3, %v4329_v46 }
 0x345   : > { %1726 = vmatmul.mubr.f32.gmra.mrb[18].mxu0 %v1141_v38  ;;  %2329 = vmatmul.mubr.msk.f32.gmra.mrb[38].mxu1 %vm1606_vm3, %v4357_v11 }
 0x346   : > { %1731 = vmatprep.mubr.f32.mxu0 %v1145_v12  ;;  %2331 = vmatprep.mubr.msk.f32.mxu1 %vm1606_vm3, %v4380_v29  ;;  %v1176_v12 = vpop.permute.xlu1 %1175 }
 0x349   : > { %1732 = vmatmul.mubr.f32.gmra.mrb[20].mxu0 %v1144_v50  ;;  %2332 = vmatmul.mubr.msk.f32.gmra.mrb[40].mxu1 %vm1606_vm3, %v4410_v17 }
 0x34a   : > { %1737 = vmatprep.mubr.f32.mxu0 %v1148_v45  ;;  %2334 = vmatprep.mubr.msk.f32.mxu1 %vm1606_vm3, %v4435_v40 }
 0x34d   : > { %1738 = vmatmul.mubr.f32.gmra.mrb[22].mxu0 %v1147_v44  ;;  %2335 = vmatmul.mubr.msk.f32.gmra.mrb[42].mxu1 %vm1606_vm3, %v4456_v52 }
 0x3d0   : > { %v1810_v55 = vpop.f32.mrb[4].mxu1 }
 0x3d1   : > { %v1812_v60 = vpop.f32.mrb[5].mxu1 }
 0x3d4   : > { %v1816_v46 = vpop.f32.mrb[6].mxu1 }
 0x3d5   : > { %v1818_v11 = vpop.f32.mrb[7].mxu1 }
 0x3d8   : > { %v1822_v41 = vpop.f32.mrb[8].mxu1 }
 0x3d9   : > { %v4519_v16 = vpop.f32.mrb[9].mxu1 }
 0x3dc   : > { %v4521_v29 = vpop.f32.mrb[10].mxu1 }
 0x3dd   : > { %v4523_v9 = vpop.f32.mrb[11].mxu1 }
 0x3e0   : > { %v4525_v17 = vpop.f32.mrb[12].mxu1 }
 0x3e1   : > { %v4527_v30 = vpop.f32.mrb[13].mxu1 }
 0x3e4   : > { %v4529_v40 = vpop.f32.mrb[14].mxu1 }
 0x3e5   : > { %v4531_v51 = vpop.f32.mrb[15].mxu1 }
 0x3e8   : > { %v4533_v52 = vpop.f32.mrb[16].mxu1 }
 0x3e9   : > { %v4535_v56 = vpop.f32.mrb[17].mxu1 }
 0x3ec   : > { %v4537_v63 = vpop.f32.mrb[18].mxu1 }
 0x3ed   : > { %v4539_v18 = vpop.f32.mrb[19].mxu1 }
 0x3f4   : > { %v2271_v26 = vpop.f32.mrb[20].mxu1 }
 0x3f5   : > { %v2272_v15 = vpop.f32.mrb[21].mxu1 }
 0x3f6   : > { %v4541_v57 = vadd.f32 %v2272_v15, %v2271_v26 }
 0x3f8   : > { %v2274_v4 = vpop.f32.mrb[22].mxu1 }
 0x3f9   : > { %v2275_v19 = vpop.f32.mrb[23].mxu1 }
 0x3fa   : > { %v2276_v2 = vadd.f32 %v2275_v19, %v2274_v4 }
 0x3fc   : > { %v2277_v36 = vpop.f32.mrb[24].mxu1 }
 0x3fd   : > { %v2278_v62 = vpop.f32.mrb[25].mxu1 }
 0x3fe   : > { %v4543_v54 = vadd.f32 %v2278_v62, %v2277_v36  ;;  %v1181_v36 = vpop.permute.xlu0 %1180 }
 0x400   : > { %v2280_v28 = vpop.f32.mrb[26].mxu1 }
 0x401   : > { %v2281_v7 = vpop.f32.mrb[27].mxu1 }
 0x402   : > { %v4545_v10 = vadd.f32 %v2281_v7, %v2280_v28  ;;  %v1929_v28 = vadd.f32 %v2276_v2, %v1166_v1  ;;  %v1186_v2 = vpop.permute.xlu1 %1185 }
 0x404   : > { %v1697_v14 = vpop.f32.mrb[8].mxu0  ;;  %v2283_v13 = vpop.f32.mrb[28].mxu1 }
 0x405   : > { %v1698_v48 = vadd.f32 %v1697_v14, %v1161_v20  ;;  %v1699_v58 = vpop.f32.mrb[9].mxu0  ;;  %v2284_v24 = vpop.f32.mrb[29].mxu1  ;;  %v1924_v14 = vadd.f32 %v4541_v57, %v1161_v20 }
 0x406   : > { %v1700_v0 = vadd.f32 %v1699_v58, %v1161_v20  ;;  %v4548_v59 = vadd.f32 %v2284_v24, %v2283_v13 }
 0x407   : > { %v1811_v43 = vadd.f32 %v1810_v55, %v1698_v48 }
 0x408   : > { %v1813_v8 = vadd.f32 %v1812_v60, %v1700_v0  ;;  %v1703_v21 = vpop.f32.mrb[10].mxu0  ;;  %v2286_v5 = vpop.f32.mrb[30].mxu1 }
 0x409   : > { %v2067_v35 = vmax.f32 %v1811_v43, 0.0  ;;  %v1704_v32 = vadd.f32 %v1703_v21, %v1166_v1  ;;  %v1705_v23 = vpop.f32.mrb[11].mxu0  ;;  %v2287_v25 = vpop.f32.mrb[31].mxu1  ;;  %v1939_v21 = vadd.f32 %v4545_v10, %v1176_v12 }
 0x40a   : > { %v2068_v37 = vmax.f32 %v1813_v8, 0.0  ;;  %v1706_v53 = vadd.f32 %v1705_v23, %v1166_v1  ;;  %v4555_v42 = vadd.f32 %v2287_v25, %v2286_v5 }
 0x40b   : > { %2091 = vst [vmem:[%s4553_s15] sm:$0xff] %v2067_v35  ;;  %v1817_v39 = vadd.f32 %v1816_v46, %v1704_v32  ;;  %v1934_v32 = vadd.f32 %v4543_v54, %v1171_v22 }
 0x40c   : > { %2092 = vst [vmem:[%s4553_s15 + $0x8] sm:$0xff] %v2068_v37  ;;  %v1819_v6 = vadd.f32 %v1818_v11, %v1706_v53  ;;  %v1709_v3 = vpop.f32.mrb[12].mxu0  ;;  %v2289_v34 = vpop.f32.mrb[32].mxu1  ;;  %v1949_v54 = vadd.f32 %v4555_v42, %v1186_v2 }
 0x40d   : > { %v2070_v47 = vmax.f32 %v1817_v39, 0.0  ;;  %v1710_v61 = vadd.f32 %v1709_v3, %v1171_v22  ;;  %v1711_v27 = vpop.f32.mrb[13].mxu0  ;;  %v2290_v33 = vpop.f32.mrb[33].mxu1 }
 0x40e   : > { %v2071_v49 = vmax.f32 %v1819_v6, 0.0  ;;  %v1712_v31 = vadd.f32 %v1711_v27, %v1171_v22  ;;  %v4559_v38 = vadd.f32 %v2290_v33, %v2289_v34  ;;  %v1191_v6 = vpop.permute.xlu0 %1190  ;;  %v1944_v33 = vadd.f32 %v4548_v59, %v1181_v36 }
 0x40f   : > { %2095 = vst [vmem:[%s4553_s15 + $0x18] sm:$0xff] %v2070_v47  ;;  %v1823_v50 = vadd.f32 %v1822_v41, %v1710_v61 }
 0x410   : > { %2096 = vst [vmem:[%s4553_s15 + $0x20] sm:$0xff] %v2071_v49  ;;  %v1825_v45 = vadd.f32 %v4519_v16, %v1712_v31  ;;  %v1715_v44 = vpop.f32.mrb[14].mxu0  ;;  %v2292_v55 = vpop.f32.mrb[34].mxu1 }
 0x411   : > { %v2073_v60 = vmax.f32 %v1823_v50, 0.0  ;;  %v1716_v46 = vadd.f32 %v1715_v44, %v1176_v12  ;;  %v1717_v11 = vpop.f32.mrb[15].mxu0  ;;  %v2293_v26 = vpop.f32.mrb[35].mxu1 }
 0x412   : > { %v2074_v15 = vmax.f32 %v1825_v45, 0.0  ;;  %v1718_v4 = vadd.f32 %v1717_v11, %v1176_v12  ;;  %v4564_v19 = vadd.f32 %v2293_v26, %v2292_v55  ;;  %v1196_v45 = vpop.permute.xlu1 %1195 }
 0x413   : > { %2098 = vst [vmem:[%s4553_s15 + $0x30] sm:$0xff] %v2073_v60  ;;  %v1829_v62 = vadd.f32 %v4521_v29, %v1716_v46 }
 0x414   : > { %2099 = vst [vmem:[%s4553_s15 + $0x38] sm:$0xff] %v2074_v15  ;;  %v1831_v41 = vadd.f32 %v4523_v9, %v1718_v4  ;;  %v1721_v16 = vpop.f32.mrb[16].mxu0  ;;  %v2327_v7 = vpop.f32.mrb[36].mxu1  ;;  %v1959_v60 = vadd.f32 %v4564_v19, %v1196_v45  ;;  %v1954_v4 = vadd.f32 %v4559_v38, %v1191_v6 }
 0x415   : > { %v2076_v13 = vmax.f32 %v1829_v62, 0.0  ;;  %v1722_v48 = vadd.f32 %v1721_v16, %v1181_v36  ;;  %v2034_v58 = vadd.f32 %v2327_v7, %v1929_v28  ;;  %v1723_v24 = vpop.f32.mrb[17].mxu0  ;;  %v2028_v0 = vpop.f32.mrb[37].mxu1 }
 0x416   : > { %v2077_v43 = vmax.f32 %v1831_v41, 0.0  ;;  %v1724_v8 = vadd.f32 %v1723_v24, %v1181_v36  ;;  %v2029_v29 = vadd.f32 %v2028_v0, %v1924_v14 }
 0x417   : > { %2101 = vst [vmem:[%s4553_s15 + $0x48] sm:$0xff] %v2076_v13  ;;  %v1835_v1 = vadd.f32 %v4525_v17, %v1722_v48  ;;  %v2072_v9 = vmax.f32 %v2034_v58, 0.0 }
 0x418   : > { %2102 = vst [vmem:[%s4553_s15 + $0x50] sm:$0xff] %v2077_v43  ;;  %v1837_v57 = vadd.f32 %v4527_v30, %v1724_v8  ;;  %v2069_v20 = vmax.f32 %v2029_v29, 0.0  ;;  %v1727_v5 = vpop.f32.mrb[18].mxu0  ;;  %v2330_v35 = vpop.f32.mrb[38].mxu1 }
 0x419   : > { %v2079_v23 = vmax.f32 %v1835_v1, 0.0  ;;  %2097 = vst.msk [vmem:[%s4553_s15 + $0x28] sm:$0xff] %vm2093_vm4, %v2072_v9  ;;  %v1728_v25 = vadd.f32 %v1727_v5, %v1186_v2  ;;  %v2044_v37 = vadd.f32 %v2330_v35, %v1939_v21  ;;  %v1729_v17 = vpop.f32.mrb[19].mxu0  ;;  %v2038_v53 = vpop.f32.mrb[39].mxu1 }
 0x41a   : > { %v2080_v39 = vmax.f32 %v1837_v57, 0.0  ;;  %2094 = vst.msk [vmem:[%s4553_s15 + $0x10] sm:$0xff] %vm2093_vm4, %v2069_v20  ;;  %v1730_v10 = vadd.f32 %v1729_v17, %v1186_v2  ;;  %v2039_v30 = vadd.f32 %v2038_v53, %v1934_v32 }
 0x41b   : > { %2104 = vst [vmem:[%s4553_s15 + $0x60] sm:$0xff] %v2079_v23  ;;  %v1841_v3 = vadd.f32 %v4529_v40, %v1728_v25  ;;  %v2078_v34 = vmax.f32 %v2044_v37, 0.0 }
 0x41c   : > { %2105 = vst [vmem:[%s4553_s15 + $0x68] sm:$0xff] %v2080_v39  ;;  %v1843_v22 = vadd.f32 %v4531_v51, %v1730_v10  ;;  %v2075_v47 = vmax.f32 %v2039_v30, 0.0  ;;  %v1733_v61 = vpop.f32.mrb[20].mxu0  ;;  %v2333_v27 = vpop.f32.mrb[40].mxu1 }
 0x41d   : > { %v2082_v49 = vmax.f32 %v1841_v3, 0.0  ;;  %2103 = vst.msk [vmem:[%s4553_s15 + $0x58] sm:$0xff] %vm2093_vm4, %v2078_v34  ;;  %v1734_v31 = vadd.f32 %v1733_v61, %v1191_v6  ;;  %v2054_v12 = vadd.f32 %v2333_v27, %v1949_v54  ;;  %v1735_v40 = vpop.f32.mrb[21].mxu0  ;;  %v2048_v50 = vpop.f32.mrb[41].mxu1 }
 0x41e   : > { %v2083_v42 = vmax.f32 %v1843_v22, 0.0  ;;  %2100 = vst.msk [vmem:[%s4553_s15 + $0x40] sm:$0xff] %vm2093_vm4, %v2075_v47  ;;  %v1736_v51 = vadd.f32 %v1735_v40, %v1191_v6  ;;  %v2049_v44 = vadd.f32 %v2048_v50, %v1944_v33 }
 0x41f   : > { %2107 = vst [vmem:[%s4553_s15 + $0x78] sm:$0xff] %v2082_v49  ;;  %v1847_v55 = vadd.f32 %v4533_v52, %v1734_v31  ;;  %v2084_v59 = vmax.f32 %v2054_v12, 0.0 }
 0x420   : > { %2108 = vst [vmem:[%s4553_s15 + $0x80] sm:$0xff] %v2083_v42  ;;  %v1849_v46 = vadd.f32 %v4535_v56, %v1736_v51  ;;  %v2081_v11 = vmax.f32 %v2049_v44, 0.0  ;;  %v1739_v26 = vpop.f32.mrb[22].mxu0  ;;  %v2336_v15 = vpop.f32.mrb[42].mxu1 }
 0x421   : > { %v2085_v36 = vmax.f32 %v1847_v55, 0.0  ;;  %2109 = vst.msk [vmem:[%s4553_s15 + $0x88] sm:$0xff] %vm2093_vm4, %v2084_v59  ;;  %v1740_v62 = vadd.f32 %v1739_v26, %v1196_v45  ;;  %v2064_v52 = vadd.f32 %v2336_v15, %v1959_v60  ;;  %v1741_v28 = vpop.f32.mrb[23].mxu0  ;;  %v2058_v19 = vpop.f32.mrb[43].mxu1 }
 0x422   : > { %v2086_v41 = vmax.f32 %v1849_v46, 0.0  ;;  %2106 = vst.msk [vmem:[%s4553_s15 + $0x70] sm:$0xff] %vm2093_vm4, %v2081_v11  ;;  %v1742_v56 = vadd.f32 %v1741_v28, %v1196_v45  ;;  %v2059_v16 = vadd.f32 %v2058_v19, %v1954_v4 }
 0x423   : > { %2110 = vst [vmem:[%s4553_s15 + $0x90] sm:$0xff] %v2085_v36  ;;  %v1853_v7 = vadd.f32 %v4537_v63, %v1740_v62  ;;  %v2090_v38 = vmax.f32 %v2064_v52, 0.0 }
 0x424   : > { %2111 = vst [vmem:[%s4553_s15 + $0x98] sm:$0xff] %v2086_v41  ;;  %v1855_v14 = vadd.f32 %v4539_v18, %v1742_v56  ;;  %v2087_v13 = vmax.f32 %v2059_v16, 0.0 }
 0x425   : > { %v2088_v48 = vmax.f32 %v1853_v7, 0.0  ;;  %2115 = vst.msk [vmem:[%s4553_s15 + $0xb8] sm:$0xff] %vm2093_vm4, %v2090_v38 }
 0x426   : > { %v2089_v58 = vmax.f32 %v1855_v14, 0.0  ;;  %2112 = vst.msk [vmem:[%s4553_s15 + $0xa0] sm:$0xff] %vm2093_vm4, %v2087_v13 }
 0x427   : > { %2113 = vst [vmem:[%s4553_s15 + $0xa8] sm:$0xff] %v2088_v48 }
 0x428   : > { %2114 = vst [vmem:[%s4553_s15 + $0xb0] sm:$0xff] %v2089_v58 }
 0x429 PF: > { %s18_s21 = sadd.s32 1, %s3126_s21  }
 0x42a   : > { %p15_p5 = scmp.ge.s32.totalorder %s18_s21, 4  }
 0x42c   :  { %17 = sbr.rel (!%p15_p5) target bundleno = 2 (0x2), region = 83 }
 0x433   :  { %2137 = vsyncpa [#allocation3], 1 }
 0x434   :  { %2139 = vsyncpa [#allocation3 + $0x1], 1 }
 0x435   :  { %2140 = vsyncpa [#allocation5], 1 }

// kernel: behavioral_model_forward.3
= control target key start
LH: loop header
LB: loop body
LE: loop exit
PB: predicated region body
PF: predicated region fallthrough
CT: control target
= control target key end

     0   :  { %10 = vsyncpa [#allocation4], 0  ;;  %s4353_s0 = inlined_call_operand.vmem [shape: f32[2,19200], index: 0, kind: input, shape index: {}]   ;;  %s4354_s1 = inlined_call_operand.hbm [shape: bf16[19200,128], index: 1, kind: input, shape index: {}]   ;;  %s4355_s2 = inlined_call_operand.hbm [shape: f32[1,128], index: 2, kind: input, shape index: {}]   ;;  %s4356_s3 = inlined_call_operand.vmem [shape: f32[128,4], index: 3, kind: input, shape index: {}]   ;;  %s4357_s4 = inlined_call_operand.hbm [shape: f32[1,4], index: 4, kind: input, shape index: {}]   ;;  %s4358_s5 = inlined_call_operand.hbm [shape: f32[2,4], index: 5, kind: output, shape index: {}]  }
   0x1   :  { %12 = vsyncpa [#allocation4 + $0x1], 0 }
   0x2   :  { %13 = vsyncpa [#allocation7], 0 }
   0x3   :  { %14 = vsyncpa [#allocation5], 0  ;;  %s3865_s18 = smov 0   ;;  %s3867_s19 = smov 0  }
   0x4   :  { %s3869_s20 = smov 0   ;;  %s3871_s21 = smov 0  }
   0x5 LB: > { %s3884_s22 = sadd.s32 4294967295, %s3820_s21   ;;  %s3887_s23 = sadd.s32 1, %s3820_s21   ;;  %s3820_s21 = sphi %s3871_s21, %s4377_s21   ;;  %s3816_s20 = sphi %s3869_s20, %s4376_s20   ;;  %s3812_s19 = sphi %s3867_s19, %s4375_s19   ;;  %s3808_s18 = sphi %s3865_s18, %s4374_s18  }
   0x6   : > { %s50_s24 = ssub.s32 %s3820_s21, %s3887_s23  ;;  %s53_s25 = sadd.s32 1, %s3816_s20 }
   0x7   : > { %p51_p0 = scmp.eq.s32.totalorder %s50_s24, 0  ;;  %p60_p1 = scmp.ne.s32.totalorder %s3816_s20, %s3812_s19 }
   0x8   : > { %p61_p2 = scmp.eq.s32.totalorder %s3820_s21, 0  ;;  %p66_p3 = scmp.ne.s32.totalorder %s3812_s19, %s3808_s18 }
   0x9   : > { %s3897_s26 = scalar_select %p51_p0, %s3816_s20, %s53_s25  }
   0xa   : > { %p3899_p4 = por %p61_p2, %p60_p1  ;;  %p4359_p5 = scmp.eq.s32.totalorder %s3884_s22, 0 }
   0xb   : > { %p2790_p6 = scmp.ge.s32.totalorder %s3820_s21, 1  ;;  %p161_p7 = scmp.lt.s32.totalorder %s3820_s21, 7 }
   0xc   : > { %p3908_p8 = por %p4359_p5, %p66_p3  ;;  %s3822_s30 = smov [#allocation6]  }
   0xd   : > { %p3913_p10 = pnand %p2790_p6, %p161_p7  ;;  %s174_s6 = sshll.u32 %s3822_s30, 4  ;;  %s175_s6 = int_to_ptr.vmem [resolvable:$true] %s174_s6 }
   0xe   : > { %s4364_s28 = scalar_select %p3908_p8, 1, 0 }
   0xf   : > { %s4365_s29 = scalar_select %p3913_p10, 1, 0 }
  0x10   : > { %p3394_p11 = pneg %p3913_p10  ;;  %p3407_p12 = scmp.lt.s32.totalorder %s3820_s21, 6 }
  0x11   : > { %s3823_s8 = smov [#allocation8]   ;;  %s208_s11 = sand.u32 1, %s3816_s20  }
  0x12   : > { %p3922_p13 = pnand %p3394_p11, %p4359_p5  ;;  %s188_s9 = sshll.u32 %s3823_s8, 4  ;;  %s3932_s9 = int_to_ptr.vmem [resolvable:$true] %s188_s9 }
  0x13   : > { %p3928_p0 = pnand %p3407_p12, %p3899_p4  ;;  %s3666_s14 = scalar_lea.hbm %s4355_s2, 16 }
  0x14   : > { %p3667_p1 = scmp.ne.s32.totalorder %s4355_s2, %s3666_s14  ;;  %p3668_p2 = pneg %p3922_p13 }
  0x15   : > { %s4367_s10 = scalar_select %p3928_p0, 1, 0 }
  0x16   : > { %p3669_p3 = pnand %p3668_p2, %p3667_p1  ;;  %p3673_p6 = scmp.lt.u32.totalorder %s3666_s14, %s4355_s2 }
  0x18   : > { %p3670_p4 = pneg %p3669_p3 }
  0x1a   : > { %p3675_p7 = pnand %p3673_p6, %p3670_p4 }
  0x1c   : > { %3678 = shalt.err (!%p3675_p7)
}
  0x1d   : > { %s3679_s24 = scalar_lea.vmem %s175_s6, 16  ;;  %s3686_s25 = scalar_lea.vmem %s175_s6, 32 }
  0x1e   : > { %p3680_p11 = scmp.ne.s32.totalorder %s175_s6, %s3679_s24  ;;  %p3687_p5 = scmp.lt.s32.totalorder %s175_s6, %s175_s6 }
  0x1f   : > { %p3688_p8 = scmp.lt.s32.totalorder %s3686_s25, %s3679_s24 }
  0x20   : > { %p3682_p12 = pnand %p3680_p11, %p3668_p2 }
  0x21   : > { %p3689_p10 = por %p3688_p8, %p3687_p5 }
  0x22   : > { %p3683_p9 = pneg %p3682_p12 }
  0x24   : > { %p3690_p0 = pnand %p3689_p10, %p3683_p9 }
  0x26   : > { %3693 = shalt.err (!%p3690_p0)
}
  0x27   : > { %3397 = dma.hbm_to_vmem [thread:$0]  (!%p3922_p13), %s4355_s2, 16, %s175_s6, [#allocation7]  }
  0x28   : > { %s3694_s13 = scalar_lea.hbm %s4357_s4, 16 }
  0x29   : > { %p3695_p1 = scmp.ne.s32.totalorder %s4357_s4, %s3694_s13  ;;  %p3701_p9 = scmp.lt.u32.totalorder %s3694_s13, %s4357_s4 }
  0x2b   : > { %p3697_p5 = pnand %p3695_p1, %p3668_p2 }
  0x2d   : > { %p3698_p8 = pneg %p3697_p5 }
  0x2f   : > { %p3703_p10 = pnand %p3701_p9, %p3698_p8 }
  0x31   : > { %3706 = shalt.err (!%p3703_p10)
}
  0x32   : > { %s3707_s6 = scalar_lea.vmem %s3932_s9, 16  ;;  %s3714_s18 = scalar_lea.vmem %s3932_s9, 32 }
  0x33   : > { %p3708_p0 = scmp.ne.s32.totalorder %s3932_s9, %s3707_s6  ;;  %p3715_p6 = scmp.lt.s32.totalorder %s3932_s9, %s3932_s9 }
  0x34   : > { %p3716_p7 = scmp.lt.s32.totalorder %s3714_s18, %s3707_s6 }
  0x35   : > { %p3710_p3 = pnand %p3708_p0, %p3668_p2 }
  0x36   : > { %p3717_p11 = por %p3716_p7, %p3715_p6 }
  0x37   : > { %p3711_p4 = pneg %p3710_p3 }
  0x39   : > { %p3718_p12 = pnand %p3717_p11, %p3711_p4 }
  0x3b   : > { %3721 = shalt.err (!%p3718_p12)
}
  0x3c   : > { %3400 = dma.hbm_to_vmem [thread:$0]  (!%p3922_p13), %s4357_s4, 16, %s3932_s9, [#allocation7]  }
  0x3d   : > { %s3378_s27 = smul.u32 1600, %s208_s11  ;;  %s3995_s15 = scalar_lea.sflag [#allocation4], %s208_s11 }
  0x3e   : > { %s3008_s30 = smul.u32 25600, %s3820_s21  ;;  %p4368_p2 = scmp.ne.s32.totalorder %s4367_s10, 0 }
  0x3f   : > { %s212_s7 = scalar_lea.vmem [#allocation3], %s3378_s27  ;;  %s3727_s17 = scalar_lea.hbm %s4354_s1, 153600 }
  0x40   : > { %s3989_s13 = scalar_lea.hbm %s4354_s1, %s3008_s30  ;;  %s219_s14 = sshll.u32 %s212_s7, 4  ;;  %s3991_s14 = int_to_ptr.vmem [resolvable:$true] %s219_s14 }
  0x41   : > { %s3722_s9 = scalar_lea.hbm %s3989_s13, 25600  ;;  %p3724_p1 = pneg %p4368_p2 }
  0x42   : > { %p3723_p13 = scmp.ne.s32.totalorder %s3989_s13, %s3722_s9  ;;  %p3728_p9 = scmp.lt.u32.totalorder %s3989_s13, %s4354_s1 }
  0x43   : > { %p3729_p10 = scmp.lt.u32.totalorder %s3727_s17, %s3722_s9  ;;  %p3731_p3 = scmp.lt.u32.totalorder %s3722_s9, %s3989_s13 }
  0x44   : > { %p3725_p5 = pnand %p3724_p1, %p3723_p13 }
  0x45   : > { %p3730_p0 = por %p3729_p10, %p3728_p9 }
  0x46   : > { %p3726_p8 = pneg %p3725_p5 }
  0x47   : > { %p3732_p4 = por %p3731_p3, %p3730_p0 }
  0x49   : > { %p3733_p6 = pnand %p3732_p4, %p3726_p8 }
  0x4b   : > { %3736 = shalt.err (!%p3733_p6)
}
  0x4c   : > { %s3737_s11 = scalar_lea.vmem %s3991_s14, 25600  ;;  %s3824_s24 = smov [#allocation3]  }
  0x4d   : > { %p3738_p7 = scmp.ne.s32.totalorder %s3991_s14, %s3737_s11  ;;  %s3742_s25 = sshll.u32 %s3824_s24, 4  ;;  %s3743_s25 = int_to_ptr.vmem [resolvable:$false] %s3742_s25 }
  0x4e   : > { %s3744_s27 = scalar_lea.vmem %s3743_s25, 51200  ;;  %p3745_p13 = scmp.lt.s32.totalorder %s3991_s14, %s3743_s25 }
  0x4f   : > { %p3740_p11 = pnand %p3738_p7, %p3724_p1  ;;  %p3746_p5 = scmp.lt.s32.totalorder %s3744_s27, %s3737_s11 }
  0x51   : > { %p3741_p12 = pneg %p3740_p11  ;;  %p3747_p9 = por %p3746_p5, %p3745_p13 }
  0x53   : > { %p3748_p10 = pnand %p3747_p9, %p3741_p12 }
  0x55   : > { %3751 = shalt.err (!%p3748_p10)
}
  0x56   : > { %s3825_s30 = smov 64   ;;  %s3826_s8 = smov 4  }
  0x57   : > { %3404 = dma.hbm_to_vmem [thread:$0]  (!%p4368_p2), %s3989_s13, 25600, %s3991_s14, %s3995_s15, %s3825_s30, %s3825_s30, %s3826_s8  }
  0x58   : > { %p4369_p1 = scmp.ne.s32.totalorder %s4365_s29, 0 }
  0x59   : > { %s233_s12 = sand.u32 (!%p4369_p1), 1, %s3812_s19   ;;  %p4370_p8 = scmp.ne.s32.totalorder (!%p4369_p1), %s4364_s28, 0 }
  0x5a   : > { %231 = sbr.rel (%p4369_p1) target bundleno = 1118 (0x45e), region = 40  ;;  %s234_s9 = scalar_lea.sflag (!%p4369_p1), [#allocation4], %s233_s12 }
  0x5b   : > { %s3379_s7 = smul.u32 (!%p4369_p1), 1600, %s233_s12 }
  0x5d   : > { %s4026_s21 = scalar_lea.vmem (!%p4369_p1), [#allocation3], %s3379_s7 }
  0x61   : > { %3795 = dma.done.wait (%p4370_p8), %s234_s9, 25600  }
  0x62   : > { %3797 = vsyncadd (%p4370_p8), %s234_s9, 4294941696  ;;  %p4371_p0 = scmp.eq.s32.totalorder %s3884_s22, 0 }
  0x64   : > { %3799 = dma.done.wait (%p4371_p0), [#allocation7], 32   ;;  %p4372_p2 = pmov %p4371_p0 }
  0x65   : > { %s272_s29 = smul.u32 25, %s3884_s22  ;;  %p4373_p4 = scmp.ne.s32.totalorder %s3884_s22, 0 }
  0x66   : > { %3801 = vsyncadd (%p4372_p2), [#allocation7], 4294967264  ;;  %v3827_v0 = vmov (!%p4373_p4), 0.0  }
  0x67   : > { %p273_p3 = scmp.lt.s32.totalorder %s272_s29, 149  ;;  %283 = sbr.rel (%p4373_p4) target bundleno = 110 (0x6e), region = 56  ;;  %284 = vst [vmem:[#allocation2] sm:$0x3] (!%p4373_p4), %v3827_v0 }
  0x69   : > { %s4379_s29 = smov (!%p273_p3, %s272_s29), 149 }
  0x6a   : > { %s2798_s10 = sshll.u32 %s4379_s29, 1 }
  0x6b   : > { %s4040_s15 = scalar_lea.vmem %s4353_s0, %s2798_s10 }
  0x6e PF: > { %v3456_v1 = vld [vmem:[%s4026_s21 + $0x40] sm:$0xff]   ;;  %v3460_v5 = vld [vmem:[%s4026_s21 + $0x48] sm:$0xff]   ;;  %v3464_v9 = vld [vmem:[%s4026_s21 + $0x50] sm:$0xff]   ;;  %v304_v29 = vlaneseq  ;;  %v3828_v37 = vmov 1983009808   ;;  %vm3830_vm0 = vmmov 0  }
  0x6f   : > { %v3457_v2 = vld [vmem:[%s4026_s21 + $0xc0] sm:$0xff]   ;;  %3009 = vmatprep.subr.bf16.mxu0 %v3456_v1  ;;  %v3461_v6 = vld [vmem:[%s4026_s21 + $0xc8] sm:$0xff]   ;;  %v3465_v10 = vld [vmem:[%s4026_s21 + $0xd0] sm:$0xff]   ;;  %v302_v38 = vunpack.c.l.s4 %v3828_v37  ;;  %p3001_p6 = scmp.ne.s32.totalorder %s3884_s22, 5 }
  0x70   : > { %v3458_v3 = vld [vmem:[%s4026_s21] sm:$0xff]   ;;  %3031 = vmatprep.subr.bf16.mxu1 %v3457_v2  ;;  %v3462_v7 = vld [vmem:[%s4026_s21 + $0x8] sm:$0xff]   ;;  %v3466_v11 = vld [vmem:[%s4026_s21 + $0x10] sm:$0xff]   ;;  %v305_v34 = vshrl.u32 %v304_v29, 7  ;;  %vm3832_vm1 = vmmov (!%p3001_p6), 0   ;;  %vm2688_vm2 = vcmask (!%p3001_p6), 25600  }
  0x71   : > { %v3459_v4 = vld [vmem:[%s4026_s21 + $0x80] sm:$0xff]   ;;  %3010 = vmatpush3.bf16.msra.mxu0 %v3458_v3  ;;  %v3463_v8 = vld [vmem:[%s4026_s21 + $0x88] sm:$0xff]   ;;  %v3467_v12 = vld [vmem:[%s4026_s21 + $0x90] sm:$0xff]   ;;  %v303_v39 = vunpack.c.0.s8 %v302_v38 }
  0x72   : > { %3032 = vmatpush3.bf16.msra.mxu1 %v3459_v4  ;;  %3011 = vmatprep.subr.bf16.mxu0 %v3460_v5  ;;  %v3468_v13 = vld [vmem:[%s4026_s21 + $0x58] sm:$0xff]   ;;  %v3472_v17 = vld [vmem:[%s4026_s21 + $0x60] sm:$0xff]   ;;  %v3476_v21 = vld [vmem:[%s4026_s21 + $0x68] sm:$0xff]  }
  0x73   : > { %3033 = vmatprep.subr.bf16.mxu1 %v3461_v6  ;;  %v3469_v14 = vld [vmem:[%s4026_s21 + $0xd8] sm:$0xff]   ;;  %v3473_v18 = vld [vmem:[%s4026_s21 + $0xe0] sm:$0xff]   ;;  %v3477_v22 = vld [vmem:[%s4026_s21 + $0xe8] sm:$0xff]   ;;  %v4079_v42 = vsub.s32 %v303_v39, %v305_v34 }
  0x74   : > { %v3470_v15 = vld [vmem:[%s4026_s21 + $0x18] sm:$0xff]   ;;  %v3474_v19 = vld [vmem:[%s4026_s21 + $0x20] sm:$0xff]   ;;  %v3478_v23 = vld [vmem:[%s4026_s21 + $0x28] sm:$0xff]  }
  0x75   : > { %3012 = vmatpush3.bf16.msra.mxu0 %v3462_v7  ;;  %v3471_v16 = vld [vmem:[%s4026_s21 + $0x98] sm:$0xff]   ;;  %v3475_v20 = vld [vmem:[%s4026_s21 + $0xa0] sm:$0xff]   ;;  %v3479_v24 = vld [vmem:[%s4026_s21 + $0xa8] sm:$0xff]  }
  0x76   : > { %3034 = vmatpush3.bf16.msra.mxu1 %v3463_v8  ;;  %3013 = vmatprep.subr.bf16.mxu0 %v3464_v9  ;;  %v3480_v25 = vld [vmem:[%s4026_s21 + $0x70] sm:$0xff]   ;;  %v3484_v30 = vld [vmem:[%s4026_s21 + $0x78] sm:$0xff]   ;;  %v3489_v36 = vld [vmem:[%s4026_s21 + $0x140] sm:$0xff]  }
  0x77   : > { %3035 = vmatprep.subr.bf16.mxu1 %v3465_v10  ;;  %v3481_v26 = vld [vmem:[%s4026_s21 + $0xf0] sm:$0xff]   ;;  %v3485_v31 = vld [vmem:[%s4026_s21 + $0xf8] sm:$0xff]   ;;  %v3491_v41 = vld [vmem:[%s4026_s21 + $0x1c0] sm:$0xff]  }
  0x78   : > { %v3482_v27 = vld [vmem:[%s4026_s21 + $0x30] sm:$0xff]   ;;  %v3486_v32 = vld [vmem:[%s4026_s21 + $0x38] sm:$0xff]   ;;  %v3490_v47 = vld [vmem:[%s4026_s21 + $0x100] sm:$0xff]  }
  0x79   : > { %3014 = vmatpush3.bf16.msra.mxu0 %v3466_v11  ;;  %v3483_v28 = vld [vmem:[%s4026_s21 + $0xb0] sm:$0xff]   ;;  %v3487_v33 = vld [vmem:[%s4026_s21 + $0xb8] sm:$0xff]   ;;  %v3492_v50 = vld [vmem:[%s4026_s21 + $0x180] sm:$0xff]  }
  0x7a   : > { %3036 = vmatpush3.bf16.msra.mxu1 %v3467_v12  ;;  %3015 = vmatprep.subr.bf16.mxu0 %v3468_v13  ;;  %v286_v35 = vld [vmem:[%s4040_s15] sm:$0xff]  ;;  %v3493_v53 = vld [vmem:[%s4026_s21 + $0x148] sm:$0xff]   ;;  %v3497_v57 = vld [vmem:[%s4026_s21 + $0x150] sm:$0xff]  }
  0x7b   : > { %3037 = vmatprep.subr.bf16.mxu1 %v3469_v14  ;;  %v300_v40 = vcombine.high %v286_v35, %v286_v35  ;;  %v307_v43 = vrot.slane %v286_v35, %v4079_v42  ;;  %v3495_v54 = vld [vmem:[%s4026_s21 + $0x1c8] sm:$0xff]   ;;  %v3499_v58 = vld [vmem:[%s4026_s21 + $0x1d0] sm:$0xff]   ;;  %v3501_v61 = vld [vmem:[%s4026_s21 + $0x158] sm:$0xff]  }
  0x7c   : > { %v3494_v55 = vld [vmem:[%s4026_s21 + $0x108] sm:$0xff]   ;;  %v3498_v59 = vld [vmem:[%s4026_s21 + $0x110] sm:$0xff]   ;;  %v3503_v62 = vld [vmem:[%s4026_s21 + $0x1d8] sm:$0xff]  }
  0x7d   : > { %3016 = vmatpush3.bf16.msra.mxu0 %v3470_v15  ;;  %v314_v44 = vrot.slane %v300_v40, %v4079_v42  ;;  %v315_v45 = vcombine.high %v307_v43, %v307_v43  ;;  %v434_v48 = vpack.c.bf16 %v307_v43, %v307_v43  ;;  %v3496_v56 = vld [vmem:[%s4026_s21 + $0x188] sm:$0xff]   ;;  %v3500_v60 = vld [vmem:[%s4026_s21 + $0x190] sm:$0xff]   ;;  %v3502_v63 = vld [vmem:[%s4026_s21 + $0x118] sm:$0xff]  }
  0x7e   : > { %3038 = vmatpush3.bf16.msra.mxu1 %v3471_v16  ;;  %3017 = vmatprep.subr.bf16.mxu0 %v3472_v17  ;;  %v3504_v0 = vld [vmem:[%s4026_s21 + $0x198] sm:$0xff]   ;;  %v3505_v1 = vld [vmem:[%s4026_s21 + $0x160] sm:$0xff]   ;;  %v3509_v5 = vld [vmem:[%s4026_s21 + $0x168] sm:$0xff]  }
  0x7f   : > { %3039 = vmatprep.subr.bf16.mxu1 %v3473_v18  ;;  %v316_v46 = vcombine.high %v314_v44, %v314_v44  ;;  %v436_v49 = vpack.c.bf16 %v314_v44, %v314_v44  ;;  %v435_v51 = vpack.c.bf16 %v315_v45, %v315_v45  ;;  %v3507_v2 = vld [vmem:[%s4026_s21 + $0x1e0] sm:$0xff]   ;;  %v3511_v6 = vld [vmem:[%s4026_s21 + $0x1e8] sm:$0xff]   ;;  %v3513_v9 = vld [vmem:[%s4026_s21 + $0x170] sm:$0xff]  }
  0x80   : > { %v3506_v3 = vld [vmem:[%s4026_s21 + $0x120] sm:$0xff]   ;;  %v3510_v7 = vld [vmem:[%s4026_s21 + $0x128] sm:$0xff]   ;;  %v3515_v11 = vld [vmem:[%s4026_s21 + $0x1f0] sm:$0xff]  }
  0x81   : > { %3018 = vmatpush3.bf16.msra.mxu0 %v3474_v19  ;;  %v437_v52 = vpack.c.bf16 %v316_v46, %v316_v46  ;;  %2091 = vmatprep.mubr.bf16.mxu0 %v435_v51  ;;  %v3508_v4 = vld [vmem:[%s4026_s21 + $0x1a0] sm:$0xff]   ;;  %v3512_v8 = vld [vmem:[%s4026_s21 + $0x1a8] sm:$0xff]   ;;  %v3514_v14 = vld [vmem:[%s4026_s21 + $0x130] sm:$0xff]  }
  0x82   : > { %3040 = vmatpush3.bf16.msra.mxu1 %v3475_v20  ;;  %3019 = vmatprep.subr.bf16.mxu0 %v3476_v21  ;;  %v287_v10 = vld [vmem:[%s4040_s15 + $0x8] sm:$0xff]  ;;  %v3516_v15 = vld [vmem:[%s4026_s21 + $0x1b0] sm:$0xff]   ;;  %v3517_v18 = vld [vmem:[%s4026_s21 + $0x178] sm:$0xff]  }
  0x83   : > { %3041 = vmatprep.subr.bf16.mxu1 %v3477_v22  ;;  %2131 = vmatprep.mubr.bf16.mxu1 %v437_v52  ;;  %v324_v12 = vrot.slane %v287_v10, %v4079_v42  ;;  %v317_v13 = vcombine.high %v287_v10, %v287_v10  ;;  %v3519_v19 = vld [vmem:[%s4026_s21 + $0x1f8] sm:$0xff]   ;;  %v3529_v34 = vld [vmem:[%s4026_s21 + $0x288] sm:$0xff]   ;;  %v3530_v35 = vld [vmem:[%s4026_s21 + $0x250] sm:$0xff]  }
  0x84   : > { %v3518_v22 = vld [vmem:[%s4026_s21 + $0x138] sm:$0xff]   ;;  %v3531_v37 = vld [vmem:[%s4026_s21 + $0x210] sm:$0xff]   ;;  %v3538_v44 = vld [vmem:[%s4026_s21 + $0x260] sm:$0xff]  }
  0x85   : > { %3020 = vmatpush3.bf16.msra.mxu0 %v3478_v23  ;;  %v332_v16 = vcombine.high %v324_v12, %v324_v12  ;;  %v331_v17 = vrot.slane %v317_v13, %v4079_v42  ;;  %v3520_v23 = vld [vmem:[%s4026_s21 + $0x1b8] sm:$0xff]   ;;  %v3533_v38 = vld [vmem:[%s4026_s21 + $0x290] sm:$0xff]   ;;  %v3540_v45 = vld [vmem:[%s4026_s21 + $0x2e0] sm:$0xff]  }
  0x86   : > { %3042 = vmatpush3.bf16.msra.mxu1 %v3479_v24  ;;  %3021 = vmatprep.subr.bf16.mxu0 %v3480_v25  ;;  %v3521_v25 = vld [vmem:[%s4026_s21 + $0x240] sm:$0xff]   ;;  %v3534_v39 = vld [vmem:[%s4026_s21 + $0x258] sm:$0xff]   ;;  %v3545_v51 = vld [vmem:[%s4026_s21 + $0x2a8] sm:$0xff]  }
  0x87   : > { %3043 = vmatprep.subr.bf16.mxu1 %v3481_v26  ;;  %v439_v20 = vpack.c.bf16 %v332_v16, %v332_v16  ;;  %v333_v21 = vcombine.high %v331_v17, %v331_v17  ;;  %v3524_v26 = vld [vmem:[%s4026_s21 + $0x2c0] sm:$0xff]   ;;  %v440_v29 = vpack.c.bf16 %v331_v17, %v331_v17  ;;  %v3536_v40 = vld [vmem:[%s4026_s21 + $0x2d8] sm:$0xff]   ;;  %v3546_v52 = vld [vmem:[%s4026_s21 + $0x270] sm:$0xff]  }
  0x88   : > { %v3537_v43 = vld [vmem:[%s4026_s21 + $0x298] sm:$0xff]   ;;  %v3539_v46 = vld [vmem:[%s4026_s21 + $0x220] sm:$0xff]   ;;  %v3559_v10 = vld [vmem:[%s4026_s21 + $0x348] sm:$0xff]  }
  0x89   : > { %3022 = vmatpush3.bf16.msra.mxu0 %v3482_v27  ;;  %v441_v24 = vpack.c.bf16 %v333_v21, %v333_v21  ;;  %v3523_v27 = vld [vmem:[%s4026_s21 + $0x200] sm:$0xff]   ;;  %v3562_v13 = vld [vmem:[%s4026_s21 + $0x388] sm:$0xff]   ;;  %v3564_v16 = vld [vmem:[%s4026_s21 + $0x310] sm:$0xff]  }
  0x8a   : > { %3044 = vmatpush3.bf16.msra.mxu1 %v3483_v28  ;;  %3023 = vmatprep.subr.bf16.mxu0 %v3484_v30  ;;  %v438_v28 = vpack.c.bf16 %v324_v12, %v324_v12  ;;  %v3525_v30 = vld [vmem:[%s4026_s21 + $0x280] sm:$0xff]   ;;  %v3560_v12 = vld [vmem:[%s4026_s21 + $0x308] sm:$0xff]   ;;  %v3566_v17 = vld [vmem:[%s4026_s21 + $0x390] sm:$0xff]  }
  0x8b   : > { %3045 = vmatprep.subr.bf16.mxu1 %v3485_v31  ;;  %v3526_v31 = vld [vmem:[%s4026_s21 + $0x248] sm:$0xff]   ;;  %v3570_v21 = vld [vmem:[%s4026_s21 + $0x398] sm:$0xff]  }
  0x8d   : > { %3024 = vmatpush3.bf16.msra.mxu0 %v3486_v32  ;;  %v3528_v32 = vld [vmem:[%s4026_s21 + $0x2c8] sm:$0xff]  }
  0x8e   : > { %3046 = vmatpush3.bf16.msra.mxu1 %v3487_v33  ;;  %3053 = vmatprep.subr.bf16.mxu0 %v3489_v36  ;;  %v3527_v33 = vld [vmem:[%s4026_s21 + $0x208] sm:$0xff]   ;;  %v3532_v36 = vld [vmem:[%s4026_s21 + $0x2d0] sm:$0xff]  }
  0x8f   : > { %3075 = vmatprep.subr.bf16.mxu1 %v3491_v41  ;;  %v3535_v41 = vld [vmem:[%s4026_s21 + $0x218] sm:$0xff]  }
  0x90   : > { %2092 = vmatmul.mubr.bf16.vlgmr.msra.gmra.mrb[0].mxu0 %v434_v48  ;;  %v3542_v48 = vld [vmem:[%s4026_s21 + $0x268] sm:$0xff]  }
  0x91   : > { %2132 = vmatmul.mubr.bf16.vlgmr.msra.gmra.mrb[0].mxu1 %v436_v49  ;;  %3054 = vmatpush3.bf16.msra.mxu0 %v3490_v47  ;;  %v3541_v47 = vld [vmem:[%s4026_s21 + $0x2a0] sm:$0xff]   ;;  %v3544_v49 = vld [vmem:[%s4026_s21 + $0x2e8] sm:$0xff]  }
  0x92   : > { %3076 = vmatpush3.bf16.msra.mxu1 %v3492_v50  ;;  %3055 = vmatprep.subr.bf16.mxu0 %v3493_v53  ;;  %v3543_v50 = vld [vmem:[%s4026_s21 + $0x228] sm:$0xff]  }
  0x93   : > { %3077 = vmatprep.subr.bf16.mxu1 %v3495_v54  ;;  %2171 = vmatprep.mubr.bf16.mxu0 %v439_v20  ;;  %v288_v53 = vld [vmem:[%s4040_s15 + $0x10] sm:$0xff]  ;;  %v3568_v20 = vld [vmem:[%s4026_s21 + $0x318] sm:$0xff]  }
  0x94   : > { %2211 = vmatprep.mubr.bf16.mxu1 %v441_v24  ;;  %v3548_v54 = vld [vmem:[%s4026_s21 + $0x2f0] sm:$0xff]   ;;  %v3572_v24 = vld [vmem:[%s4026_s21 + $0x320] sm:$0xff]  }
  0x95   : > { %3056 = vmatpush3.bf16.msra.mxu0 %v3494_v55  ;;  %v341_v55 = vrot.slane %v288_v53, %v4079_v42 }
  0x96   : > { %3078 = vmatpush3.bf16.msra.mxu1 %v3496_v56  ;;  %3057 = vmatprep.subr.bf16.mxu0 %v3497_v57  ;;  %v334_v56 = vcombine.high %v288_v53, %v288_v53  ;;  %v3547_v57 = vld [vmem:[%s4026_s21 + $0x230] sm:$0xff]   ;;  %v3592_v53 = vld [vmem:[%s4026_s21 + $0x448] sm:$0xff]  }
  0x97   : > { %3079 = vmatprep.subr.bf16.mxu1 %v3499_v58  ;;  %v3549_v58 = vld [vmem:[%s4026_s21 + $0x2b0] sm:$0xff]  }
  0x99   : > { %3058 = vmatpush3.bf16.msra.mxu0 %v3498_v59  ;;  %v349_v59 = vcombine.high %v341_v55, %v341_v55 }
  0x9a   : > { %3080 = vmatpush3.bf16.msra.mxu1 %v3500_v60  ;;  %3059 = vmatprep.subr.bf16.mxu0 %v3501_v61  ;;  %v348_v60 = vrot.slane %v334_v56, %v4079_v42  ;;  %v3550_v61 = vld [vmem:[%s4026_s21 + $0x278] sm:$0xff]   ;;  %v3595_v56 = vld [vmem:[%s4026_s21 + $0x488] sm:$0xff]  }
  0x9b   : > { %3081 = vmatprep.subr.bf16.mxu1 %v3503_v62  ;;  %v3552_v62 = vld [vmem:[%s4026_s21 + $0x2f8] sm:$0xff]  }
  0x9d   : > { %3060 = vmatpush3.bf16.msra.mxu0 %v3502_v63  ;;  %v443_v63 = vpack.c.bf16 %v349_v59, %v349_v59  ;;  %v3597_v59 = vld [vmem:[%s4026_s21 + $0x410] sm:$0xff]  }
  0x9e   : > { %3082 = vmatpush3.bf16.msra.mxu1 %v3504_v0  ;;  %3061 = vmatprep.subr.bf16.mxu0 %v3505_v1  ;;  %v350_v0 = vcombine.high %v348_v60, %v348_v60  ;;  %v3551_v1 = vld [vmem:[%s4026_s21 + $0x238] sm:$0xff]  }
  0x9f   : > { %3083 = vmatprep.subr.bf16.mxu1 %v3507_v2  ;;  %v3553_v2 = vld [vmem:[%s4026_s21 + $0x2b8] sm:$0xff]  }
  0xa1   : > { %3062 = vmatpush3.bf16.msra.mxu0 %v3506_v3  ;;  %v445_v3 = vpack.c.bf16 %v350_v0, %v350_v0  ;;  %v3603_v0 = vld [vmem:[%s4026_s21 + $0x498] sm:$0xff]  }
  0xa2   : > { %3084 = vmatpush3.bf16.msra.mxu1 %v3508_v4  ;;  %3063 = vmatprep.subr.bf16.mxu0 %v3509_v5  ;;  %v3554_v4 = vld [vmem:[%s4026_s21 + $0x340] sm:$0xff]  }
  0xa3   : > { %3085 = vmatprep.subr.bf16.mxu1 %v3511_v6  ;;  %v3557_v5 = vld [vmem:[%s4026_s21 + $0x3c0] sm:$0xff]  }
  0xa4   : > { %v3556_v6 = vld [vmem:[%s4026_s21 + $0x300] sm:$0xff]  }
  0xa5   : > { %3064 = vmatpush3.bf16.msra.mxu0 %v3510_v7  ;;  %v442_v7 = vpack.c.bf16 %v341_v55, %v341_v55  ;;  %v3593_v55 = vld [vmem:[%s4026_s21 + $0x408] sm:$0xff]  }
  0xa6   : > { %3086 = vmatpush3.bf16.msra.mxu1 %v3512_v8  ;;  %3065 = vmatprep.subr.bf16.mxu0 %v3513_v9  ;;  %v444_v8 = vpack.c.bf16 %v348_v60, %v348_v60  ;;  %v3558_v9 = vld [vmem:[%s4026_s21 + $0x380] sm:$0xff]   ;;  %v3599_v60 = vld [vmem:[%s4026_s21 + $0x490] sm:$0xff]  }
  0xa7   : > { %3087 = vmatprep.subr.bf16.mxu1 %v3515_v11  ;;  %v3561_v11 = vld [vmem:[%s4026_s21 + $0x3c8] sm:$0xff]  }
  0xa9   : > { %3066 = vmatpush3.bf16.msra.mxu0 %v3514_v14  ;;  %v3563_v14 = vld [vmem:[%s4026_s21 + $0x350] sm:$0xff]  }
  0xaa   : > { %3088 = vmatpush3.bf16.msra.mxu1 %v3516_v15  ;;  %3067 = vmatprep.subr.bf16.mxu0 %v3517_v18  ;;  %v3565_v15 = vld [vmem:[%s4026_s21 + $0x3d0] sm:$0xff]   ;;  %v3567_v18 = vld [vmem:[%s4026_s21 + $0x358] sm:$0xff]  }
  0xab   : > { %3089 = vmatprep.subr.bf16.mxu1 %v3519_v19  ;;  %v3569_v19 = vld [vmem:[%s4026_s21 + $0x3d8] sm:$0xff]  }
  0xad   : > { %3068 = vmatpush3.bf16.msra.mxu0 %v3518_v22  ;;  %v3571_v22 = vld [vmem:[%s4026_s21 + $0x360] sm:$0xff]  }
  0xae   : > { %3090 = vmatpush3.bf16.msra.mxu1 %v3520_v23  ;;  %3097 = vmatprep.subr.bf16.mxu0 %v3521_v25  ;;  %v3573_v23 = vld [vmem:[%s4026_s21 + $0x3e0] sm:$0xff]  }
  0xaf   : > { %3119 = vmatprep.subr.bf16.mxu1 %v3524_v26  ;;  %v3574_v25 = vld [vmem:[%s4026_s21 + $0x3a0] sm:$0xff]   ;;  %v3575_v26 = vld [vmem:[%s4026_s21 + $0x368] sm:$0xff]  }
  0xb0   : > { %2172 = vmatmul.mubr.bf16.vlgmr.msra.gmra.mrb[4].mxu0 %v438_v28  ;;  %v3576_v28 = vld [vmem:[%s4026_s21 + $0x328] sm:$0xff]  }
  0xb1   : > { %2212 = vmatmul.mubr.bf16.vlgmr.msra.gmra.mrb[4].mxu1 %v440_v29  ;;  %3098 = vmatpush3.bf16.msra.mxu0 %v3523_v27  ;;  %v3577_v27 = vld [vmem:[%s4026_s21 + $0x3e8] sm:$0xff]  }
  0xb2   : > { %3120 = vmatpush3.bf16.msra.mxu1 %v3525_v30  ;;  %3099 = vmatprep.subr.bf16.mxu0 %v3526_v31  ;;  %v3578_v29 = vld [vmem:[%s4026_s21 + $0x3a8] sm:$0xff]   ;;  %v3579_v30 = vld [vmem:[%s4026_s21 + $0x370] sm:$0xff]  }
  0xb3   : > { %3121 = vmatprep.subr.bf16.mxu1 %v3528_v32  ;;  %2251 = vmatprep.mubr.bf16.mxu0 %v443_v63  ;;  %v3581_v31 = vld [vmem:[%s4026_s21 + $0x3f0] sm:$0xff]   ;;  %v3601_v63 = vld [vmem:[%s4026_s21 + $0x418] sm:$0xff]  }
  0xb4   : > { %2291 = vmatprep.mubr.bf16.mxu1 %v445_v3  ;;  %v289_v32 = vld [vmem:[%s4040_s15 + $0x18] sm:$0xff]  ;;  %v3605_v3 = vld [vmem:[%s4026_s21 + $0x420] sm:$0xff]  }
  0xb5   : > { %3100 = vmatpush3.bf16.msra.mxu0 %v3527_v33  ;;  %v3580_v33 = vld [vmem:[%s4026_s21 + $0x330] sm:$0xff]  }
  0xb6   : > { %3122 = vmatpush3.bf16.msra.mxu1 %v3529_v34  ;;  %3101 = vmatprep.subr.bf16.mxu0 %v3530_v35  ;;  %v358_v34 = vrot.slane %v289_v32, %v4079_v42  ;;  %v351_v35 = vcombine.high %v289_v32, %v289_v32  ;;  %v3627_v32 = vld [vmem:[%s4026_s21 + $0x5c8] sm:$0xff]  }
  0xb7   : > { %3123 = vmatprep.subr.bf16.mxu1 %v3532_v36  ;;  %v3582_v36 = vld [vmem:[%s4026_s21 + $0x3b0] sm:$0xff]  }
  0xb9   : > { %3102 = vmatpush3.bf16.msra.mxu0 %v3531_v37  ;;  %v3583_v37 = vld [vmem:[%s4026_s21 + $0x378] sm:$0xff]  }
  0xba   : > { %3124 = vmatpush3.bf16.msra.mxu1 %v3533_v38  ;;  %3103 = vmatprep.subr.bf16.mxu0 %v3534_v39  ;;  %v366_v38 = vcombine.high %v358_v34, %v358_v34  ;;  %v365_v39 = vrot.slane %v351_v35, %v4079_v42  ;;  %v3629_v35 = vld [vmem:[%s4026_s21 + $0x550] sm:$0xff]  }
  0xbb   : > { %3125 = vmatprep.subr.bf16.mxu1 %v3536_v40  ;;  %v3585_v40 = vld [vmem:[%s4026_s21 + $0x3f8] sm:$0xff]  }
  0xbd   : > { %3104 = vmatpush3.bf16.msra.mxu0 %v3535_v41  ;;  %v3584_v41 = vld [vmem:[%s4026_s21 + $0x338] sm:$0xff]  }
  0xbe   : > { %3126 = vmatpush3.bf16.msra.mxu1 %v3537_v43  ;;  %3105 = vmatprep.subr.bf16.mxu0 %v3538_v44  ;;  %v447_v43 = vpack.c.bf16 %v366_v38, %v366_v38  ;;  %v367_v44 = vcombine.high %v365_v39, %v365_v39  ;;  %v3632_v38 = vld [vmem:[%s4026_s21 + $0x590] sm:$0xff]  }
  0xbf   : > { %3127 = vmatprep.subr.bf16.mxu1 %v3540_v45  ;;  %v3586_v45 = vld [vmem:[%s4026_s21 + $0x3b8] sm:$0xff]  }
  0xc1   : > { %3106 = vmatpush3.bf16.msra.mxu0 %v3539_v46  ;;  %v3587_v46 = vld [vmem:[%s4026_s21 + $0x440] sm:$0xff]  }
  0xc2   : > { %3128 = vmatpush3.bf16.msra.mxu1 %v3541_v47  ;;  %3107 = vmatprep.subr.bf16.mxu0 %v3542_v48  ;;  %v449_v47 = vpack.c.bf16 %v367_v44, %v367_v44  ;;  %v3590_v48 = vld [vmem:[%s4026_s21 + $0x4c0] sm:$0xff]  }
  0xc3   : > { %3129 = vmatprep.subr.bf16.mxu1 %v3544_v49  ;;  %v3589_v49 = vld [vmem:[%s4026_s21 + $0x400] sm:$0xff]  }
  0xc4   : > { %v3637_v44 = vld [vmem:[%s4026_s21 + $0x560] sm:$0xff]  }
  0xc5   : > { %3108 = vmatpush3.bf16.msra.mxu0 %v3543_v50  ;;  %v446_v50 = vpack.c.bf16 %v358_v34, %v358_v34  ;;  %v3628_v34 = vld [vmem:[%s4026_s21 + $0x588] sm:$0xff]  }
  0xc6   : > { %3130 = vmatpush3.bf16.msra.mxu1 %v3545_v51  ;;  %3109 = vmatprep.subr.bf16.mxu0 %v3546_v52  ;;  %v448_v51 = vpack.c.bf16 %v365_v39, %v365_v39  ;;  %v3591_v52 = vld [vmem:[%s4026_s21 + $0x480] sm:$0xff]   ;;  %v3633_v39 = vld [vmem:[%s4026_s21 + $0x558] sm:$0xff]  }
  0xc7   : > { %3131 = vmatprep.subr.bf16.mxu1 %v3548_v54  ;;  %v3594_v54 = vld [vmem:[%s4026_s21 + $0x4c8] sm:$0xff]  }
  0xc9   : > { %3110 = vmatpush3.bf16.msra.mxu0 %v3547_v57  ;;  %v3596_v57 = vld [vmem:[%s4026_s21 + $0x450] sm:$0xff]  }
  0xca   : > { %3132 = vmatpush3.bf16.msra.mxu1 %v3549_v58  ;;  %3111 = vmatprep.subr.bf16.mxu0 %v3550_v61  ;;  %v3598_v58 = vld [vmem:[%s4026_s21 + $0x4d0] sm:$0xff]   ;;  %v3600_v61 = vld [vmem:[%s4026_s21 + $0x458] sm:$0xff]  }
  0xcb   : > { %3133 = vmatprep.subr.bf16.mxu1 %v3552_v62  ;;  %v3602_v62 = vld [vmem:[%s4026_s21 + $0x4d8] sm:$0xff]  }
  0xcd   : > { %3112 = vmatpush3.bf16.msra.mxu0 %v3551_v1  ;;  %v3604_v1 = vld [vmem:[%s4026_s21 + $0x460] sm:$0xff]  }
  0xce   : > { %3134 = vmatpush3.bf16.msra.mxu1 %v3553_v2  ;;  %3141 = vmatprep.subr.bf16.mxu0 %v3554_v4  ;;  %v3606_v2 = vld [vmem:[%s4026_s21 + $0x4e0] sm:$0xff]  }
  0xcf   : > { %3163 = vmatprep.subr.bf16.mxu1 %v3557_v5  ;;  %v3607_v4 = vld [vmem:[%s4026_s21 + $0x4a0] sm:$0xff]   ;;  %v3608_v5 = vld [vmem:[%s4026_s21 + $0x468] sm:$0xff]  }
  0xd0   : > { %2252 = vmatmul.mubr.bf16.vlgmr.msra.gmra.mrb[8].mxu0 %v442_v7  ;;  %v3609_v7 = vld [vmem:[%s4026_s21 + $0x428] sm:$0xff]  }
  0xd1   : > { %2292 = vmatmul.mubr.bf16.vlgmr.msra.gmra.mrb[8].mxu1 %v444_v8  ;;  %3142 = vmatpush3.bf16.msra.mxu0 %v3556_v6  ;;  %v3610_v6 = vld [vmem:[%s4026_s21 + $0x4e8] sm:$0xff]  }
  0xd2   : > { %3164 = vmatpush3.bf16.msra.mxu1 %v3558_v9  ;;  %3143 = vmatprep.subr.bf16.mxu0 %v3559_v10  ;;  %v3611_v8 = vld [vmem:[%s4026_s21 + $0x4a8] sm:$0xff]   ;;  %v3612_v9 = vld [vmem:[%s4026_s21 + $0x470] sm:$0xff]  }
  0xd3   : > { %3165 = vmatprep.subr.bf16.mxu1 %v3561_v11  ;;  %2331 = vmatprep.mubr.bf16.mxu0 %v447_v43  ;;  %v3614_v10 = vld [vmem:[%s4026_s21 + $0x4f0] sm:$0xff]   ;;  %v290_v11 = vld [vmem:[%s4040_s15 + $0x20] sm:$0xff] }
  0xd4   : > { %2371 = vmatprep.mubr.bf16.mxu1 %v449_v47  ;;  %v3636_v43 = vld [vmem:[%s4026_s21 + $0x598] sm:$0xff]   ;;  %v3640_v47 = vld [vmem:[%s4026_s21 + $0x5a0] sm:$0xff]  }
  0xd5   : > { %3144 = vmatpush3.bf16.msra.mxu0 %v3560_v12  ;;  %v3613_v12 = vld [vmem:[%s4026_s21 + $0x430] sm:$0xff]  }
  0xd6   : > { %3166 = vmatpush3.bf16.msra.mxu1 %v3562_v13  ;;  %3145 = vmatprep.subr.bf16.mxu0 %v3563_v14  ;;  %v375_v13 = vrot.slane %v290_v11, %v4079_v42  ;;  %v368_v14 = vcombine.high %v290_v11, %v290_v11  ;;  %v3659_v11 = vld [vmem:[%s4026_s21 + $0x628] sm:$0xff]  }
  0xd7   : > { %3167 = vmatprep.subr.bf16.mxu1 %v3565_v15  ;;  %v3615_v15 = vld [vmem:[%s4026_s21 + $0x4b0] sm:$0xff]  }
  0xd9   : > { %3146 = vmatpush3.bf16.msra.mxu0 %v3564_v16  ;;  %v3616_v16 = vld [vmem:[%s4026_s21 + $0x478] sm:$0xff]  }
  0xda   : > { %3168 = vmatpush3.bf16.msra.mxu1 %v3566_v17  ;;  %3147 = vmatprep.subr.bf16.mxu0 %v3567_v18  ;;  %v383_v17 = vcombine.high %v375_v13, %v375_v13  ;;  %v382_v18 = vrot.slane %v368_v14, %v4079_v42  ;;  %v2800_v14 = vld.sshfl [vmem:[%s4040_s15 + $0x30] sm:$0x3 pattern:$0x76325410] }
  0xdb   : > { %3169 = vmatprep.subr.bf16.mxu1 %v3569_v19  ;;  %v3618_v19 = vld [vmem:[%s4026_s21 + $0x4f8] sm:$0xff]  }
  0xdd   : > { %3148 = vmatpush3.bf16.msra.mxu0 %v3568_v20  ;;  %v3617_v20 = vld [vmem:[%s4026_s21 + $0x438] sm:$0xff]  }
  0xde   : > { %3170 = vmatpush3.bf16.msra.mxu1 %v3570_v21  ;;  %3149 = vmatprep.subr.bf16.mxu0 %v3571_v22  ;;  %v451_v21 = vpack.c.bf16 %v383_v17, %v383_v17  ;;  %v384_v22 = vcombine.high %v382_v18, %v382_v18 }
  0xdf   : > { %3171 = vmatprep.subr.bf16.mxu1 %v3573_v23  ;;  %v3619_v23 = vld [vmem:[%s4026_s21 + $0x4b8] sm:$0xff]  }
  0xe1   : > { %3150 = vmatpush3.bf16.msra.mxu0 %v3572_v24  ;;  %v3620_v24 = vld [vmem:[%s4026_s21 + $0x540] sm:$0xff]  }
  0xe2   : > { %3172 = vmatpush3.bf16.msra.mxu1 %v3574_v25  ;;  %3151 = vmatprep.subr.bf16.mxu0 %v3575_v26  ;;  %v453_v25 = vpack.c.bf16 %v384_v22, %v384_v22  ;;  %v3623_v26 = vld [vmem:[%s4026_s21 + $0x5c0] sm:$0xff]  }
  0xe3   : > { %3173 = vmatprep.subr.bf16.mxu1 %v3577_v27  ;;  %v3622_v27 = vld [vmem:[%s4026_s21 + $0x500] sm:$0xff]  }
  0xe5   : > { %3152 = vmatpush3.bf16.msra.mxu0 %v3576_v28  ;;  %v450_v28 = vpack.c.bf16 %v375_v13, %v375_v13  ;;  %v3661_v13 = vld [vmem:[%s4026_s21 + $0x638] sm:$0xff]  }
  0xe6   : > { %3174 = vmatpush3.bf16.msra.mxu1 %v3578_v29  ;;  %3153 = vmatprep.subr.bf16.mxu0 %v3579_v30  ;;  %v452_v29 = vpack.c.bf16 %v382_v18, %v382_v18  ;;  %v3624_v30 = vld [vmem:[%s4026_s21 + $0x580] sm:$0xff]  }
  0xe7   : > { %3175 = vmatprep.subr.bf16.mxu1 %v3581_v31  ;;  %v3625_v31 = vld [vmem:[%s4026_s21 + $0x548] sm:$0xff]  }
  0xe9   : > { %3154 = vmatpush3.bf16.msra.mxu0 %v3580_v33  ;;  %v3626_v33 = vld [vmem:[%s4026_s21 + $0x508] sm:$0xff]  }
  0xea   : > { %3176 = vmatpush3.bf16.msra.mxu1 %v3582_v36  ;;  %3155 = vmatprep.subr.bf16.mxu0 %v3583_v37  ;;  %v3631_v36 = vld [vmem:[%s4026_s21 + $0x5d0] sm:$0xff]  }
  0xeb   : > { %3177 = vmatprep.subr.bf16.mxu1 %v3585_v40  ;;  %v3630_v37 = vld [vmem:[%s4026_s21 + $0x510] sm:$0xff]   ;;  %v3635_v40 = vld [vmem:[%s4026_s21 + $0x5d8] sm:$0xff]  }
  0xed   : > { %3156 = vmatpush3.bf16.msra.mxu0 %v3584_v41  ;;  %v3634_v41 = vld [vmem:[%s4026_s21 + $0x518] sm:$0xff]  }
  0xee   : > { %3178 = vmatpush3.bf16.msra.mxu1 %v3586_v45  ;;  %3185 = vmatprep.subr.bf16.mxu0 %v3587_v46  ;;  %v3639_v45 = vld [vmem:[%s4026_s21 + $0x5e0] sm:$0xff]  }
  0xef   : > { %3207 = vmatprep.subr.bf16.mxu1 %v3590_v48  ;;  %v3638_v46 = vld [vmem:[%s4026_s21 + $0x520] sm:$0xff]   ;;  %v3641_v48 = vld [vmem:[%s4026_s21 + $0x568] sm:$0xff]  }
  0xf0   : > { %2332 = vmatmul.mubr.bf16.vlgmr.msra.gmra.mrb[12].mxu0 %v446_v50  ;;  %v3642_v50 = vld [vmem:[%s4026_s21 + $0x528] sm:$0xff]  }
  0xf1   : > { %2372 = vmatmul.mubr.bf16.vlgmr.msra.gmra.mrb[12].mxu1 %v448_v51  ;;  %3186 = vmatpush3.bf16.msra.mxu0 %v3589_v49  ;;  %v3643_v49 = vld [vmem:[%s4026_s21 + $0x5e8] sm:$0xff]  }
  0xf2   : > { %3208 = vmatpush3.bf16.msra.mxu1 %v3591_v52  ;;  %3187 = vmatprep.subr.bf16.mxu0 %v3592_v53  ;;  %v3644_v51 = vld [vmem:[%s4026_s21 + $0x5a8] sm:$0xff]   ;;  %v3645_v52 = vld [vmem:[%s4026_s21 + $0x570] sm:$0xff]  }
  0xf3   : > { %3209 = vmatprep.subr.bf16.mxu1 %v3594_v54  ;;  %2411 = vmatprep.mubr.bf16.mxu0 %v451_v21  ;;  %v3647_v53 = vld [vmem:[%s4026_s21 + $0x5f0] sm:$0xff]   ;;  %v291_v54 = vld [vmem:[%s4040_s15 + $0x28] sm:$0xff] }
  0xf4   : > { %2451 = vmatprep.mubr.bf16.mxu1 %v453_v25 }
  0xf5   : > { %3188 = vmatpush3.bf16.msra.mxu0 %v3593_v55  ;;  %v3646_v55 = vld [vmem:[%s4026_s21 + $0x530] sm:$0xff]  }
  0xf6   : > { %3210 = vmatpush3.bf16.msra.mxu1 %v3595_v56  ;;  %3189 = vmatprep.subr.bf16.mxu0 %v3596_v57  ;;  %v392_v56 = vrot.slane %v291_v54, %v4079_v42  ;;  %v385_v57 = vcombine.high %v291_v54, %v291_v54 }
  0xf7   : > { %3211 = vmatprep.subr.bf16.mxu1 %v3598_v58  ;;  %v3648_v58 = vld [vmem:[%s4026_s21 + $0x5b0] sm:$0xff]  }
  0xf9   : > { %3190 = vmatpush3.bf16.msra.mxu0 %v3597_v59  ;;  %v3649_v59 = vld [vmem:[%s4026_s21 + $0x578] sm:$0xff]  }
  0xfa   : > { %3212 = vmatpush3.bf16.msra.mxu1 %v3599_v60  ;;  %3191 = vmatprep.subr.bf16.mxu0 %v3600_v61  ;;  %v400_v60 = vcombine.high %v392_v56, %v392_v56  ;;  %v399_v61 = vrot.slane %v385_v57, %v4079_v42  ;;  %v3654_v42 = vld [vmem:[%s4026_s21 + $0x600] sm:$0xff]  }
  0xfb   : > { %3213 = vmatprep.subr.bf16.mxu1 %v3602_v62  ;;  %v3651_v62 = vld [vmem:[%s4026_s21 + $0x5f8] sm:$0xff]  }
  0xfd   : > { %3192 = vmatpush3.bf16.msra.mxu0 %v3601_v63  ;;  %v455_v63 = vpack.c.bf16 %v400_v60, %v400_v60 }
  0xfe   : > { %3214 = vmatpush3.bf16.msra.mxu1 %v3603_v0  ;;  %3193 = vmatprep.subr.bf16.mxu0 %v3604_v1  ;;  %v401_v0 = vcombine.high %v399_v61, %v399_v61  ;;  %v3650_v1 = vld [vmem:[%s4026_s21 + $0x538] sm:$0xff]  }
  0xff   : > { %3215 = vmatprep.subr.bf16.mxu1 %v3606_v2  ;;  %v3652_v2 = vld [vmem:[%s4026_s21 + $0x5b8] sm:$0xff]  }
 0x101   : > { %3194 = vmatpush3.bf16.msra.mxu0 %v3605_v3  ;;  %v457_v3 = vpack.c.bf16 %v401_v0, %v401_v0 }
 0x102   : > { %3216 = vmatpush3.bf16.msra.mxu1 %v3607_v4  ;;  %3195 = vmatprep.subr.bf16.mxu0 %v3608_v5  ;;  %v454_v4 = vpack.c.bf16 %v392_v56, %v392_v56  ;;  %v456_v5 = vpack.c.bf16 %v399_v61, %v399_v61 }
 0x103   : > { %3217 = vmatprep.subr.bf16.mxu1 %v3610_v6  ;;  %v3829_v6 = vmov 0.0  }
 0x105   : > { %3196 = vmatpush3.bf16.msra.mxu0 %v3609_v7  ;;  %v3655_v7 = vld [vmem:[%s4026_s21 + $0x608] sm:$0xff]  }
 0x106   : > { %3218 = vmatpush3.bf16.msra.mxu1 %v3611_v8  ;;  %3197 = vmatprep.subr.bf16.mxu0 %v3612_v9  ;;  %v3656_v8 = vld [vmem:[%s4026_s21 + $0x610] sm:$0xff]   ;;  %v3657_v9 = vld [vmem:[%s4026_s21 + $0x618] sm:$0xff]  }
 0x107   : > { %3219 = vmatprep.subr.bf16.mxu1 %v3614_v10  ;;  %v3658_v10 = vld [vmem:[%s4026_s21 + $0x620] sm:$0xff]  }
 0x109   : > { %3198 = vmatpush3.bf16.msra.mxu0 %v3613_v12  ;;  %v3660_v12 = vld [vmem:[%s4026_s21 + $0x630] sm:$0xff]  }
 0x10a   : > { %3220 = vmatpush3.bf16.msra.mxu1 %v3615_v15  ;;  %3199 = vmatprep.subr.bf16.mxu0 %v3616_v16  ;;  %v458_v15 = vpack.c.bf16 %v2800_v14, %v2800_v14 }
 0x10b   : > { %3221 = vmatprep.subr.bf16.mxu1 %v3618_v19 }
 0x10d   : > { %3200 = vmatpush3.bf16.msra.mxu0 %v3617_v20 }
 0x10e   : > { %3222 = vmatpush3.bf16.msra.mxu1 %v3619_v23  ;;  %3229 = vmatprep.subr.bf16.mxu0 %v3620_v24 }
 0x10f   : > { %3251 = vmatprep.subr.bf16.mxu1 %v3623_v26 }
 0x110   : > { %2412 = vmatmul.mubr.bf16.vlgmr.msra.gmra.mrb[16].mxu0 %v450_v28 }
 0x111   : > { %2452 = vmatmul.mubr.bf16.vlgmr.msra.gmra.mrb[16].mxu1 %v452_v29  ;;  %3230 = vmatpush3.bf16.msra.mxu0 %v3622_v27 }
 0x112   : > { %3252 = vmatpush3.bf16.msra.mxu1 %v3624_v30  ;;  %3231 = vmatprep.subr.bf16.mxu0 %v3625_v31 }
 0x113   : > { %3253 = vmatprep.subr.bf16.mxu1 %v3627_v32  ;;  %2491 = vmatprep.mubr.bf16.mxu0 %v455_v63 }
 0x114   : > { %2531 = vmatprep.mubr.bf16.mxu1 %v457_v3 }
 0x115   : > { %3232 = vmatpush3.bf16.msra.mxu0 %v3626_v33 }
 0x116   : > { %3254 = vmatpush3.bf16.msra.mxu1 %v3628_v34  ;;  %3233 = vmatprep.subr.bf16.mxu0 %v3629_v35 }
 0x117   : > { %3255 = vmatprep.subr.bf16.mxu1 %v3631_v36 }
 0x119   : > { %3234 = vmatpush3.bf16.msra.mxu0 %v3630_v37 }
 0x11a   : > { %3256 = vmatpush3.bf16.msra.mxu1 %v3632_v38  ;;  %3235 = vmatprep.subr.bf16.mxu0 %v3633_v39 }
 0x11b   : > { %3257 = vmatprep.subr.bf16.mxu1 %v3635_v40 }
 0x11d   : > { %3236 = vmatpush3.bf16.msra.mxu0 %v3634_v41 }
 0x11e   : > { %3258 = vmatpush3.bf16.msra.mxu1 %v3636_v43  ;;  %3237 = vmatprep.subr.bf16.mxu0 %v3637_v44 }
 0x11f   : > { %3259 = vmatprep.subr.bf16.mxu1 %v3639_v45 }
 0x121   : > { %3238 = vmatpush3.bf16.msra.mxu0 %v3638_v46 }
 0x122   : > { %3260 = vmatpush3.bf16.msra.mxu1 %v3640_v47  ;;  %3239 = vmatprep.subr.bf16.mxu0 %v3641_v48 }
 0x123   : > { %3261 = vmatprep.subr.bf16.mxu1 %v3643_v49 }
 0x125   : > { %3240 = vmatpush3.bf16.msra.mxu0 %v3642_v50 }
 0x126   : > { %3262 = vmatpush3.bf16.msra.mxu1 %v3644_v51  ;;  %3241 = vmatprep.subr.bf16.mxu0 %v3645_v52 }
 0x127   : > { %3263 = vmatprep.subr.bf16.mxu1 %v3647_v53 }
 0x129   : > { %3242 = vmatpush3.bf16.msra.mxu0 %v3646_v55 }
 0x12a   : > { %3264 = vmatpush3.bf16.msra.mxu1 %v3648_v58  ;;  %3243 = vmatprep.subr.bf16.mxu0 %v3649_v59 }
 0x12b   : > { %3265 = vmatprep.subr.bf16.mxu1 %v3651_v62 }
 0x12d   : > { %3244 = vmatpush3.bf16.msra.mxu0 %v3650_v1 }
 0x12e   : > { %3266 = vmatpush3.bf16.msra.mxu1 %v3652_v2  ;;  %3299 = vmatprep.subr.bf16.mxu0 %v3829_v6 }
 0x130   : > { %2492 = vmatmul.mubr.bf16.vlgmr.msra.gmra.mrb[20].mxu0 %v454_v4 }
 0x131   : > { %2532 = vmatmul.mubr.bf16.vlgmr.msra.gmra.mrb[20].mxu1 %v456_v5  ;;  %3300 = vmatpush3.bf16.msra.mxu0 %v3654_v42 }
 0x132   : > { %3315 = vmatprep.mubr.msk.bf16.mxu0 %vm3830_vm0, %v3829_v6  ;;  %3301 = vmatprep.subr.bf16.mxu0 %v3829_v6 }
 0x135   : > { %3302 = vmatpush3.bf16.msra.mxu0 %v3655_v7 }
 0x136   : > { %3303 = vmatprep.subr.bf16.mxu0 %v3829_v6 }
 0x139   : > { %3304 = vmatpush3.bf16.msra.mxu0 %v3656_v8 }
 0x13a   : > { %3305 = vmatprep.subr.bf16.mxu0 %v3829_v6 }
 0x13d   : > { %3306 = vmatpush3.bf16.msra.mxu0 %v3657_v9 }
 0x13e   : > { %3307 = vmatprep.subr.bf16.mxu0 %v3829_v6 }
 0x141   : > { %3308 = vmatpush3.bf16.msra.mxu0 %v3658_v10 }
 0x142   : > { %3309 = vmatprep.subr.bf16.mxu0 %v3829_v6 }
 0x145   : > { %3310 = vmatpush3.bf16.msra.mxu0 %v3659_v11 }
 0x146   : > { %3311 = vmatprep.subr.bf16.mxu0 %v3829_v6 }
 0x149   : > { %3312 = vmatpush3.bf16.msra.mxu0 %v3660_v12 }
 0x14a   : > { %3313 = vmatprep.subr.bf16.mxu0 %v3829_v6 }
 0x14d   : > { %3314 = vmatpush3.bf16.msra.mxu0 %v3661_v13 }
 0x150   : > { %3316 = vmatmul.mubr.bf16.vlgmr.msra.gmra.mrb[24].mxu0 %v458_v15 }
 0x163   : > { %v3025_v16 = vpop.f32.mrb[0].mxu0 }
 0x164   : > { %v3047_v17 = vpop.f32.mrb[0].mxu1  ;;  %v3026_v18 = vpop.f32.mrb[1].mxu0 }
 0x165   : > { %v3048_v19 = vpop.f32.mrb[1].mxu1  ;;  %v3027_v20 = vadd.f32 %v3026_v18, %v3025_v16  ;;  %v3028_v22 = vpop.f32.mrb[2].mxu0 }
 0x166   : > { %v3049_v21 = vadd.f32 %v3048_v19, %v3047_v17  ;;  %v3050_v23 = vpop.f32.mrb[2].mxu1  ;;  %v3029_v24 = vpop.f32.mrb[3].mxu0 }
 0x167   : > { %v3051_v25 = vpop.f32.mrb[3].mxu1  ;;  %v285_v23 = vld [vmem:[#allocation2] sm:$0x3] }
 0x168   : > { %v2134_v26 = vadd.f32 %v3049_v21, %v3027_v20 }
 0x183   : > { %v3069_v27 = vpop.f32.mrb[4].mxu0 }
 0x184   : > { %v3091_v28 = vpop.f32.mrb[4].mxu1  ;;  %v3070_v29 = vpop.f32.mrb[5].mxu0 }
 0x185   : > { %v3092_v30 = vpop.f32.mrb[5].mxu1  ;;  %v3071_v31 = vadd.f32 %v3070_v29, %v3069_v27  ;;  %v3072_v32 = vpop.f32.mrb[6].mxu0 }
 0x186   : > { %v3093_v33 = vadd.f32 %v3092_v30, %v3091_v28  ;;  %v3094_v34 = vpop.f32.mrb[6].mxu1  ;;  %v3073_v35 = vpop.f32.mrb[7].mxu0  ;;  %v2595_v30 = vld [vmem:[%s4356_s3] sm:$0xff] (!%p3001_p6)  ;;  %v2597_v32 = vld [vmem:[%s4356_s3 + $0x10] sm:$0xff] (!%p3001_p6) }
 0x187   : > { %v3095_v36 = vpop.f32.mrb[7].mxu1  ;;  %v2174_v37 = vadd.f32 %v3071_v31, %v2134_v26  ;;  %v2596_v31 = vld [vmem:[%s4356_s3 + $0x8] sm:$0xff] (!%p3001_p6)  ;;  %v2598_v35 = vld [vmem:[%s4356_s3 + $0x18] sm:$0xff] (!%p3001_p6) }
 0x188   : > { %v3355_v34 = vpack.c.bf16 (!%p3001_p6), %v2596_v31, %v2595_v30  ;;  %v3833_v36 = vmov (!%p3001_p6), 0.0  }
 0x189   : > { %v2214_v38 = vadd.f32 %v3093_v33, %v2174_v37  ;;  %v3831_v33 = vmov (!%p3001_p6), 0.0|0.0   ;;  %3351 = vmatprep.mubr.msk.f32.mxu0 (!%p3001_p6), %vm3832_vm1, %v3833_v36  ;;  %v3358_v37 = vpack.c.bf16 (!%p3001_p6), %v2598_v35, %v2597_v32 }
 0x18a   : > { %3354 = vmatprep.subr.bf16.mxu0 (!%p3001_p6), %v3831_v33 }
 0x18b   : > { %3356 = vmatpush3.bf16.msra.mxu0 (!%p3001_p6), %v3355_v34 }
 0x18c   : > { %3357 = vmatprep.subr.bf16.mxu0 (!%p3001_p6), %v3831_v33 }
 0x18f   : > { %3359 = vmatpush3.bf16.msra.mxu0 (!%p3001_p6), %v3358_v37 }
 0x190   : > { %3360 = vmatprep.subr.bf16.mxu0 (!%p3001_p6), %v3831_v33 }
 0x1a3   : > { %v3113_v39 = vpop.f32.mrb[8].mxu0 }
 0x1a4   : > { %v3135_v40 = vpop.f32.mrb[8].mxu1  ;;  %v3114_v41 = vpop.f32.mrb[9].mxu0 }
 0x1a5   : > { %v3136_v43 = vpop.f32.mrb[9].mxu1  ;;  %v3115_v44 = vadd.f32 %v3114_v41, %v3113_v39  ;;  %v3116_v45 = vpop.f32.mrb[10].mxu0  ;;  %v2600_v39 = vld [vmem:[%s4356_s3 + $0x28] sm:$0xff] (!%p3001_p6)  ;;  %v2601_v41 = vld [vmem:[%s4356_s3 + $0x30] sm:$0xff] (!%p3001_p6) }
 0x1a6   : > { %v3137_v46 = vadd.f32 %v3136_v43, %v3135_v40  ;;  %v3138_v47 = vpop.f32.mrb[10].mxu1  ;;  %v3117_v48 = vpop.f32.mrb[11].mxu0  ;;  %v2602_v43 = vld [vmem:[%s4356_s3 + $0x38] sm:$0xff] (!%p3001_p6)  ;;  %v2603_v45 = vld [vmem:[%s4356_s3 + $0x40] sm:$0xff] (!%p3001_p6) }
 0x1a7   : > { %v3139_v49 = vpop.f32.mrb[11].mxu1  ;;  %v2254_v50 = vadd.f32 %v3115_v44, %v2214_v38  ;;  %v2599_v38 = vld [vmem:[%s4356_s3 + $0x20] sm:$0xff] (!%p3001_p6)  ;;  %v3364_v44 = vpack.c.bf16 (!%p3001_p6), %v2602_v43, %v2601_v41  ;;  %v2605_v48 = vld [vmem:[%s4356_s3 + $0x50] sm:$0xff] (!%p3001_p6) }
 0x1a8   : > { %v3361_v40 = vpack.c.bf16 (!%p3001_p6), %v2600_v39, %v2599_v38  ;;  %v2606_v49 = vld [vmem:[%s4356_s3 + $0x58] sm:$0xff] (!%p3001_p6) }
 0x1a9   : > { %v2294_v51 = vadd.f32 %v3137_v46, %v2254_v50  ;;  %v2604_v46 = vld [vmem:[%s4356_s3 + $0x48] sm:$0xff] (!%p3001_p6)  ;;  %v3370_v50 = vpack.c.bf16 (!%p3001_p6), %v2606_v49, %v2605_v48 }
 0x1aa   : > { %3362 = vmatpush3.bf16.msra.mxu0 (!%p3001_p6), %v3361_v40  ;;  %v3367_v47 = vpack.c.bf16 (!%p3001_p6), %v2604_v46, %v2603_v45 }
 0x1ab   : > { %3363 = vmatprep.subr.bf16.mxu0 (!%p3001_p6), %v3831_v33 }
 0x1ae   : > { %3365 = vmatpush3.bf16.msra.mxu0 (!%p3001_p6), %v3364_v44 }
 0x1af   : > { %3366 = vmatprep.subr.bf16.mxu0 (!%p3001_p6), %v3831_v33 }
 0x1b2   : > { %3368 = vmatpush3.bf16.msra.mxu0 (!%p3001_p6), %v3367_v47 }
 0x1b3   : > { %3369 = vmatprep.subr.bf16.mxu0 (!%p3001_p6), %v3831_v33 }
 0x1b6   : > { %3371 = vmatpush3.bf16.msra.mxu0 (!%p3001_p6), %v3370_v50 }
 0x1b7   : > { %3372 = vmatprep.subr.bf16.mxu0 (!%p3001_p6), %v3831_v33 }
 0x1c3   : > { %v3157_v52 = vpop.f32.mrb[12].mxu0 }
 0x1c4   : > { %v3179_v53 = vpop.f32.mrb[12].mxu1  ;;  %v3158_v54 = vpop.f32.mrb[13].mxu0 }
 0x1c5   : > { %v3180_v55 = vpop.f32.mrb[13].mxu1  ;;  %v3159_v56 = vadd.f32 %v3158_v54, %v3157_v52  ;;  %v3160_v57 = vpop.f32.mrb[14].mxu0  ;;  %v2608_v52 = vld [vmem:[%s4356_s3 + $0x68] sm:$0xff] (!%p3001_p6) }
 0x1c6   : > { %v3181_v58 = vadd.f32 %v3180_v55, %v3179_v53  ;;  %v3182_v59 = vpop.f32.mrb[14].mxu1  ;;  %v3161_v60 = vpop.f32.mrb[15].mxu0  ;;  %v3002_v55 = vld [vmem:[#allocation6] ss:$0 sm:$0xff] (!%p3001_p6)  ;;  %v2610_v57 = vld [vmem:[%s4356_s3 + $0x78] sm:$0xff] (!%p3001_p6) }
 0x1c7   : > { %v3183_v61 = vpop.f32.mrb[15].mxu1  ;;  %v2334_v62 = vadd.f32 %v3159_v56, %v2294_v51  ;;  %v2607_v51 = vld [vmem:[%s4356_s3 + $0x60] sm:$0xff] (!%p3001_p6)  ;;  %v2609_v56 = vld [vmem:[%s4356_s3 + $0x70] sm:$0xff] (!%p3001_p6) }
 0x1c8   : > { %v3373_v53 = vpack.c.bf16 (!%p3001_p6), %v2608_v52, %v2607_v51  ;;  %v3376_v59 = vpack.c.bf16 (!%p3001_p6), %v2610_v57, %v2609_v56  ;;  %v3003_v61 = vld [vmem:[#allocation8] ss:$0 sm:$0xff] (!%p3001_p6) }
 0x1c9   : > { %v2374_v63 = vadd.f32 %v3181_v58, %v2334_v62 }
 0x1ca   : > { %3374 = vmatpush3.bf16.msra.mxu0 (!%p3001_p6), %v3373_v53 }
 0x1cb   : > { %3375 = vmatprep.subr.bf16.mxu0 (!%p3001_p6), %v3831_v33 }
 0x1ce   : > { %3377 = vmatpush3.bf16.msra.mxu0 (!%p3001_p6), %v3376_v59 }
 0x1e3   : > { %v3201_v0 = vpop.f32.mrb[16].mxu0 }
 0x1e4   : > { %v3223_v1 = vpop.f32.mrb[16].mxu1  ;;  %v3202_v2 = vpop.f32.mrb[17].mxu0 }
 0x1e5   : > { %v3224_v3 = vpop.f32.mrb[17].mxu1  ;;  %v3203_v4 = vadd.f32 %v3202_v2, %v3201_v0  ;;  %v3204_v5 = vpop.f32.mrb[18].mxu0 }
 0x1e6   : > { %v3225_v42 = vadd.f32 %v3224_v3, %v3223_v1  ;;  %v3226_v6 = vpop.f32.mrb[18].mxu1  ;;  %v3205_v7 = vpop.f32.mrb[19].mxu0 }
 0x1e7   : > { %v3227_v8 = vpop.f32.mrb[19].mxu1  ;;  %v2414_v9 = vadd.f32 %v3203_v4, %v2374_v63 }
 0x1e9   : > { %v2454_v10 = vadd.f32 %v3225_v42, %v2414_v9 }
 0x203   : > { %v3245_v11 = vpop.f32.mrb[20].mxu0 }
 0x204   : > { %v3267_v12 = vpop.f32.mrb[20].mxu1  ;;  %v3246_v13 = vpop.f32.mrb[21].mxu0 }
 0x205   : > { %v3268_v14 = vpop.f32.mrb[21].mxu1  ;;  %v3247_v15 = vadd.f32 %v3246_v13, %v3245_v11  ;;  %v3248_v16 = vpop.f32.mrb[22].mxu0 }
 0x206   : > { %v3269_v17 = vadd.f32 %v3268_v14, %v3267_v12  ;;  %v3270_v18 = vpop.f32.mrb[22].mxu1  ;;  %v3249_v19 = vpop.f32.mrb[23].mxu0 }
 0x207   : > { %v3271_v20 = vpop.f32.mrb[23].mxu1  ;;  %v2494_v21 = vadd.f32 %v3247_v15, %v2454_v10 }
 0x209   : > { %v2534_v22 = vadd.f32 %v3269_v17, %v2494_v21 }
 0x222   : > { %2584 = sbr.rel (%p3001_p6) target bundleno = 1093 (0x445), region = 60 }
 0x223   : > { %v2573_v24 = vpop.f32.mrb[24].mxu0 }
 0x224   : > { %v2574_v25 = vadd.f32 %v2573_v24, %v2534_v22  ;;  %v3317_v26 = vpop.f32.mrb[25].mxu0 }
 0x225   : > { %v2576_v27 = vpop.f32.mrb[26].mxu0 }
 0x226   : > { %v2579_v28 = vadd.f32 %v2574_v25, %v285_v23  ;;  %v3318_v29 = vpop.f32.mrb[27].mxu0 }
 0x228   : > { %2580 = vst [vmem:[#allocation2] sm:$0x3] %v2579_v28 }
 0x22f   : > { %v2585_v54 = vld [vmem:[#allocation2] sm:$0x3] }
 0x230   : > { %v2593_v58 = vadd.f32 %v3002_v55, %v2585_v54 }
 0x232   : > { %v2594_v60 = vmax.f32 %v2593_v58, 0.0 }
 0x234   : > { %3352 = vmatmul.mubr.f32.vlgmr.msra.gmra.mrb[0].mxu0 %v2594_v60 }
 0x307   : > { %v2684_v62 = vpop.f32.mrb[0].mxu0 }
 0x308   : > { %v2685_v63 = vadd.f32 %v3003_v61, %v2684_v62  ;;  %v3353_v0 = vpop.f32.mrb[1].mxu0 }
 0x30a   : > { %v2689_v1 = vsel %vm2688_vm2, %v2685_v63, -inf }
 0x30b   : > { %2690 = vmax.xlane.f32.xlu0 %v2689_v1 }
 0x398   : > { %v2691_v2 = vpop.xlane.xlu0 %2690 }
 0x399   : > { %v2692_v3 = vsub.f32 %v2685_v63, %v2691_v2 }
 0x39b   : > { %v2693_v4 = vmul.f32 1.442695, %v2692_v3 }
 0x39d   : > { %3662 = vpow2.f32 %v2693_v4 }
 0x3a7   : > { %v3663_v5 = vpop.eup %3662 }
 0x3a8   : > { %v2695_v42 = vsel %vm2688_vm2, %v3663_v5, 0.0 }
 0x3a9   : > { %2696 = vadd.xlane.f32.xlu0 %v2695_v42 }
 0x436   : > { %v2697_v6 = vpop.xlane.xlu0 %2696 }
 0x437   : > { %3664 = vrcp.f32 %v2697_v6 }
 0x441   : > { %v3665_v7 = vpop.eup %3664 }
 0x442   : > { %v2699_v8 = vmul.f32 %v3665_v7, %v3663_v5 }
 0x444   : > { %2700 = vst.msk [vmem:[#allocation9] sm:$0x3] %vm2688_vm2, %v2699_v8 }
 0x445 PF: > { %p3410_p7 = scmp.eq.s32.totalorder %s3884_s22, 5  ;;  %s3834_s7 = smov [#allocation9]  }
 0x446   : > { %s2708_s9 = sshll.u32 %s3834_s7, 4  ;;  %s2709_s9 = int_to_ptr.vmem [resolvable:$true] %s2708_s9 }
 0x447   : > { %s3752_s21 = scalar_lea.vmem %s2709_s9, 32  ;;  %p3759_p5 = scmp.lt.s32.totalorder %s2709_s9, %s2709_s9 }
 0x448   : > { %p3753_p11 = scmp.ne.s32.totalorder %s2709_s9, %s3752_s21  ;;  %p3760_p9 = scmp.lt.s32.totalorder %s3752_s21, %s3752_s21 }
 0x44a   : > { %p3754_p12 = pnand %p3753_p11, %p3410_p7  ;;  %p3761_p10 = por %p3760_p9, %p3759_p5 }
 0x44c   : > { %p3755_p13 = pneg %p3754_p12 }
 0x44e   : > { %p3762_p1 = pnand %p3761_p10, %p3755_p13 }
 0x450   : > { %3765 = shalt.err (!%p3762_p1)
}
 0x451   : > { %s3766_s13 = scalar_lea.hbm %s4358_s5, 32 }
 0x452   : > { %p3767_p8 = scmp.ne.s32.totalorder %s4358_s5, %s3766_s13  ;;  %p3772_p3 = scmp.lt.u32.totalorder %s3766_s13, %s4358_s5 }
 0x454   : > { %p3768_p0 = pnand %p3767_p8, %p3410_p7 }
 0x456   : > { %p3769_p2 = pneg %p3768_p0 }
 0x458   : > { %p3774_p4 = pnand %p3772_p3, %p3769_p2 }
 0x45a   : > { %3777 = shalt.err (!%p3774_p4)
}
 0x45b   : > { %3391 = dma.vmem_to_hbm [thread:$0]  (%p3410_p7), %s2709_s9, 32, %s4358_s5, [#allocation5]  }
 0x45c   : > { %3803 = dma.done.wait (%p3410_p7), [#allocation5], 32  }
 0x45d   : > { %3805 = vsyncadd (%p3410_p7), [#allocation5], 4294967264 }
 0x45e PF: > { %p17_p6 = scmp.ge.s32.totalorder %s3887_s23, 8   ;;  %s4374_s18 = smov %s3812_s19 }
 0x45f   : > { %s4375_s19 = smov %s3816_s20  ;;  %s4376_s20 = smov %s3897_s26 }
 0x460   : > { %s4377_s21 = smov %s3887_s23  ;;  %19 = sbr.rel (!%p17_p6) target bundleno = 5 (0x5), region = 96 }
 0x467   :  { %2721 = vsyncpa [#allocation4], 1 }
 0x468   :  { %2723 = vsyncpa [#allocation4 + $0x1], 1 }
 0x469   :  { %2724 = vsyncpa [#allocation7], 1 }
 0x46a   :  { %2725 = vsyncpa [#allocation5], 1 }
 0x46b   :  { %2727 = vsyncpa [#allocation5 + $0x1], 1 }

</bundles_post_ra>
